<compile_context>
chip_gen: v7x
topology: tpu7x:2x2x1
jax: 0.10.0
libtpu: 0.0.40
codegen_flags: <defaults>
</compile_context>

<pallas_src>
import functools

import jax
import jax.numpy as jnp
from jax import lax
from jax.experimental import pallas as pl
from jax.experimental.pallas import tpu as pltpu


# ----------------------------------------------------------------------------
# Fused Pallas kernel: one (batch, time) grid step of the ConvLSTM3D.
# ----------------------------------------------------------------------------
def _convlstm3d_kernel(x_ref, w_ref, b_ref, mask_ref, peep_ref, h_out_ref,
                       h_st, c_st, inp_st, slab_st,
                       *, starts, cin, cout, cpad):
    """Refs:
      x_ref    : (1, 1, Cin, S)   f32   input frame X[b, t]
      w_ref    : (4*Cout, KK*Cp)  bf16  packed per-tap fused-gate weights
      b_ref    : (4*Cout, 1)      f32   conv bias
      mask_ref : (KK, S)          bf16  "same"-padding validity mask per tap
      peep_ref : (3, Cout, S)     f32   peephole weights W_ci / W_cf / W_co
      h_out_ref: (1, 1, Cout, S)  f32   output H[b, t]
    Scratch (persistent across the sequential t axis):
      h_st, c_st : (Cout, S)    f32     recurrent state
      inp_st     : (Cp, S)      bf16    staged conv input [h_prev | x_t | 0]
      slab_st    : (KK*Cp, S)   bf16    stacked shifted+masked conv operand
    """
    t = pl.program_id(1)
    S = h_st.shape[-1]

    @pl.when(t == 0)
    def _init():
        h_st[...] = jnp.zeros_like(h_st)
        c_st[...] = jnp.zeros_like(c_st)
        inp_st[...] = jnp.zeros_like(inp_st)   # keeps channel-pad rows zero

    # Stage the conv input (channels on sublanes); bf16 cast hoisted to once
    # per step.  Channel order [h_prev, x_t, zero-pad] matches the packed
    # weight layout built by the wrapper.
    inp_st[pl.ds(0, cout), :] = h_st[...].astype(jnp.bfloat16)
    inp_st[pl.ds(cout, cin), :] = x_ref[0, 0].astype(jnp.bfloat16)

    inp = inp_st[...]                                      # (Cp, S) bf16
    xx = jnp.concatenate([inp, inp], axis=1)               # (Cp, 2S) wrapped copy

    # Build the stacked "im2col" slab in VMEM: one (Cp, S) block per conv tap,
    # circularly lane-shifted by the tap's flat offset and boundary-masked
    # (implements the conv's zero padding).  Static slices + immediate stores
    # keep per-iteration live ranges bounded.
    for o, st in enumerate(starts):
        shifted = inp if st == 0 else xx[:, st:st + S]
        slab_st[pl.ds(o * cpad, cpad), :] = shifted * mask_ref[pl.ds(o, 1), :]

    # One fused MXU contraction for all four gates: K = KK*Cp.
    acc = jnp.dot(w_ref[...], slab_st[...],
                  preferred_element_type=jnp.float32)       # (4*Cout, S) f32
    acc = acc + b_ref[...]

    c_prev = c_st[...]
    i_lin = acc[0 * cout:1 * cout]
    f_lin = acc[1 * cout:2 * cout]
    g_lin = acc[2 * cout:3 * cout]                          # candidate cell input
    o_lin = acc[3 * cout:4 * cout]

    # Peephole LSTM gate math, all f32 (activation = tanh).
    i_g = jax.nn.sigmoid(i_lin + peep_ref[0] * c_prev)
    f_g = jax.nn.sigmoid(f_lin + peep_ref[1] * c_prev)
    c_new = f_g * c_prev + i_g * jnp.tanh(g_lin)
    o_g = jax.nn.sigmoid(o_lin + peep_ref[2] * c_new)
    h_new = o_g * jnp.tanh(c_new)

    h_st[...] = h_new
    c_st[...] = c_new
    h_out_ref[0, 0] = h_new


# ----------------------------------------------------------------------------
# Wrapper: pack weights/masks once, run one fused pallas_call over (B, T).
# ----------------------------------------------------------------------------
def convlstm3d_forward(X, params, *, kernel_size, padding):
    """X: (B, Cin, T, D, H, W) -> (B, Cout, T, D, H, W)."""
    B, Cin, T, D, H, W = X.shape
    Cout = params['W_ci'].shape[0]
    k = kernel_size
    assert 2 * padding == k - 1, "ConvLSTM3D assumes a 'same' convolution"
    S = D * H * W
    C = Cin + Cout
    KK = k ** 3
    Cp = -(-C // 16) * 16          # pad fused input channels to bf16 sublane packing

    # Per-tap flat lane offsets ((kd,kh,kw) row-major, matching the weight
    # reshape) -> static slice starts into the doubled buffer.
    starts = tuple(
        ((kd - padding) * H * W + (kh - padding) * W + (kw - padding)) % S
        for kd in range(k) for kh in range(k) for kw in range(k))

    # Packed fused-gate weights (4*Cout, KK*Cp) bf16: input channels reordered
    # to [h, x] (matches the in-kernel staging order) and zero-padded to Cp.
    Wc = params['W_conv'].astype(jnp.float32)                 # (4*Cout, C, k, k, k)
    Wc = jnp.concatenate([Wc[:, Cin:], Wc[:, :Cin]], axis=1)  # [h-ch, x-ch]
    Wc = jnp.pad(Wc, ((0, 0), (0, Cp - C), (0, 0), (0, 0), (0, 0)))
    w_packed = jnp.transpose(Wc.reshape(4 * Cout, Cp, KK), (0, 2, 1))
    w_packed = w_packed.reshape(4 * Cout, KK * Cp).astype(jnp.bfloat16)

    bias = params['b_conv'].reshape(4 * Cout, 1).astype(jnp.float32)

    # Boundary masks implementing the conv's zero padding in the flat layout.
    pos = jnp.arange(S)
    d = pos // (H * W)
    h = (pos // W) % H
    w = pos % W
    rows = []
    for kd in range(k):
        for kh in range(k):
            for kw in range(k):
                dd, dh, dw = kd - padding, kh - padding, kw - padding
                rows.append((d + dd >= 0) & (d + dd < D) &
                            (h + dh >= 0) & (h + dh < H) &
                            (w + dw >= 0) & (w + dw < W))
    mask = jnp.stack(rows).astype(jnp.bfloat16)                # (KK, S), exact 0/1

    # Peephole weights stacked: (3, Cout, S) (pure reshape, no transpose).
    peep = jnp.stack([params['W_ci'], params['W_cf'], params['W_co']])
    peep = peep.reshape(3, Cout, S).astype(jnp.float32)

    # Time-major lane-dense input: (B, T, Cin, S).
    x_seq = jnp.transpose(X.reshape(B, Cin, T, S), (0, 2, 1, 3)).astype(jnp.float32)

    kern = functools.partial(_convlstm3d_kernel, starts=starts,
                             cin=Cin, cout=Cout, cpad=Cp)

    out = pl.pallas_call(
        kern,
        out_shape=jax.ShapeDtypeStruct((B, T, Cout, S), jnp.float32),
        grid_spec=pltpu.PrefetchScalarGridSpec(
            num_scalar_prefetch=0,
            grid=(B, T),
            in_specs=[
                pl.BlockSpec((1, 1, Cin, S), lambda b, t: (b, t, 0, 0)),   # x_t
                pl.BlockSpec((4 * Cout, KK * Cp), lambda b, t: (0, 0)),    # weights (resident)
                pl.BlockSpec((4 * Cout, 1), lambda b, t: (0, 0)),          # bias   (resident)
                pl.BlockSpec((KK, S), lambda b, t: (0, 0)),                # masks  (resident)
                pl.BlockSpec((3, Cout, S), lambda b, t: (0, 0, 0)),        # peephole (resident)
            ],
            out_specs=pl.BlockSpec((1, 1, Cout, S), lambda b, t: (b, t, 0, 0)),
            scratch_shapes=[
                pltpu.VMEM((Cout, S), jnp.float32),        # h state (persistent)
                pltpu.VMEM((Cout, S), jnp.float32),        # c state (persistent)
                pltpu.VMEM((Cp, S), jnp.bfloat16),         # staged conv input
                pltpu.VMEM((KK * Cp, S), jnp.bfloat16),    # stacked tap slab
            ]),
        compiler_params=pltpu.CompilerParams(
            dimension_semantics=("parallel", "arbitrary"),
            vmem_limit_bytes=8 * 1024 * 1024),
    )(x_seq, w_packed, bias, mask, peep)

    # (B, T, Cout, S) -> (B, Cout, T, D, H, W)
    return jnp.transpose(out, (0, 2, 1, 3)).reshape(B, Cout, T, D, H, W)


# ----------------------------------------------------------------------------
# Pure-JAX reference (lax.conv, f32 HIGHEST) for the correctness check.
# ----------------------------------------------------------------------------
def convlstm3d_reference(X, params, *, kernel_size, padding):
    B, Cin, T, D, H, W = X.shape
    Cout = params['W_ci'].shape[0]
    Wc, bc = params['W_conv'], params['b_conv']
    h = jnp.zeros((B, Cout, D, H, W), jnp.float32)
    c = jnp.zeros((B, Cout, D, H, W), jnp.float32)
    outs = []
    for t in range(T):
        inp = jnp.concatenate([X[:, :, t], h], axis=1)
        conv = lax.conv_general_dilated(
            inp, Wc, window_strides=(1, 1, 1),
            padding=[(padding, padding)] * 3,
            dimension_numbers=('NCDHW', 'OIDHW', 'NCDHW'),
            precision=lax.Precision.HIGHEST)
        conv = conv + bc[None, :, None, None, None]
        i_c, f_c, g_c, o_c = jnp.split(conv, 4, axis=1)
        i_g = jax.nn.sigmoid(i_c + params['W_ci'][None] * c)
        f_g = jax.nn.sigmoid(f_c + params['W_cf'][None] * c)
        c = f_g * c + i_g * jnp.tanh(g_c)
        o_g = jax.nn.sigmoid(o_c + params['W_co'][None] * c)
        h = o_g * jnp.tanh(c)
        outs.append(h)
    return jnp.stack(outs, axis=2)


if __name__ == "__main__":
    # X: (batch, in_channels, seq_len, depth, height, width)
    B, Cin, T, D, H, W = 2, 4, 4, 4, 8, 8
    Cout, k, pad = 32, 3, 1                 # out_channels, kernel_size, "same" padding
    frame_size = (D, H, W)

    key = jax.random.PRNGKey(0)
    ks = jax.random.split(key, 6)
    X = jax.random.normal(ks[0], (B, Cin, T, D, H, W), jnp.float32)

    # Deterministic synthetic parameters (shapes per ConvLSTMCell3D.__init__).
    params = dict(
        W_conv=0.05 * jax.random.normal(ks[1], (4 * Cout, Cin + Cout, k, k, k), jnp.float32),
        b_conv=0.05 * jax.random.normal(ks[2], (4 * Cout,), jnp.float32),
        W_ci=0.05 * jax.random.normal(ks[3], (Cout, *frame_size), jnp.float32),
        W_cf=0.05 * jax.random.normal(ks[4], (Cout, *frame_size), jnp.float32),
        W_co=0.05 * jax.random.normal(ks[5], (Cout, *frame_size), jnp.float32),
    )

    fwd = jax.jit(functools.partial(convlstm3d_forward, kernel_size=k, padding=pad))
    out = fwd(X, params)
    jax.block_until_ready(out)
    assert out.shape == (B, Cout, T, D, H, W)

    ref = jax.jit(functools.partial(convlstm3d_reference, kernel_size=k, padding=pad))(X, params)
    jax.block_until_ready(ref)
    max_err = float(jnp.max(jnp.abs(out - ref)))
    # bf16 MXU operands vs the f32 HIGHEST reference over a 972-tap conv and a
    # T-step recurrence -> tolerance covers accumulated bf16 rounding only.
    assert jnp.allclose(out, ref, atol=5e-2, rtol=5e-2), f"max abs err = {max_err}"

    print("KERNEL_OK")
</pallas_src>

<mosaic_0001>
module attributes {stable_mosaic.version = 11 : i64} {
  func.func @_convlstm3d_kernel(%arg0: i32, %arg1: i32, %arg2: memref<1x1x4x256xf32, #tpu.memory_space<vmem>>, %arg3: memref<128x1296xbf16, #tpu.memory_space<vmem>>, %arg4: memref<128x1xf32, #tpu.memory_space<vmem>>, %arg5: memref<27x256xbf16, #tpu.memory_space<vmem>>, %arg6: memref<3x32x256xf32, #tpu.memory_space<vmem>>, %arg7: memref<1x1x32x256xf32, #tpu.memory_space<vmem>>, %arg8: memref<32x256xf32, #tpu.memory_space<vmem>>, %arg9: memref<32x256xf32, #tpu.memory_space<vmem>>, %arg10: memref<48x256xbf16, #tpu.memory_space<vmem>>, %arg11: memref<1296x256xbf16, #tpu.memory_space<vmem>>) attributes {dimension_semantics = [#tpu.dimension_semantics<parallel>, #tpu.dimension_semantics<arbitrary>], iteration_bounds = array<i64: 2, 4>, scalar_prefetch = 0 : i64, scratch_operands = 4 : i64, tpu.core_type = #tpu.core_type<tc>, window_params = [{transform_indices = @transform_0, window_bounds = array<i64: 1, 1, 4, 256>}, {pipeline_mode = #tpu.pipeline_mode<synchronous>, transform_indices = @transform_1, window_bounds = array<i64: 128, 1296>}, {pipeline_mode = #tpu.pipeline_mode<synchronous>, transform_indices = @transform_2, window_bounds = array<i64: 128, 1>}, {pipeline_mode = #tpu.pipeline_mode<synchronous>, transform_indices = @transform_3, window_bounds = array<i64: 27, 256>}, {pipeline_mode = #tpu.pipeline_mode<synchronous>, transform_indices = @transform_4, window_bounds = array<i64: 3, 32, 256>}, {transform_indices = @transform_5, window_bounds = array<i64: 1, 1, 32, 256>}]} {
    %c0_i32 = arith.constant 0 : i32
    %0 = arith.cmpi eq, %arg1, %c0_i32 : i32
    %1 = arith.extui %0 : i1 to i32
    %c0_i32_0 = arith.constant 0 : i32
    %2 = arith.cmpi ne, %1, %c0_i32_0 : i32
    scf.if %2 {
      %cst_95 = arith.constant 0.000000e+00 : f32
      %195 = vector.broadcast %cst_95 : f32 to vector<32x256xf32>
      %c0_96 = arith.constant 0 : index
      %c0_97 = arith.constant 0 : index
      %196 = vector.load %arg8[%c0_96, %c0_97] : memref<32x256xf32, #tpu.memory_space<vmem>>, vector<32x256xf32>
      tpu.vector_store %arg8[%c0_96, %c0_97], %195 {strides = array<i32>} : memref<32x256xf32, #tpu.memory_space<vmem>>, vector<32x256xf32>,
      %cst_98 = arith.constant 0.000000e+00 : f32
      %197 = vector.broadcast %cst_98 : f32 to vector<32x256xf32>
      %c0_99 = arith.constant 0 : index
      %c0_100 = arith.constant 0 : index
      %198 = vector.load %arg9[%c0_99, %c0_100] : memref<32x256xf32, #tpu.memory_space<vmem>>, vector<32x256xf32>
      tpu.vector_store %arg9[%c0_99, %c0_100], %197 {strides = array<i32>} : memref<32x256xf32, #tpu.memory_space<vmem>>, vector<32x256xf32>,
      %cst_101 = arith.constant 0.000000e+00 : bf16
      %199 = vector.broadcast %cst_101 : bf16 to vector<48x256xbf16>
      %c0_102 = arith.constant 0 : index
      %c0_103 = arith.constant 0 : index
      %200 = vector.load %arg10[%c0_102, %c0_103] : memref<48x256xbf16, #tpu.memory_space<vmem>>, vector<48x256xbf16>
      tpu.vector_store %arg10[%c0_102, %c0_103], %199 {strides = array<i32>} : memref<48x256xbf16, #tpu.memory_space<vmem>>, vector<48x256xbf16>,
    } else {
    }
    %c0 = arith.constant 0 : index
    %c0_1 = arith.constant 0 : index
    %3 = vector.load %arg8[%c0, %c0_1] : memref<32x256xf32, #tpu.memory_space<vmem>>, vector<32x256xf32>
    %4 = arith.truncf %3 : vector<32x256xf32> to vector<32x256xbf16>
    %c0_2 = arith.constant 0 : index
    %c0_3 = arith.constant 0 : index
    %5 = vector.load %arg10[%c0_2, %c0_3] : memref<48x256xbf16, #tpu.memory_space<vmem>>, vector<32x256xbf16>
    tpu.vector_store %arg10[%c0_2, %c0_3], %4 {strides = array<i32>} : memref<48x256xbf16, #tpu.memory_space<vmem>>, vector<32x256xbf16>,
    %c0_4 = arith.constant 0 : index
    %c0_5 = arith.constant 0 : index
    %c0_6 = arith.constant 0 : index
    %c0_7 = arith.constant 0 : index
    %6 = vector.load %arg2[%c0_4, %c0_5, %c0_6, %c0_7] : memref<1x1x4x256xf32, #tpu.memory_space<vmem>>, vector<1x1x4x256xf32>
    %7 = vector.shape_cast %6 : vector<1x1x4x256xf32> to vector<4x256xf32>
    %8 = arith.truncf %7 : vector<4x256xf32> to vector<4x256xbf16>
    %c32 = arith.constant 32 : index
    %c0_8 = arith.constant 0 : index
    %9 = vector.load %arg10[%c32, %c0_8] : memref<48x256xbf16, #tpu.memory_space<vmem>>, vector<4x256xbf16>
    tpu.vector_store %arg10[%c32, %c0_8], %8 {strides = array<i32>} : memref<48x256xbf16, #tpu.memory_space<vmem>>, vector<4x256xbf16>,
    %c0_9 = arith.constant 0 : index
    %c0_10 = arith.constant 0 : index
    %10 = vector.load %arg10[%c0_9, %c0_10] : memref<48x256xbf16, #tpu.memory_space<vmem>>, vector<48x256xbf16>
    %11 = tpu.concatenate %10, %10 in 1 : vector<48x256xbf16>, vector<48x256xbf16> -> vector<48x512xbf16>
    %12 = vector.extract_strided_slice %11 {offsets = [0, 183], sizes = [48, 256], strides = [1, 1]} : vector<48x512xbf16> to vector<48x256xbf16>
    %c0_11 = arith.constant 0 : index
    %c0_12 = arith.constant 0 : index
    %13 = vector.load %arg5[%c0_11, %c0_12] : memref<27x256xbf16, #tpu.memory_space<vmem>>, vector<1x256xbf16>
    %14 = vector.broadcast %13 : vector<1x256xbf16> to vector<48x256xbf16>
    %15 = arith.mulf %12, %14 : vector<48x256xbf16>
    %c0_13 = arith.constant 0 : index
    %c0_14 = arith.constant 0 : index
    %16 = vector.load %arg11[%c0_13, %c0_14] : memref<1296x256xbf16, #tpu.memory_space<vmem>>, vector<48x256xbf16>
    tpu.vector_store %arg11[%c0_13, %c0_14], %15 {strides = array<i32>} : memref<1296x256xbf16, #tpu.memory_space<vmem>>, vector<48x256xbf16>,
    %17 = vector.extract_strided_slice %11 {offsets = [0, 184], sizes = [48, 256], strides = [1, 1]} : vector<48x512xbf16> to vector<48x256xbf16>
    %c1 = arith.constant 1 : index
    %c0_15 = arith.constant 0 : index
    %18 = vector.load %arg5[%c1, %c0_15] : memref<27x256xbf16, #tpu.memory_space<vmem>>, vector<1x256xbf16>
    %19 = vector.broadcast %18 : vector<1x256xbf16> to vector<48x256xbf16>
    %20 = arith.mulf %17, %19 : vector<48x256xbf16>
    %c48 = arith.constant 48 : index
    %c0_16 = arith.constant 0 : index
    %21 = vector.load %arg11[%c48, %c0_16] : memref<1296x256xbf16, #tpu.memory_space<vmem>>, vector<48x256xbf16>
    tpu.vector_store %arg11[%c48, %c0_16], %20 {strides = array<i32>} : memref<1296x256xbf16, #tpu.memory_space<vmem>>, vector<48x256xbf16>,
    %22 = vector.extract_strided_slice %11 {offsets = [0, 185], sizes = [48, 256], strides = [1, 1]} : vector<48x512xbf16> to vector<48x256xbf16>
    %c2 = arith.constant 2 : index
    %c0_17 = arith.constant 0 : index
    %23 = vector.load %arg5[%c2, %c0_17] : memref<27x256xbf16, #tpu.memory_space<vmem>>, vector<1x256xbf16>
    %24 = vector.broadcast %23 : vector<1x256xbf16> to vector<48x256xbf16>
    %25 = arith.mulf %22, %24 : vector<48x256xbf16>
    %c96 = arith.constant 96 : index
    %c0_18 = arith.constant 0 : index
    %26 = vector.load %arg11[%c96, %c0_18] : memref<1296x256xbf16, #tpu.memory_space<vmem>>, vector<48x256xbf16>
    tpu.vector_store %arg11[%c96, %c0_18], %25 {strides = array<i32>} : memref<1296x256xbf16, #tpu.memory_space<vmem>>, vector<48x256xbf16>,
    %27 = vector.extract_strided_slice %11 {offsets = [0, 191], sizes = [48, 256], strides = [1, 1]} : vector<48x512xbf16> to vector<48x256xbf16>
    %c3 = arith.constant 3 : index
    %c0_19 = arith.constant 0 : index
    %28 = vector.load %arg5[%c3, %c0_19] : memref<27x256xbf16, #tpu.memory_space<vmem>>, vector<1x256xbf16>
    %29 = vector.broadcast %28 : vector<1x256xbf16> to vector<48x256xbf16>
    %30 = arith.mulf %27, %29 : vector<48x256xbf16>
    %c144 = arith.constant 144 : index
    %c0_20 = arith.constant 0 : index
    %31 = vector.load %arg11[%c144, %c0_20] : memref<1296x256xbf16, #tpu.memory_space<vmem>>, vector<48x256xbf16>
    tpu.vector_store %arg11[%c144, %c0_20], %30 {strides = array<i32>} : memref<1296x256xbf16, #tpu.memory_space<vmem>>, vector<48x256xbf16>,
    %32 = vector.extract_strided_slice %11 {offsets = [0, 192], sizes = [48, 256], strides = [1, 1]} : vector<48x512xbf16> to vector<48x256xbf16>
    %c4 = arith.constant 4 : index
    %c0_21 = arith.constant 0 : index
    %33 = vector.load %arg5[%c4, %c0_21] : memref<27x256xbf16, #tpu.memory_space<vmem>>, vector<1x256xbf16>
    %34 = vector.broadcast %33 : vector<1x256xbf16> to vector<48x256xbf16>
    %35 = arith.mulf %32, %34 : vector<48x256xbf16>
    %c192 = arith.constant 192 : index
    %c0_22 = arith.constant 0 : index
    %36 = vector.load %arg11[%c192, %c0_22] : memref<1296x256xbf16, #tpu.memory_space<vmem>>, vector<48x256xbf16>
    tpu.vector_store %arg11[%c192, %c0_22], %35 {strides = array<i32>} : memref<1296x256xbf16, #tpu.memory_space<vmem>>, vector<48x256xbf16>,
    %37 = vector.extract_strided_slice %11 {offsets = [0, 193], sizes = [48, 256], strides = [1, 1]} : vector<48x512xbf16> to vector<48x256xbf16>
    %c5 = arith.constant 5 : index
    %c0_23 = arith.constant 0 : index
    %38 = vector.load %arg5[%c5, %c0_23] : memref<27x256xbf16, #tpu.memory_space<vmem>>, vector<1x256xbf16>
    %39 = vector.broadcast %38 : vector<1x256xbf16> to vector<48x256xbf16>
    %40 = arith.mulf %37, %39 : vector<48x256xbf16>
    %c240 = arith.constant 240 : index
    %c0_24 = arith.constant 0 : index
    %41 = vector.load %arg11[%c240, %c0_24] : memref<1296x256xbf16, #tpu.memory_space<vmem>>, vector<48x256xbf16>
    tpu.vector_store %arg11[%c240, %c0_24], %40 {strides = array<i32>} : memref<1296x256xbf16, #tpu.memory_space<vmem>>, vector<48x256xbf16>,
    %42 = vector.extract_strided_slice %11 {offsets = [0, 199], sizes = [48, 256], strides = [1, 1]} : vector<48x512xbf16> to vector<48x256xbf16>
    %c6 = arith.constant 6 : index
    %c0_25 = arith.constant 0 : index
    %43 = vector.load %arg5[%c6, %c0_25] : memref<27x256xbf16, #tpu.memory_space<vmem>>, vector<1x256xbf16>
    %44 = vector.broadcast %43 : vector<1x256xbf16> to vector<48x256xbf16>
    %45 = arith.mulf %42, %44 : vector<48x256xbf16>
    %c288 = arith.constant 288 : index
    %c0_26 = arith.constant 0 : index
    %46 = vector.load %arg11[%c288, %c0_26] : memref<1296x256xbf16, #tpu.memory_space<vmem>>, vector<48x256xbf16>
    tpu.vector_store %arg11[%c288, %c0_26], %45 {strides = array<i32>} : memref<1296x256xbf16, #tpu.memory_space<vmem>>, vector<48x256xbf16>,
    %47 = vector.extract_strided_slice %11 {offsets = [0, 200], sizes = [48, 256], strides = [1, 1]} : vector<48x512xbf16> to vector<48x256xbf16>
    %c7 = arith.constant 7 : index
    %c0_27 = arith.constant 0 : index
    %48 = vector.load %arg5[%c7, %c0_27] : memref<27x256xbf16, #tpu.memory_space<vmem>>, vector<1x256xbf16>
    %49 = vector.broadcast %48 : vector<1x256xbf16> to vector<48x256xbf16>
    %50 = arith.mulf %47, %49 : vector<48x256xbf16>
    %c336 = arith.constant 336 : index
    %c0_28 = arith.constant 0 : index
    %51 = vector.load %arg11[%c336, %c0_28] : memref<1296x256xbf16, #tpu.memory_space<vmem>>, vector<48x256xbf16>
    tpu.vector_store %arg11[%c336, %c0_28], %50 {strides = array<i32>} : memref<1296x256xbf16, #tpu.memory_space<vmem>>, vector<48x256xbf16>,
    %52 = vector.extract_strided_slice %11 {offsets = [0, 201], sizes = [48, 256], strides = [1, 1]} : vector<48x512xbf16> to vector<48x256xbf16>
    %c8 = arith.constant 8 : index
    %c0_29 = arith.constant 0 : index
    %53 = vector.load %arg5[%c8, %c0_29] : memref<27x256xbf16, #tpu.memory_space<vmem>>, vector<1x256xbf16>
    %54 = vector.broadcast %53 : vector<1x256xbf16> to vector<48x256xbf16>
    %55 = arith.mulf %52, %54 : vector<48x256xbf16>
    %c384 = arith.constant 384 : index
    %c0_30 = arith.constant 0 : index
    %56 = vector.load %arg11[%c384, %c0_30] : memref<1296x256xbf16, #tpu.memory_space<vmem>>, vector<48x256xbf16>
    tpu.vector_store %arg11[%c384, %c0_30], %55 {strides = array<i32>} : memref<1296x256xbf16, #tpu.memory_space<vmem>>, vector<48x256xbf16>,
    %57 = vector.extract_strided_slice %11 {offsets = [0, 247], sizes = [48, 256], strides = [1, 1]} : vector<48x512xbf16> to vector<48x256xbf16>
    %c9 = arith.constant 9 : index
    %c0_31 = arith.constant 0 : index
    %58 = vector.load %arg5[%c9, %c0_31] : memref<27x256xbf16, #tpu.memory_space<vmem>>, vector<1x256xbf16>
    %59 = vector.broadcast %58 : vector<1x256xbf16> to vector<48x256xbf16>
    %60 = arith.mulf %57, %59 : vector<48x256xbf16>
    %c432 = arith.constant 432 : index
    %c0_32 = arith.constant 0 : index
    %61 = vector.load %arg11[%c432, %c0_32] : memref<1296x256xbf16, #tpu.memory_space<vmem>>, vector<48x256xbf16>
    tpu.vector_store %arg11[%c432, %c0_32], %60 {strides = array<i32>} : memref<1296x256xbf16, #tpu.memory_space<vmem>>, vector<48x256xbf16>,
    %62 = vector.extract_strided_slice %11 {offsets = [0, 248], sizes = [48, 256], strides = [1, 1]} : vector<48x512xbf16> to vector<48x256xbf16>
    %c10 = arith.constant 10 : index
    %c0_33 = arith.constant 0 : index
    %63 = vector.load %arg5[%c10, %c0_33] : memref<27x256xbf16, #tpu.memory_space<vmem>>, vector<1x256xbf16>
    %64 = vector.broadcast %63 : vector<1x256xbf16> to vector<48x256xbf16>
    %65 = arith.mulf %62, %64 : vector<48x256xbf16>
    %c480 = arith.constant 480 : index
    %c0_34 = arith.constant 0 : index
    %66 = vector.load %arg11[%c480, %c0_34] : memref<1296x256xbf16, #tpu.memory_space<vmem>>, vector<48x256xbf16>
    tpu.vector_store %arg11[%c480, %c0_34], %65 {strides = array<i32>} : memref<1296x256xbf16, #tpu.memory_space<vmem>>, vector<48x256xbf16>,
    %67 = vector.extract_strided_slice %11 {offsets = [0, 249], sizes = [48, 256], strides = [1, 1]} : vector<48x512xbf16> to vector<48x256xbf16>
    %c11 = arith.constant 11 : index
    %c0_35 = arith.constant 0 : index
    %68 = vector.load %arg5[%c11, %c0_35] : memref<27x256xbf16, #tpu.memory_space<vmem>>, vector<1x256xbf16>
    %69 = vector.broadcast %68 : vector<1x256xbf16> to vector<48x256xbf16>
    %70 = arith.mulf %67, %69 : vector<48x256xbf16>
    %c528 = arith.constant 528 : index
    %c0_36 = arith.constant 0 : index
    %71 = vector.load %arg11[%c528, %c0_36] : memref<1296x256xbf16, #tpu.memory_space<vmem>>, vector<48x256xbf16>
    tpu.vector_store %arg11[%c528, %c0_36], %70 {strides = array<i32>} : memref<1296x256xbf16, #tpu.memory_space<vmem>>, vector<48x256xbf16>,
    %72 = vector.extract_strided_slice %11 {offsets = [0, 255], sizes = [48, 256], strides = [1, 1]} : vector<48x512xbf16> to vector<48x256xbf16>
    %c12 = arith.constant 12 : index
    %c0_37 = arith.constant 0 : index
    %73 = vector.load %arg5[%c12, %c0_37] : memref<27x256xbf16, #tpu.memory_space<vmem>>, vector<1x256xbf16>
    %74 = vector.broadcast %73 : vector<1x256xbf16> to vector<48x256xbf16>
    %75 = arith.mulf %72, %74 : vector<48x256xbf16>
    %c576 = arith.constant 576 : index
    %c0_38 = arith.constant 0 : index
    %76 = vector.load %arg11[%c576, %c0_38] : memref<1296x256xbf16, #tpu.memory_space<vmem>>, vector<48x256xbf16>
    tpu.vector_store %arg11[%c576, %c0_38], %75 {strides = array<i32>} : memref<1296x256xbf16, #tpu.memory_space<vmem>>, vector<48x256xbf16>,
    %c13 = arith.constant 13 : index
    %c0_39 = arith.constant 0 : index
    %77 = vector.load %arg5[%c13, %c0_39] : memref<27x256xbf16, #tpu.memory_space<vmem>>, vector<1x256xbf16>
    %78 = vector.broadcast %77 : vector<1x256xbf16> to vector<48x256xbf16>
    %79 = arith.mulf %10, %78 : vector<48x256xbf16>
    %c624 = arith.constant 624 : index
    %c0_40 = arith.constant 0 : index
    %80 = vector.load %arg11[%c624, %c0_40] : memref<1296x256xbf16, #tpu.memory_space<vmem>>, vector<48x256xbf16>
    tpu.vector_store %arg11[%c624, %c0_40], %79 {strides = array<i32>} : memref<1296x256xbf16, #tpu.memory_space<vmem>>, vector<48x256xbf16>,
    %81 = vector.extract_strided_slice %11 {offsets = [0, 1], sizes = [48, 256], strides = [1, 1]} : vector<48x512xbf16> to vector<48x256xbf16>
    %c14 = arith.constant 14 : index
    %c0_41 = arith.constant 0 : index
    %82 = vector.load %arg5[%c14, %c0_41] : memref<27x256xbf16, #tpu.memory_space<vmem>>, vector<1x256xbf16>
    %83 = vector.broadcast %82 : vector<1x256xbf16> to vector<48x256xbf16>
    %84 = arith.mulf %81, %83 : vector<48x256xbf16>
    %c672 = arith.constant 672 : index
    %c0_42 = arith.constant 0 : index
    %85 = vector.load %arg11[%c672, %c0_42] : memref<1296x256xbf16, #tpu.memory_space<vmem>>, vector<48x256xbf16>
    tpu.vector_store %arg11[%c672, %c0_42], %84 {strides = array<i32>} : memref<1296x256xbf16, #tpu.memory_space<vmem>>, vector<48x256xbf16>,
    %86 = vector.extract_strided_slice %11 {offsets = [0, 7], sizes = [48, 256], strides = [1, 1]} : vector<48x512xbf16> to vector<48x256xbf16>
    %c15 = arith.constant 15 : index
    %c0_43 = arith.constant 0 : index
    %87 = vector.load %arg5[%c15, %c0_43] : memref<27x256xbf16, #tpu.memory_space<vmem>>, vector<1x256xbf16>
    %88 = vector.broadcast %87 : vector<1x256xbf16> to vector<48x256xbf16>
    %89 = arith.mulf %86, %88 : vector<48x256xbf16>
    %c720 = arith.constant 720 : index
    %c0_44 = arith.constant 0 : index
    %90 = vector.load %arg11[%c720, %c0_44] : memref<1296x256xbf16, #tpu.memory_space<vmem>>, vector<48x256xbf16>
    tpu.vector_store %arg11[%c720, %c0_44], %89 {strides = array<i32>} : memref<1296x256xbf16, #tpu.memory_space<vmem>>, vector<48x256xbf16>,
    %91 = vector.extract_strided_slice %11 {offsets = [0, 8], sizes = [48, 256], strides = [1, 1]} : vector<48x512xbf16> to vector<48x256xbf16>
    %c16 = arith.constant 16 : index
    %c0_45 = arith.constant 0 : index
    %92 = vector.load %arg5[%c16, %c0_45] : memref<27x256xbf16, #tpu.memory_space<vmem>>, vector<1x256xbf16>
    %93 = vector.broadcast %92 : vector<1x256xbf16> to vector<48x256xbf16>
    %94 = arith.mulf %91, %93 : vector<48x256xbf16>
    %c768 = arith.constant 768 : index
    %c0_46 = arith.constant 0 : index
    %95 = vector.load %arg11[%c768, %c0_46] : memref<1296x256xbf16, #tpu.memory_space<vmem>>, vector<48x256xbf16>
    tpu.vector_store %arg11[%c768, %c0_46], %94 {strides = array<i32>} : memref<1296x256xbf16, #tpu.memory_space<vmem>>, vector<48x256xbf16>,
    %96 = vector.extract_strided_slice %11 {offsets = [0, 9], sizes = [48, 256], strides = [1, 1]} : vector<48x512xbf16> to vector<48x256xbf16>
    %c17 = arith.constant 17 : index
    %c0_47 = arith.constant 0 : index
    %97 = vector.load %arg5[%c17, %c0_47] : memref<27x256xbf16, #tpu.memory_space<vmem>>, vector<1x256xbf16>
    %98 = vector.broadcast %97 : vector<1x256xbf16> to vector<48x256xbf16>
    %99 = arith.mulf %96, %98 : vector<48x256xbf16>
    %c816 = arith.constant 816 : index
    %c0_48 = arith.constant 0 : index
    %100 = vector.load %arg11[%c816, %c0_48] : memref<1296x256xbf16, #tpu.memory_space<vmem>>, vector<48x256xbf16>
    tpu.vector_store %arg11[%c816, %c0_48], %99 {strides = array<i32>} : memref<1296x256xbf16, #tpu.memory_space<vmem>>, vector<48x256xbf16>,
    %101 = vector.extract_strided_slice %11 {offsets = [0, 55], sizes = [48, 256], strides = [1, 1]} : vector<48x512xbf16> to vector<48x256xbf16>
    %c18 = arith.constant 18 : index
    %c0_49 = arith.constant 0 : index
    %102 = vector.load %arg5[%c18, %c0_49] : memref<27x256xbf16, #tpu.memory_space<vmem>>, vector<1x256xbf16>
    %103 = vector.broadcast %102 : vector<1x256xbf16> to vector<48x256xbf16>
    %104 = arith.mulf %101, %103 : vector<48x256xbf16>
    %c864 = arith.constant 864 : index
    %c0_50 = arith.constant 0 : index
    %105 = vector.load %arg11[%c864, %c0_50] : memref<1296x256xbf16, #tpu.memory_space<vmem>>, vector<48x256xbf16>
    tpu.vector_store %arg11[%c864, %c0_50], %104 {strides = array<i32>} : memref<1296x256xbf16, #tpu.memory_space<vmem>>, vector<48x256xbf16>,
    %106 = vector.extract_strided_slice %11 {offsets = [0, 56], sizes = [48, 256], strides = [1, 1]} : vector<48x512xbf16> to vector<48x256xbf16>
    %c19 = arith.constant 19 : index
    %c0_51 = arith.constant 0 : index
    %107 = vector.load %arg5[%c19, %c0_51] : memref<27x256xbf16, #tpu.memory_space<vmem>>, vector<1x256xbf16>
    %108 = vector.broadcast %107 : vector<1x256xbf16> to vector<48x256xbf16>
    %109 = arith.mulf %106, %108 : vector<48x256xbf16>
    %c912 = arith.constant 912 : index
    %c0_52 = arith.constant 0 : index
    %110 = vector.load %arg11[%c912, %c0_52] : memref<1296x256xbf16, #tpu.memory_space<vmem>>, vector<48x256xbf16>
    tpu.vector_store %arg11[%c912, %c0_52], %109 {strides = array<i32>} : memref<1296x256xbf16, #tpu.memory_space<vmem>>, vector<48x256xbf16>,
    %111 = vector.extract_strided_slice %11 {offsets = [0, 57], sizes = [48, 256], strides = [1, 1]} : vector<48x512xbf16> to vector<48x256xbf16>
    %c20 = arith.constant 20 : index
    %c0_53 = arith.constant 0 : index
    %112 = vector.load %arg5[%c20, %c0_53] : memref<27x256xbf16, #tpu.memory_space<vmem>>, vector<1x256xbf16>
    %113 = vector.broadcast %112 : vector<1x256xbf16> to vector<48x256xbf16>
    %114 = arith.mulf %111, %113 : vector<48x256xbf16>
    %c960 = arith.constant 960 : index
    %c0_54 = arith.constant 0 : index
    %115 = vector.load %arg11[%c960, %c0_54] : memref<1296x256xbf16, #tpu.memory_space<vmem>>, vector<48x256xbf16>
    tpu.vector_store %arg11[%c960, %c0_54], %114 {strides = array<i32>} : memref<1296x256xbf16, #tpu.memory_space<vmem>>, vector<48x256xbf16>,
    %116 = vector.extract_strided_slice %11 {offsets = [0, 63], sizes = [48, 256], strides = [1, 1]} : vector<48x512xbf16> to vector<48x256xbf16>
    %c21 = arith.constant 21 : index
    %c0_55 = arith.constant 0 : index
    %117 = vector.load %arg5[%c21, %c0_55] : memref<27x256xbf16, #tpu.memory_space<vmem>>, vector<1x256xbf16>
    %118 = vector.broadcast %117 : vector<1x256xbf16> to vector<48x256xbf16>
    %119 = arith.mulf %116, %118 : vector<48x256xbf16>
    %c1008 = arith.constant 1008 : index
    %c0_56 = arith.constant 0 : index
    %120 = vector.load %arg11[%c1008, %c0_56] : memref<1296x256xbf16, #tpu.memory_space<vmem>>, vector<48x256xbf16>
    tpu.vector_store %arg11[%c1008, %c0_56], %119 {strides = array<i32>} : memref<1296x256xbf16, #tpu.memory_space<vmem>>, vector<48x256xbf16>,
    %121 = vector.extract_strided_slice %11 {offsets = [0, 64], sizes = [48, 256], strides = [1, 1]} : vector<48x512xbf16> to vector<48x256xbf16>
    %c22 = arith.constant 22 : index
    %c0_57 = arith.constant 0 : index
    %122 = vector.load %arg5[%c22, %c0_57] : memref<27x256xbf16, #tpu.memory_space<vmem>>, vector<1x256xbf16>
    %123 = vector.broadcast %122 : vector<1x256xbf16> to vector<48x256xbf16>
    %124 = arith.mulf %121, %123 : vector<48x256xbf16>
    %c1056 = arith.constant 1056 : index
    %c0_58 = arith.constant 0 : index
    %125 = vector.load %arg11[%c1056, %c0_58] : memref<1296x256xbf16, #tpu.memory_space<vmem>>, vector<48x256xbf16>
    tpu.vector_store %arg11[%c1056, %c0_58], %124 {strides = array<i32>} : memref<1296x256xbf16, #tpu.memory_space<vmem>>, vector<48x256xbf16>,
    %126 = vector.extract_strided_slice %11 {offsets = [0, 65], sizes = [48, 256], strides = [1, 1]} : vector<48x512xbf16> to vector<48x256xbf16>
    %c23 = arith.constant 23 : index
    %c0_59 = arith.constant 0 : index
    %127 = vector.load %arg5[%c23, %c0_59] : memref<27x256xbf16, #tpu.memory_space<vmem>>, vector<1x256xbf16>
    %128 = vector.broadcast %127 : vector<1x256xbf16> to vector<48x256xbf16>
    %129 = arith.mulf %126, %128 : vector<48x256xbf16>
    %c1104 = arith.constant 1104 : index
    %c0_60 = arith.constant 0 : index
    %130 = vector.load %arg11[%c1104, %c0_60] : memref<1296x256xbf16, #tpu.memory_space<vmem>>, vector<48x256xbf16>
    tpu.vector_store %arg11[%c1104, %c0_60], %129 {strides = array<i32>} : memref<1296x256xbf16, #tpu.memory_space<vmem>>, vector<48x256xbf16>,
    %131 = vector.extract_strided_slice %11 {offsets = [0, 71], sizes = [48, 256], strides = [1, 1]} : vector<48x512xbf16> to vector<48x256xbf16>
    %c24 = arith.constant 24 : index
    %c0_61 = arith.constant 0 : index
    %132 = vector.load %arg5[%c24, %c0_61] : memref<27x256xbf16, #tpu.memory_space<vmem>>, vector<1x256xbf16>
    %133 = vector.broadcast %132 : vector<1x256xbf16> to vector<48x256xbf16>
    %134 = arith.mulf %131, %133 : vector<48x256xbf16>
    %c1152 = arith.constant 1152 : index
    %c0_62 = arith.constant 0 : index
    %135 = vector.load %arg11[%c1152, %c0_62] : memref<1296x256xbf16, #tpu.memory_space<vmem>>, vector<48x256xbf16>
    tpu.vector_store %arg11[%c1152, %c0_62], %134 {strides = array<i32>} : memref<1296x256xbf16, #tpu.memory_space<vmem>>, vector<48x256xbf16>,
    %136 = vector.extract_strided_slice %11 {offsets = [0, 72], sizes = [48, 256], strides = [1, 1]} : vector<48x512xbf16> to vector<48x256xbf16>
    %c25 = arith.constant 25 : index
    %c0_63 = arith.constant 0 : index
    %137 = vector.load %arg5[%c25, %c0_63] : memref<27x256xbf16, #tpu.memory_space<vmem>>, vector<1x256xbf16>
    %138 = vector.broadcast %137 : vector<1x256xbf16> to vector<48x256xbf16>
    %139 = arith.mulf %136, %138 : vector<48x256xbf16>
    %c1200 = arith.constant 1200 : index
    %c0_64 = arith.constant 0 : index
    %140 = vector.load %arg11[%c1200, %c0_64] : memref<1296x256xbf16, #tpu.memory_space<vmem>>, vector<48x256xbf16>
    tpu.vector_store %arg11[%c1200, %c0_64], %139 {strides = array<i32>} : memref<1296x256xbf16, #tpu.memory_space<vmem>>, vector<48x256xbf16>,
    %141 = vector.extract_strided_slice %11 {offsets = [0, 73], sizes = [48, 256], strides = [1, 1]} : vector<48x512xbf16> to vector<48x256xbf16>
    %c26 = arith.constant 26 : index
    %c0_65 = arith.constant 0 : index
    %142 = vector.load %arg5[%c26, %c0_65] : memref<27x256xbf16, #tpu.memory_space<vmem>>, vector<1x256xbf16>
    %143 = vector.broadcast %142 : vector<1x256xbf16> to vector<48x256xbf16>
    %144 = arith.mulf %141, %143 : vector<48x256xbf16>
    %c1248 = arith.constant 1248 : index
    %c0_66 = arith.constant 0 : index
    %145 = vector.load %arg11[%c1248, %c0_66] : memref<1296x256xbf16, #tpu.memory_space<vmem>>, vector<48x256xbf16>
    tpu.vector_store %arg11[%c1248, %c0_66], %144 {strides = array<i32>} : memref<1296x256xbf16, #tpu.memory_space<vmem>>, vector<48x256xbf16>,
    %c0_67 = arith.constant 0 : index
    %c0_68 = arith.constant 0 : index
    %146 = vector.load %arg3[%c0_67, %c0_68] : memref<128x1296xbf16, #tpu.memory_space<vmem>>, vector<128x1296xbf16>
    %c0_69 = arith.constant 0 : index
    %c0_70 = arith.constant 0 : index
    %147 = vector.load %arg11[%c0_69, %c0_70] : memref<1296x256xbf16, #tpu.memory_space<vmem>>, vector<1296x256xbf16>
    %cst = arith.constant dense<0.000000e+00> : vector<128x256xf32>
    %148 = tpu.matmul %146, %147, %cst {dimension_numbers = #tpu.dot_dimension_numbers<[1], [0], [0], [1], [0, 0, 1, 1], [], []>} : vector<128x1296xbf16>, vector<1296x256xbf16>, vector<128x256xf32> -> vector<128x256xf32>
    %c0_71 = arith.constant 0 : index
    %c0_72 = arith.constant 0 : index
    %149 = vector.load %arg4[%c0_71, %c0_72] : memref<128x1xf32, #tpu.memory_space<vmem>>, vector<128x1xf32>
    %150 = vector.broadcast %149 : vector<128x1xf32> to vector<128x256xf32>
    %151 = arith.addf %148, %150 : vector<128x256xf32>
    %c0_73 = arith.constant 0 : index
    %c0_74 = arith.constant 0 : index
    %152 = vector.load %arg9[%c0_73, %c0_74] : memref<32x256xf32, #tpu.memory_space<vmem>>, vector<32x256xf32>
    %153 = vector.extract_strided_slice %151 {offsets = [0, 0], sizes = [32, 256], strides = [1, 1]} : vector<128x256xf32> to vector<32x256xf32>
    %154 = vector.extract_strided_slice %151 {offsets = [32, 0], sizes = [32, 256], strides = [1, 1]} : vector<128x256xf32> to vector<32x256xf32>
    %155 = vector.extract_strided_slice %151 {offsets = [64, 0], sizes = [32, 256], strides = [1, 1]} : vector<128x256xf32> to vector<32x256xf32>
    %156 = vector.extract_strided_slice %151 {offsets = [96, 0], sizes = [32, 256], strides = [1, 1]} : vector<128x256xf32> to vector<32x256xf32>
    %c0_75 = arith.constant 0 : index
    %c0_76 = arith.constant 0 : index
    %c0_77 = arith.constant 0 : index
    %157 = vector.load %arg6[%c0_75, %c0_76, %c0_77] : memref<3x32x256xf32, #tpu.memory_space<vmem>>, vector<1x32x256xf32>
    %158 = vector.shape_cast %157 : vector<1x32x256xf32> to vector<32x256xf32>
    %159 = arith.mulf %158, %152 : vector<32x256xf32>
    %160 = arith.addf %153, %159 : vector<32x256xf32>
    %161 = arith.negf %160 : vector<32x256xf32>
    %162 = math.exp %161 : vector<32x256xf32>
    %cst_78 = arith.constant 1.000000e+00 : f32
    %163 = vector.broadcast %cst_78 : f32 to vector<32x256xf32>
    %164 = arith.addf %163, %162 : vector<32x256xf32>
    %165 = arith.divf %163, %164 : vector<32x256xf32>
    %c1_79 = arith.constant 1 : index
    %c0_80 = arith.constant 0 : index
    %c0_81 = arith.constant 0 : index
    %166 = vector.load %arg6[%c1_79, %c0_80, %c0_81] : memref<3x32x256xf32, #tpu.memory_space<vmem>>, vector<1x32x256xf32>
    %167 = vector.shape_cast %166 : vector<1x32x256xf32> to vector<32x256xf32>
    %168 = arith.mulf %167, %152 : vector<32x256xf32>
    %169 = arith.addf %154, %168 : vector<32x256xf32>
    %170 = arith.negf %169 : vector<32x256xf32>
    %171 = math.exp %170 : vector<32x256xf32>
    %cst_82 = arith.constant 1.000000e+00 : f32
    %172 = vector.broadcast %cst_82 : f32 to vector<32x256xf32>
    %173 = arith.addf %172, %171 : vector<32x256xf32>
    %174 = arith.divf %172, %173 : vector<32x256xf32>
    %175 = arith.mulf %174, %152 : vector<32x256xf32>
    %176 = math.tanh %155 : vector<32x256xf32>
    %177 = arith.mulf %165, %176 : vector<32x256xf32>
    %178 = arith.addf %175, %177 : vector<32x256xf32>
    %c2_83 = arith.constant 2 : index
    %c0_84 = arith.constant 0 : index
    %c0_85 = arith.constant 0 : index
    %179 = vector.load %arg6[%c2_83, %c0_84, %c0_85] : memref<3x32x256xf32, #tpu.memory_space<vmem>>, vector<1x32x256xf32>
    %180 = vector.shape_cast %179 : vector<1x32x256xf32> to vector<32x256xf32>
    %181 = arith.mulf %180, %178 : vector<32x256xf32>
    %182 = arith.addf %156, %181 : vector<32x256xf32>
    %183 = arith.negf %182 : vector<32x256xf32>
    %184 = math.exp %183 : vector<32x256xf32>
    %cst_86 = arith.constant 1.000000e+00 : f32
    %185 = vector.broadcast %cst_86 : f32 to vector<32x256xf32>
    %186 = arith.addf %185, %184 : vector<32x256xf32>
    %187 = arith.divf %185, %186 : vector<32x256xf32>
    %188 = math.tanh %178 : vector<32x256xf32>
    %189 = arith.mulf %187, %188 : vector<32x256xf32>
    %c0_87 = arith.constant 0 : index
    %c0_88 = arith.constant 0 : index
    %190 = vector.load %arg8[%c0_87, %c0_88] : memref<32x256xf32, #tpu.memory_space<vmem>>, vector<32x256xf32>
    tpu.vector_store %arg8[%c0_87, %c0_88], %189 {strides = array<i32>} : memref<32x256xf32, #tpu.memory_space<vmem>>, vector<32x256xf32>,
    %c0_89 = arith.constant 0 : index
    %c0_90 = arith.constant 0 : index
    %191 = vector.load %arg9[%c0_89, %c0_90] : memref<32x256xf32, #tpu.memory_space<vmem>>, vector<32x256xf32>
    tpu.vector_store %arg9[%c0_89, %c0_90], %178 {strides = array<i32>} : memref<32x256xf32, #tpu.memory_space<vmem>>, vector<32x256xf32>,
    %c0_91 = arith.constant 0 : index
    %c0_92 = arith.constant 0 : index
    %c0_93 = arith.constant 0 : index
    %c0_94 = arith.constant 0 : index
    %192 = vector.load %arg7[%c0_91, %c0_92, %c0_93, %c0_94] : memref<1x1x32x256xf32, #tpu.memory_space<vmem>>, vector<1x1x32x256xf32>
    %193 = vector.shape_cast %192 : vector<1x1x32x256xf32> to vector<32x256xf32>
    %194 = vector.shape_cast %189 : vector<32x256xf32> to vector<1x1x32x256xf32>
    tpu.vector_store %arg7[%c0_91, %c0_92, %c0_93, %c0_94], %194 {strides = array<i32>} : memref<1x1x32x256xf32, #tpu.memory_space<vmem>>, vector<1x1x32x256xf32>,
    return
  }
  func.func @transform_0(%arg0: i32, %arg1: i32) -> (i32, i32, i32, i32) {
    %c0_i32 = arith.constant 0 : i32
    %c0_i32_0 = arith.constant 0 : i32
    %c0_i32_1 = arith.constant 0 : i32
    return %arg0, %arg1, %c0_i32, %c0_i32_0 : i32, i32, i32, i32
  }
  func.func @transform_1(%arg0: i32, %arg1: i32) -> (i32, i32) {
    %c0_i32 = arith.constant 0 : i32
    %c0_i32_0 = arith.constant 0 : i32
    %c0_i32_1 = arith.constant 0 : i32
    return %c0_i32, %c0_i32_0 : i32, i32
  }
  func.func @transform_2(%arg0: i32, %arg1: i32) -> (i32, i32) {
    %c0_i32 = arith.constant 0 : i32
    %c0_i32_0 = arith.constant 0 : i32
    %c0_i32_1 = arith.constant 0 : i32
    return %c0_i32, %c0_i32_0 : i32, i32
  }
  func.func @transform_3(%arg0: i32, %arg1: i32) -> (i32, i32) {
    %c0_i32 = arith.constant 0 : i32
    %c0_i32_0 = arith.constant 0 : i32
    %c0_i32_1 = arith.constant 0 : i32
    return %c0_i32, %c0_i32_0 : i32, i32
  }
  func.func @transform_4(%arg0: i32, %arg1: i32) -> (i32, i32, i32) {
    %c0_i32 = arith.constant 0 : i32
    %c0_i32_0 = arith.constant 0 : i32
    %c0_i32_1 = arith.constant 0 : i32
    %c0_i32_2 = arith.constant 0 : i32
    return %c0_i32, %c0_i32_0, %c0_i32_1 : i32, i32, i32
  }
  func.func @transform_5(%arg0: i32, %arg1: i32) -> (i32, i32, i32, i32) {
    %c0_i32 = arith.constant 0 : i32
    %c0_i32_0 = arith.constant 0 : i32
    %c0_i32_1 = arith.constant 0 : i32
    return %arg0, %arg1, %c0_i32, %c0_i32_0 : i32, i32, i32, i32
  }
}

</mosaic_0001>

<bundles_post_ra>
// kernel: convlstm3d_forward.1
= control target key start
LH: loop header
LB: loop body
LE: loop exit
PB: predicated region body
PF: predicated region fallthrough
CT: control target
= control target key end

     0   :  { %s5338_s18 = smov 0   ;;  %s5340_s19 = smov 0   ;;  %s7161_s0 = inlined_call_operand.vmem [shape: f32[2,4,4,256], index: 0, kind: input, shape index: {}]   ;;  %s7162_s1 = inlined_call_operand.vmem [shape: bf16[128,1296], index: 1, kind: input, shape index: {}]   ;;  %s7163_s2 = inlined_call_operand.vmem [shape: f32[128,1], index: 2, kind: input, shape index: {}]   ;;  %s7164_s3 = inlined_call_operand.vmem [shape: bf16[27,256], index: 3, kind: input, shape index: {}]   ;;  %s7165_s4 = inlined_call_operand.vmem [shape: f32[3,32,256], index: 4, kind: input, shape index: {}]   ;;  %s7166_s5 = inlined_call_operand.vmem [shape: f32[2,4,32,256], index: 5, kind: output, shape index: {}]  }
   0x1   :  { %s5342_s20 = smov 0   ;;  %s5344_s21 = smov 0  }
   0x2   :  { %s5346_s22 = smov 0  }
   0x3 LB: > { %s24_s23 = sadd.s32 1, %s5278_s20  ;;  %s27_s24 = sadd.s32 1, %s5282_s21  ;;  %s5286_s22 = sphi %s5346_s22, %s15_s22   ;;  %s5282_s21 = sphi %s5344_s21, %s7170_s21   ;;  %s5278_s20 = sphi %s5342_s20, %s7169_s20   ;;  %s5274_s19 = sphi %s5340_s19, %s7168_s19   ;;  %s5270_s18 = sphi %s5338_s18, %s7167_s18  }
   0x4   : > { %p25_p0 = scmp.ge.s32.totalorder %s24_s23, 4  ;;  %p4471_p1 = scmp.ge.s32.totalorder %s5286_s22, 1 }
   0x5   : > { %p207_p2 = scmp.lt.s32.totalorder %s5286_s22, 9 }
   0x6   : > { %s7172_s23 = smov (%p25_p0, %s24_s23), 0  ;;  %s7174_s24 = smov (!%p25_p0, %s27_s24), %s5282_s21 }
   0x7   : > { %p208_p3 = pnand %p4471_p1, %p207_p2  ;;  %p29_p4 = scmp.ge.s32.totalorder %s7174_s24, 2 }
   0x8   : > { %p243_p5 = scmp.lt.s32.totalorder (!%p208_p3), %s5274_s19, 1  ;;  %p245_p6 = scmp.lt.s32.totalorder (!%p208_p3), %s5270_s18, 3 }
   0x9   : > { %s7176_s24 = smov (%p29_p4, %s7174_s24), 0  ;;  %211 = sbr.rel (%p208_p3) target bundleno = 1131 (0x46b), region = 40 }
   0xa   : > { %p4478_p7 = scmp.ne.s32.totalorder (!%p208_p3), %s5270_s18, 0 }
  0x10   : > { %s7178_s19 = smov (!%p243_p5, %s5274_s19), 1  ;;  %265 = sbr.rel (%p4478_p7) target bundleno = 30 (0x1e), region = 44 }
  0x11   : > { %s246_s25 = scalar_select %p245_p6, %s5270_s18, 3 }
  0x12   : > { %s4473_s26 = sshll.u32 %s7178_s19, 3  ;;  %s4476_s27 = sshll.u32 %s7178_s19, 5  ;;  %v5288_v0 = vmov (!%p4478_p7), 0.0   ;;  %v5289_v1 = vmov (!%p4478_p7), 0  }
  0x13   : > { %s4472_s28 = sshll.u32 %s246_s25, 1  ;;  %s4475_s29 = sshll.u32 %s246_s25, 3  ;;  %266 = vst [vmem:[#allocation2] sm:$0xff] (!%p4478_p7), %v5288_v0  ;;  %267 = vst [vmem:[#allocation2 + $0x8] sm:$0xff] (!%p4478_p7), %v5288_v0 }
  0x14   : > { %s249_s30 = sadd.s32 %s4473_s26, %s4472_s28  ;;  %s258_s6 = sadd.s32 %s4476_s27, %s4475_s29  ;;  %268 = vst [vmem:[#allocation2 + $0x10] sm:$0xff] (!%p4478_p7), %v5288_v0  ;;  %269 = vst [vmem:[#allocation2 + $0x18] sm:$0xff] (!%p4478_p7), %v5288_v0 }
  0x15   : > { %s4474_s7 = sshll.u32 %s249_s30, 2  ;;  %s4477_s8 = sshll.u32 %s258_s6, 3  ;;  %270 = vst [vmem:[#allocation2 + $0x20] sm:$0xff] (!%p4478_p7), %v5288_v0  ;;  %271 = vst [vmem:[#allocation2 + $0x28] sm:$0xff] (!%p4478_p7), %v5288_v0 }
  0x16   : > { %s5375_s11 = scalar_lea.vmem %s7161_s0, %s4474_s7  ;;  %s5380_s14 = scalar_lea.vmem %s7166_s5, %s4477_s8  ;;  %272 = vst [vmem:[#allocation2 + $0x30] sm:$0xff] (!%p4478_p7), %v5288_v0  ;;  %273 = vst [vmem:[#allocation2 + $0x38] sm:$0xff] (!%p4478_p7), %v5288_v0 }
  0x17   : > { %274 = vst [vmem:[#allocation3] sm:$0xff] %v5288_v0  ;;  %275 = vst [vmem:[#allocation3 + $0x8] sm:$0xff] %v5288_v0 }
  0x18   : > { %276 = vst [vmem:[#allocation3 + $0x10] sm:$0xff] %v5288_v0  ;;  %277 = vst [vmem:[#allocation3 + $0x18] sm:$0xff] %v5288_v0 }
  0x19   : > { %278 = vst [vmem:[#allocation3 + $0x20] sm:$0xff] %v5288_v0  ;;  %279 = vst [vmem:[#allocation3 + $0x28] sm:$0xff] %v5288_v0 }
  0x1a   : > { %280 = vst [vmem:[#allocation3 + $0x30] sm:$0xff] %v5288_v0  ;;  %281 = vst [vmem:[#allocation3 + $0x38] sm:$0xff] %v5288_v0 }
  0x1b   : > { %282 = vst [vmem:[#allocation4] sm:$0xff] %v5289_v1  ;;  %283 = vst [vmem:[#allocation4 + $0x8] sm:$0xff] %v5289_v1 }
  0x1c   : > { %284 = vst [vmem:[#allocation4 + $0x10] sm:$0xff] %v5289_v1  ;;  %285 = vst [vmem:[#allocation4 + $0x18] sm:$0xff] %v5289_v1 }
  0x1d   : > { %286 = vst [vmem:[#allocation4 + $0x20] sm:$0xff] %v5289_v1  ;;  %287 = vst [vmem:[#allocation4 + $0x28] sm:$0xff] %v5289_v1 }
  0x1e PF: > { %v318_v2 = vld [vmem:[%s7164_s3] sm:$0x11]  ;;  %v327_v3 = vlaneseq  ;;  %v1643_v4 = vld [vmem:[%s7164_s3 + $0x10] sm:$0x11]  ;;  %v492_v21 = vld [vmem:[%s7164_s3] sm:$0x22] }
  0x1f   : > { %v4479_v5 = vcombine.low %v318_v2, %v318_v2  ;;  %v4480_v6 = vcombine.high %v318_v2, %v318_v2  ;;  %v4512_v7 = vcombine.high %v1643_v4, %v1643_v4  ;;  %v404_v8 = vld [vmem:[%s7164_s3] sm:$0x11]  ;;  %v1727_v9 = vld [vmem:[%s7164_s3 + $0x10] sm:$0x11]  ;;  %v4511_v14 = vcombine.low %v1643_v4, %v1643_v4  ;;  %s5290_s30 = smov 55   ;;  %s5291_s6 = smov 8  }
  0x20   : > { %v5395_v10 = vshrl.u32 %v327_v3, 7  ;;  %v4481_v11 = vcombine.low %v404_v8, %v404_v8  ;;  %v4514_v12 = vcombine.high %v1727_v9, %v1727_v9  ;;  %v4482_v16 = vcombine.high %v404_v8, %v404_v8  ;;  %v1813_v32 = vld [vmem:[%s7164_s3 + $0x10] sm:$0x22]  ;;  %v578_v33 = vld [vmem:[%s7164_s3] sm:$0x22]  ;;  %s5292_s15 = smov 56  }
  0x21   : > { %v325_v13 = vpack.i.b16 %v4479_v5, %v4479_v5  ;;  %v1657_v15 = vpack.i.b16 %v4512_v7, %v4512_v7  ;;  %v332_v18 = vpack.i.b16 %v4480_v6, %v4480_v6  ;;  %v1650_v25 = vpack.i.b16 %v4511_v14, %v4511_v14  ;;  %v1897_v38 = vld [vmem:[%s7164_s3 + $0x10] sm:$0x22]  ;;  %s5293_s16 = smov 9   ;;  %v666_v50 = vld [vmem:[%s7164_s3] sm:$0x44]  ;;  %s5294_s19 = smov 57  }
  0x22   : > { %v5398_v17 = vsub.s32 0, %v5395_v10  ;;  %v411_v19 = vshrl.u32 %v4481_v11, 16  ;;  %v1742_v20 = vshrl.u32 %v4514_v12, 16  ;;  %v419_v26 = vshrl.u32 %v4482_v16, 16  ;;  %v289_v61 = vld [vmem:[#allocation2 + $0x8] sm:$0xff]  ;;  %v291_v62 = vld [vmem:[#allocation2 + $0x18] sm:$0xff] }
  0x23   : > { %v4483_v27 = vcombine.low %v492_v21, %v492_v21  ;;  %v4513_v28 = vcombine.low %v1727_v9, %v1727_v9  ;;  %v5417_v37 = vsub.s32 1, %v5395_v10  ;;  %v4515_v41 = vcombine.low %v1813_v32, %v1813_v32  ;;  %v293_v63 = vld [vmem:[#allocation2 + $0x28] sm:$0xff]  ;;  %v304_v1 = vld [vmem:[%s5375_s11] sm:$0xff]  ;;  %v290_v3 = vld [vmem:[#allocation2 + $0x10] sm:$0xff]  ;;  %s5295_s7 = smov 63   ;;  %s5296_s10 = smov 64  }
  0x24   : > { %v330_v22 = vrot.slane %v325_v13, %v5398_v17  ;;  %v1662_v23 = vrot.slane %v1657_v15, %v5398_v17  ;;  %v412_v24 = vpack.i.b16 %v411_v19, %v411_v19  ;;  %v337_v29 = vrot.slane %v332_v18, %v5398_v17  ;;  %v295_v0 = vld [vmem:[#allocation2 + $0x38] sm:$0xff]  ;;  %v288_v2 = vld [vmem:[#allocation2] sm:$0xff]  ;;  %v1983_v4 = vld [vmem:[%s7164_s3 + $0x10] sm:$0x44]  ;;  %s5297_s17 = smov 65   ;;  %s5298_s18 = smov 71  }
  0x25   : > { %v1743_v31 = vpack.i.b16 %v1742_v20, %v1742_v20  ;;  %v1655_v34 = vrot.slane %v1650_v25, %v5398_v17  ;;  %v420_v35 = vpack.i.b16 %v419_v26, %v419_v26  ;;  %v499_v36 = vpack.i.b16 %v4483_v27, %v4483_v27  ;;  %v292_v5 = vld [vmem:[#allocation2 + $0x20] sm:$0xff]  ;;  %v294_v12 = vld [vmem:[#allocation2 + $0x30] sm:$0xff]  ;;  %s5299_s25 = smov 73   ;;  %s5300_s26 = smov 120  }
  0x26   : > { %340 = vrot.lane.b32.xlu0 %v330_v22, %s5290_s30  ;;  %1667 = vrot.lane.b32.xlu1 %v1662_v23, %s5291_s6  ;;  %v417_v30 = vrot.slane %v412_v24, %v5398_v17  ;;  %v1734_v40 = vshrl.u32 %v4513_v28, 16  ;;  %v4485_v42 = vcombine.low %v578_v33, %v578_v33  ;;  %v4484_v45 = vcombine.high %v492_v21, %v492_v21  ;;  %v751_v7 = vld [vmem:[%s7164_s3] sm:$0x44]  ;;  %v2067_v24 = vld [vmem:[%s7164_s3 + $0x10] sm:$0x44]  ;;  %s5301_s27 = smov 72  }
  0x27   : > { %v1748_v39 = vrot.slane %v1743_v31, %v5398_v17  ;;  %v425_v43 = vrot.slane %v420_v35, %v5398_v17  ;;  %v504_v44 = vrot.slane %v499_v36, %v5417_v37  ;;  %v1820_v47 = vpack.i.b16 %v4515_v41, %v4515_v41  ;;  %s5302_s28 = smov 119   ;;  %s5303_s13 = smov 121  }
  0x28   : > { %v1735_v46 = vpack.i.b16 %v1734_v40, %v1734_v40  ;;  %v585_v48 = vshrl.u32 %v4485_v42, 16  ;;  %v4517_v49 = vcombine.low %v1897_v38, %v1897_v38  ;;  %v4516_v51 = vcombine.high %v1813_v32, %v1813_v32  ;;  %s5306_s29 = smov 7  }
  0x29   : > { %v506_v52 = vpack.i.b16 %v4484_v45, %v4484_v45  ;;  %v4486_v53 = vcombine.high %v578_v33, %v578_v33  ;;  %v1825_v55 = vrot.slane %v1820_v47, %v5417_v37  ;;  %v4518_v59 = vcombine.high %v1897_v38, %v1897_v38  ;;  %v837_v38 = vld [vmem:[%s7164_s3] sm:$0x88] }
  0x2a   : > { %342 = vrot.lane.b32.xlu0 %v337_v29, %s5290_s30  ;;  %428 = vrot.lane.b32.xlu1 %v417_v30, %s5292_s15  ;;  %v1740_v54 = vrot.slane %v1735_v46, %v5398_v17  ;;  %v586_v56 = vpack.i.b16 %v585_v48, %v585_v48  ;;  %v1904_v57 = vshrl.u32 %v4517_v49, 16  ;;  %v1827_v58 = vpack.i.b16 %v4516_v51, %v4516_v51  ;;  %v2153_v46 = vld [vmem:[%s7164_s3 + $0x10] sm:$0x88] }
  0x2b   : > { %v4487_v60 = vcombine.low %v666_v50, %v666_v50  ;;  %v593_v6 = vshrl.u32 %v4486_v53, 16  ;;  %v511_v8 = vrot.slane %v506_v52, %v5417_v37  ;;  %v1912_v14 = vshrl.u32 %v4518_v59, 16 }
  0x2c   : > { %v591_v9 = vrot.slane %v586_v56, %v5417_v37  ;;  %v1905_v11 = vpack.i.b16 %v1904_v57, %v1904_v57  ;;  %v1832_v13 = vrot.slane %v1827_v58, %v5417_v37  ;;  %v5449_v16 = vsub.s32 2, %v5395_v10 }
  0x2d   : > { %v673_v15 = vpack.i.b16 %v4487_v60, %v4487_v60  ;;  %v5451_v18 = vpack.c.bf16 %v291_v62, %v289_v61  ;;  %v5453_v19 = vpack.c.bf16 %v295_v0, %v293_v63  ;;  %v306_v20 = vcombine.high %v304_v1, %v304_v1 }
  0x2e   : > { %1665 = vrot.lane.b32.xlu0 %v1655_v34, %s5291_s6  ;;  %1753 = vrot.lane.b32.xlu1 %v1748_v39, %s5293_s16  ;;  %v5455_v21 = vpack.c.bf16 %v290_v3, %v288_v2  ;;  %v594_v22 = vpack.i.b16 %v593_v6, %v593_v6  ;;  %v4519_v23 = vcombine.low %v1983_v4, %v1983_v4  ;;  %v5492_v60 = vsub.s32 3, %v5395_v10 }
  0x2f   : > { %v5460_v25 = vpack.c.bf16 %v294_v12, %v292_v5  ;;  %v308_v26 = vpack.c.bf16 %v304_v1, %v304_v1  ;;  %v1910_v27 = vrot.slane %v1905_v11, %v5417_v37  ;;  %v4489_v28 = vcombine.low %v751_v7, %v751_v7  ;;  %301 = vst [vmem:[#allocation4 + $0x8] sm:$0xff] %v5451_v18 }
  0x30   : > { %303 = vst [vmem:[#allocation4 + $0x18] sm:$0xff] %v5453_v19  ;;  %v309_v29 = vpack.c.bf16 %v306_v20, %v306_v20  ;;  %300 = vst [vmem:[#allocation4] sm:$0xff] %v5455_v21  ;;  %v1913_v30 = vpack.i.b16 %v1912_v14, %v1912_v14  ;;  %v678_v31 = vrot.slane %v673_v15, %v5449_v16  ;;  %vm344_vm0 = vcmask 449536  }
  0x31   : > { %302 = vst [vmem:[#allocation4 + $0x10] sm:$0xff] %v5460_v25  ;;  %310 = vst [vmem:[#allocation4 + $0x20] sm:$0x3] %v308_v26  ;;  %v4488_v32 = vcombine.high %v666_v50, %v666_v50  ;;  %v599_v33 = vrot.slane %v594_v22, %v5417_v37  ;;  %v1990_v34 = vpack.i.b16 %v4519_v23, %v4519_v23  ;;  %v758_v35 = vshrl.u32 %v4489_v28, 16 }
  0x32   : > { %430 = vrot.lane.b32.xlu0 %v425_v43, %s5292_s15  ;;  %514 = vrot.lane.b32.xlu1 %v504_v44, %s5294_s19  ;;  %311 = vst [vmem:[#allocation4 + $0x28] sm:$0x3] %v309_v29  ;;  %v4521_v36 = vcombine.low %v2067_v24, %v2067_v24  ;;  %v1918_v39 = vrot.slane %v1913_v30, %v5417_v37  ;;  %vm1246_vm1 = vcmask 64512   ;;  %vm432_vm2 = vcmask 457728  }
  0x33   : > { %v680_v40 = vpack.i.b16 %v4488_v32, %v4488_v32  ;;  %v4520_v41 = vcombine.high %v1983_v4, %v1983_v4  ;;  %v1995_v42 = vrot.slane %v1990_v34, %v5449_v16  ;;  %v759_v43 = vpack.i.b16 %v758_v35, %v758_v35 }
  0x34   : > { %v4490_v44 = vcombine.high %v751_v7, %v751_v7  ;;  %v2074_v45 = vshrl.u32 %v4521_v36, 16  ;;  %v4522_v48 = vcombine.high %v2067_v24, %v2067_v24  ;;  %v4491_v49 = vcombine.low %v837_v38, %v837_v38 }
  0x35   : > { %v685_v47 = vrot.slane %v680_v40, %v5449_v16  ;;  %v1997_v50 = vpack.i.b16 %v4520_v41, %v4520_v41  ;;  %v764_v51 = vrot.slane %v759_v43, %v5449_v16  ;;  %v4524_v56 = vcombine.high %v2153_v46, %v2153_v46 }
  0x36   : > { %1751 = vrot.lane.b32.xlu0 %v1740_v54, %s5293_s16  ;;  %1835 = vrot.lane.b32.xlu1 %v1825_v55, %s5290_s30  ;;  %v766_v52 = vshrl.u32 %v4490_v44, 16  ;;  %v2075_v53 = vpack.i.b16 %v2074_v45, %v2074_v45  ;;  %v2082_v54 = vshrl.u32 %v4522_v48, 16  ;;  %v844_v55 = vpack.i.b16 %v4491_v49, %v4491_v49 }
  0x37   : > { %v2002_v57 = vrot.slane %v1997_v50, %v5449_v16  ;;  %v4492_v62 = vcombine.high %v837_v38, %v837_v38  ;;  %v2167_v1 = vpack.i.b16 %v4524_v56, %v4524_v56  ;;  %v4523_v4 = vcombine.low %v2153_v46, %v2153_v46 }
  0x38   : > { %v767_v58 = vpack.i.b16 %v766_v52, %v766_v52  ;;  %v2080_v59 = vrot.slane %v2075_v53, %v5449_v16  ;;  %v2083_v61 = vpack.i.b16 %v2082_v54, %v2082_v54  ;;  %v849_v0 = vrot.slane %v844_v55, %v5492_v60  ;;  %v5535_v32 = vld [vmem:[#allocation4 + $0x20] sm:$0xff] }
  0x39   : > { %v851_v2 = vpack.i.b16 %v4492_v62, %v4492_v62  ;;  %v2172_v10 = vrot.slane %v2167_v1, %v5492_v60  ;;  %v2160_v6 = vpack.i.b16 %v4523_v4, %v4523_v4  ;;  %v5514_v20 = vld [vmem:[#allocation4 + $0x28] sm:$0xff]  ;;  %vm1160_vm3 = vcmask 72704  }
  0x3a   : > { %516 = vrot.lane.b32.xlu0 %v511_v8, %s5294_s19  ;;  %602 = vrot.lane.b32.xlu1 %v591_v9, %s5295_s7  ;;  %v772_v63 = vrot.slane %v767_v58, %v5449_v16  ;;  %v2088_v3 = vrot.slane %v2083_v61, %v5449_v16  ;;  %vm518_vm4 = vcmask 465920   ;;  %vm606_vm5 = vcmask 515072  }
  0x3b   : > { %v856_v5 = vrot.slane %v851_v2, %v5492_v60  ;;  %v2165_v7 = vrot.slane %v2160_v6, %v5492_v60  ;;  %vm385_vm6 = vcmask 596992   ;;  %vm692_vm7 = vcmask 523264  }
  0x3c   : > { %vm1205_vm8 = vcmask 982016   ;;  %vm473_vm9 = vcmask 588800   ;;  %vm1119_vm10 = vcmask 973824   ;;  %vm559_vm11 = vcmask 580608  }
  0x3d   : > { %vm647_vm12 = vcmask 531456   ;;  %vm1293_vm13 = vcmask 990208   ;;  %vm1379_vm14 = vcmask 1039360   ;;  %vm1420_vm15 = vcmask 7168  }
  0x3e   : > { %1837 = vrot.lane.b32.xlu0 %v1832_v13, %s5290_s30  ;;  %1921 = vrot.lane.b32.xlu1 %v1910_v27, %s5292_s15 }
  0x42   : > { %604 = vrot.lane.b32.xlu0 %v599_v33, %s5295_s7  ;;  %688 = vrot.lane.b32.xlu1 %v678_v31, %s5296_s10 }
  0x46   : > { %1923 = vrot.lane.b32.xlu0 %v1918_v39, %s5292_s15  ;;  %2005 = vrot.lane.b32.xlu1 %v1995_v42, %s5294_s19 }
  0x4a   : > { %690 = vrot.lane.b32.xlu0 %v685_v47, %s5296_s10  ;;  %775 = vrot.lane.b32.xlu1 %v764_v51, %s5297_s17 }
  0x4e   : > { %2007 = vrot.lane.b32.xlu0 %v2002_v57, %s5294_s19  ;;  %2091 = vrot.lane.b32.xlu1 %v2080_v59, %s5295_s7  ;;  %v921_v57 = vld [vmem:[%s7164_s3] sm:$0x88] }
  0x4f   : > { %v4493_v61 = vcombine.low %v921_v57, %v921_v57  ;;  %v4494_v2 = vcombine.high %v921_v57, %v921_v57 }
  0x51   : > { %v928_v1 = vshrl.u32 %v4493_v61, 16 }
  0x52   : > { %777 = vrot.lane.b32.xlu0 %v772_v63, %s5297_s17  ;;  %859 = vrot.lane.b32.xlu1 %v849_v0, %s5298_s18 }
  0x53   : > { %v929_v6 = vpack.i.b16 %v928_v1, %v928_v1 }
  0x56   : > { %2093 = vrot.lane.b32.xlu0 %v2088_v3, %s5295_s7  ;;  %2177 = vrot.lane.b32.xlu1 %v2172_v10, %s5296_s10 }
  0x5a   : > { %861 = vrot.lane.b32.xlu0 %v856_v5, %s5298_s18 }
  0x5e   : > { %2175 = vrot.lane.b32.xlu0 %v2165_v7, %s5296_s10  ;;  %v936_v7 = vshrl.u32 %v4494_v2, 16 }
  0x98   : > { %v341_v8 = vpop.permute.xlu0 %340  ;;  %v1668_v9 = vpop.permute.xlu1 %1667 }
  0x99   : > { %v349_v11 = vmul.bf16 %v341_v8, %v5451_v18  ;;  %v352_v15 = vmul.bf16 %v341_v8, %v5453_v19  ;;  %v355_v23 = vmul.bf16 %v341_v8, %v5514_v20  ;;  %v1678_v31 = vmul.bf16 %v1668_v9, %v5460_v25 }
  0x9a   : > { %v1675_v33 = vmul.bf16 %v1668_v9, %v5455_v21  ;;  %v1681_v39 = vmul.bf16 %v1668_v9, %v5535_v32 }
  0x9b   : > { %367 = vrot.lane.b32.xlu1 %v349_v11, %s5299_s25 }
  0x9c   : > { %v343_v12 = vpop.permute.xlu0 %342  ;;  %v5510_v13 = vpop.permute.xlu1 %428 }
  0x9d   : > { %v351_v14 = vmul.bf16 %v343_v12, %v5451_v18  ;;  %v354_v24 = vmul.bf16 %v343_v12, %v5453_v19  ;;  %v357_v29 = vmul.bf16 %v343_v12, %v5514_v20  ;;  %v345_v35 = vsel %vm344_vm0, %v341_v8, %v343_v12  ;;  %v2237_v8 = vld [vmem:[%s7164_s3 + $0x10] sm:$0x88] }
  0x9e   : > { %v350_v38 = vmul.bf16 %v345_v35, %v5455_v21  ;;  %v356_v40 = vmul.bf16 %v345_v35, %v5535_v32  ;;  %v353_v41 = vmul.bf16 %v345_v35, %v5460_v25  ;;  %v437_v42 = vmul.bf16 %v5510_v13, %v5451_v18 }
  0x9f   : > { %371 = vrot.lane.b32.xlu0 %v351_v14, %s5299_s25  ;;  %373 = vrot.lane.b32.xlu1 %v352_v15, %s5299_s25  ;;  %v440_v45 = vmul.bf16 %v5510_v13, %v5453_v19  ;;  %v443_v47 = vmul.bf16 %v5510_v13, %v5514_v20  ;;  %v934_v14 = vrot.slane %v929_v6, %v5492_v60 }
  0xa0   : > { %v5518_v22 = vpop.permute.xlu1 %1753  ;;  %v1666_v26 = vpop.permute.xlu0 %1665  ;;  %v937_v15 = vpack.i.b16 %v936_v7, %v936_v7 }
  0xa1   : > { %v1673_v27 = vmul.bf16 %v1666_v26, %v5455_v21  ;;  %v1679_v34 = vmul.bf16 %v1666_v26, %v5535_v32  ;;  %v1676_v36 = vmul.bf16 %v1666_v26, %v5460_v25  ;;  %v1669_v48 = vsel %vm1246_vm1, %v1666_v26, %v1668_v9 }
  0xa2   : > { %v1677_v49 = vmul.bf16 %v1669_v48, %v5453_v19  ;;  %v1674_v53 = vmul.bf16 %v1669_v48, %v5451_v18  ;;  %v1764_v54 = vmul.bf16 %v5518_v22, %v5460_v25  ;;  %v1680_v55 = vmul.bf16 %v1669_v48, %v5514_v20 }
  0xa3   : > { %379 = vrot.lane.b32.xlu0 %v355_v23, %s5299_s25  ;;  %377 = vrot.lane.b32.xlu1 %v354_v24, %s5299_s25  ;;  %v1761_v59 = vmul.bf16 %v5518_v22, %v5455_v21  ;;  %v1767_v5 = vmul.bf16 %v5518_v22, %v5535_v32  ;;  %v4525_v23 = vcombine.low %v2237_v8, %v2237_v8 }
  0xa4   : > { %v5525_v28 = vpop.permute.xlu1 %514  ;;  %v431_v43 = vpop.permute.xlu0 %430  ;;  %v942_v26 = vrot.slane %v937_v15, %v5492_v60  ;;  %v2323_v15 = vld [vmem:[%s7164_s3 + $0x18] sm:$0x11] }
  0xa5   : > { %v523_v30 = vmul.bf16 %v5525_v28, %v5451_v18  ;;  %v439_v44 = vmul.bf16 %v431_v43, %v5451_v18  ;;  %v442_v46 = vmul.bf16 %v431_v43, %v5453_v19  ;;  %v445_v50 = vmul.bf16 %v431_v43, %v5514_v20 }
  0xa6   : > { %v433_v56 = vsel %vm432_vm2, %v5510_v13, %v431_v43 }
  0xa7   : > { %383 = vrot.lane.b32.xlu0 %v357_v29, %s5299_s25  ;;  %1691 = vrot.lane.b32.xlu1 %v1673_v27, %s5300_s26  ;;  %v438_v58 = vmul.bf16 %v433_v56, %v5455_v21  ;;  %v444_v62 = vmul.bf16 %v433_v56, %v5535_v32  ;;  %v441_v11 = vmul.bf16 %v433_v56, %v5460_v25 }
  0xa8   : > { %v1752_v51 = vpop.permute.xlu0 %1751  ;;  %v5595_v3 = vpop.permute.xlu1 %1835 }
  0xa9   : > { %v1759_v52 = vmul.bf16 %v1752_v51, %v5455_v21  ;;  %v1762_v63 = vmul.bf16 %v1752_v51, %v5460_v25  ;;  %v1755_v0 = vsel %vm1160_vm3, %v1752_v51, %v5518_v22  ;;  %v4526_v22 = vcombine.high %v2237_v8, %v2237_v8 }
  0xaa   : > { %v1760_v4 = vmul.bf16 %v1755_v0, %v5451_v18  ;;  %v1766_v9 = vmul.bf16 %v1755_v0, %v5514_v20  ;;  %v1763_v24 = vmul.bf16 %v1755_v0, %v5453_v19 }
  0xab   : > { %541 = vrot.lane.b32.xlu0 %v523_v30, %s5298_s18  ;;  %1701 = vrot.lane.b32.xlu1 %v1678_v31, %s5300_s26  ;;  %v2252_v29 = vshrl.u32 %v4526_v22, 16  ;;  %v2244_v30 = vshrl.u32 %v4525_v23, 16 }
  0xac   : > { %v5597_v10 = vpop.permute.xlu0 %516  ;;  %v5611_v13 = vpop.permute.xlu1 %602 }
  0xad   : > { %v525_v35 = vmul.bf16 %v5597_v10, %v5451_v18 }
  0xaf   : > { %1695 = vrot.lane.b32.xlu0 %v1675_v33, %s5300_s26  ;;  %1703 = vrot.lane.b32.xlu1 %v1679_v34, %s5300_s26  ;;  %v1765_v33 = vmul.bf16 %v1752_v51, %v5535_v32  ;;  %v519_v34 = vsel %vm518_vm4, %v5525_v28, %v5597_v10 }
  0xb0   : > { %v5609_v12 = vpop.permute.xlu0 %1837  ;;  %v5622_v31 = vpop.permute.xlu1 %1921 }
  0xb1   : > { %v1848_v57 = vmul.bf16 %v5609_v12, %v5460_v25 }
  0xb3   : > { %1697 = vrot.lane.b32.xlu0 %v1676_v36, %s5300_s26  ;;  %369 = vrot.lane.b32.xlu1 %v350_v38, %s5299_s25  ;;  %v2253_v36 = vpack.i.b16 %v2252_v29, %v2252_v29  ;;  %v2245_v38 = vpack.i.b16 %v2244_v30, %v2244_v30 }
  0xb4   : > { %v5620_v27 = vpop.permute.xlu0 %604 }
  0xb5   : > { %v2250_v43 = vrot.slane %v2245_v38, %v5492_v60 }
  0xb7   : > { %1707 = vrot.lane.b32.xlu0 %v1681_v39, %s5300_s26  ;;  %381 = vrot.lane.b32.xlu1 %v356_v40, %s5299_s25  ;;  %v524_v39 = vmul.bf16 %v519_v34, %v5455_v21 }
  0xb8   : > { %v5633_v40 = vpop.permute.xlu0 %1923 }
  0xbb   : > { %375 = vrot.lane.b32.xlu0 %v353_v41, %s5299_s25  ;;  %455 = vrot.lane.b32.xlu1 %v437_v42, %s5301_s27  ;;  %v5635_v41 = vpop.permute.xlu1 %688  ;;  %v2258_v42 = vrot.slane %v2253_v36, %v5492_v60 }
  0xbf   : > { %461 = vrot.lane.b32.xlu0 %v440_v45, %s5301_s27  ;;  %459 = vrot.lane.b32.xlu1 %v439_v44, %s5301_s27  ;;  %v1839_v44 = vsel %vm344_vm0, %v5595_v3, %v5609_v12  ;;  %v5646_v45 = vpop.permute.xlu0 %690 }
  0xc0   : > { %v1844_v48 = vmul.bf16 %v1839_v44, %v5451_v18 }
  0xc3   : > { %465 = vrot.lane.b32.xlu0 %v442_v46, %s5301_s27  ;;  %467 = vrot.lane.b32.xlu1 %v443_v47, %s5301_s27  ;;  %v5648_v46 = vpop.permute.xlu1 %2005  ;;  %v1845_v47 = vmul.bf16 %v5609_v12, %v5455_v21  ;;  %v5658_v51 = vpop.permute.xlu0 %2007 }
  0xc7   : > { %1699 = vrot.lane.b32.xlu0 %v1677_v49, %s5300_s26  ;;  %471 = vrot.lane.b32.xlu1 %v445_v50, %s5301_s27  ;;  %v527_v49 = vmul.bf16 %v519_v34, %v5460_v25  ;;  %v1843_v50 = vmul.bf16 %v5595_v3, %v5455_v21 }
  0xcb   : > { %1777 = vrot.lane.b32.xlu0 %v1759_v52, %s5302_s28  ;;  %1693 = vrot.lane.b32.xlu1 %v1674_v53, %s5300_s26  ;;  %v5660_v52 = vpop.permute.xlu1 %775  ;;  %v526_v53 = vmul.bf16 %v5525_v28, %v5453_v19 }
  0xcf   : > { %1787 = vrot.lane.b32.xlu0 %v1764_v54, %s5302_s28  ;;  %1705 = vrot.lane.b32.xlu1 %v1680_v55, %s5300_s26  ;;  %v528_v54 = vmul.bf16 %v5597_v10, %v5453_v19  ;;  %v5670_v55 = vpop.permute.xlu0 %777  ;;  %v5672_v56 = vpop.permute.xlu1 %2091 }
  0xd3   : > { %457 = vrot.lane.b32.xlu0 %v438_v58, %s5301_s27  ;;  %1781 = vrot.lane.b32.xlu1 %v1761_v59, %s5302_s28  ;;  %v1847_v58 = vmul.bf16 %v1839_v44, %v5453_v19  ;;  %v1007_v59 = vld [vmem:[%s7164_s3 + $0x8] sm:$0x11]  ;;  %v5682_v61 = vpop.permute.xlu0 %2093  ;;  %v5687_v0 = vpop.permute.xlu1 %859 }
  0xd4   : > { %v4496_v1 = vcombine.high %v1007_v59, %v1007_v59  ;;  %v4495_v2 = vcombine.low %v1007_v59, %v1007_v59 }
  0xd6   : > { %v1021_v8 = vpack.i.b16 %v4496_v1, %v4496_v1 }
  0xd7   : > { %469 = vrot.lane.b32.xlu0 %v444_v62, %s5301_s27  ;;  %1783 = vrot.lane.b32.xlu1 %v1762_v63, %s5302_s28  ;;  %v530_v62 = vmul.bf16 %v519_v34, %v5535_v32  ;;  %v1846_v63 = vmul.bf16 %v5595_v3, %v5460_v25  ;;  %v5695_v6 = vpop.permute.xlu0 %861  ;;  %v5699_v7 = vpop.permute.xlu1 %2177  ;;  %v1849_v34 = vmul.bf16 %v5595_v3, %v5535_v32 }
  0xdb   : > { %1779 = vrot.lane.b32.xlu0 %v1760_v4, %s5302_s28  ;;  %1793 = vrot.lane.b32.xlu1 %v1767_v5, %s5302_s28  ;;  %v529_v4 = vmul.bf16 %v5525_v28, %v5514_v20  ;;  %v531_v5 = vmul.bf16 %v5597_v10, %v5514_v20  ;;  %v1026_v28 = vrot.slane %v1021_v8, %v5398_v17  ;;  %v5711_v22 = vpop.permute.xlu0 %2175 }
  0xdf   : > { %1791 = vrot.lane.b32.xlu0 %v1766_v9, %s5302_s28  ;;  %463 = vrot.lane.b32.xlu1 %v441_v11, %s5301_s27  ;;  %v1014_v9 = vpack.i.b16 %v4495_v2, %v4495_v2  ;;  %v1851_v11 = vmul.bf16 %v5609_v12, %v5535_v32  ;;  %v5716_v12 = vsel %vm606_vm5, %v5611_v13, %v5620_v27 }
  0xe1   : > { %v1019_v10 = vrot.slane %v1014_v9, %v5398_v17 }
  0xe3   : > { %945 = vrot.lane.b32.xlu0 %v934_v14, %s5301_s27  ;;  %1785 = vrot.lane.b32.xlu1 %v1763_v24, %s5302_s28  ;;  %v1850_v14 = vmul.bf16 %v1839_v44, %v5514_v20  ;;  %v4528_v24 = vcombine.high %v2323_v15, %v2323_v15 }
  0xe7   : > { %1789 = vrot.lane.b32.xlu0 %v1765_v33, %s5302_s28  ;;  %947 = vrot.lane.b32.xlu1 %v942_v26, %s5301_s27  ;;  %v4527_v26 = vcombine.low %v2323_v15, %v2323_v15  ;;  %v612_v33 = vmul.bf16 %v5716_v12, %v5455_v21 }
  0xe9   : > { %v2330_v36 = vpack.i.b16 %v4527_v26, %v4527_v26 }
  0xeb   : > { %545 = vrot.lane.b32.xlu0 %v525_v35, %s5298_s18  ;;  %543 = vrot.lane.b32.xlu1 %v524_v39, %s5298_s18  ;;  %v2337_v35 = vpack.i.b16 %v4528_v24, %v4528_v24  ;;  %v2335_v44 = vrot.slane %v2330_v36, %v5398_v17 }
  0xed   : > { %v2342_v3 = vrot.slane %v2337_v35, %v5398_v17 }
  0xef   : > { %2263 = vrot.lane.b32.xlu0 %v2258_v42, %s5297_s17  ;;  %2261 = vrot.lane.b32.xlu1 %v2250_v43, %s5297_s17  ;;  %v611_v42 = vmul.bf16 %v5611_v13, %v5451_v18  ;;  %v613_v43 = vmul.bf16 %v5620_v27, %v5451_v18 }
  0xf3   : > { %1865 = vrot.lane.b32.xlu0 %v1845_v47, %s5299_s25  ;;  %1863 = vrot.lane.b32.xlu1 %v1844_v48, %s5299_s25 }
  0xf7   : > { %549 = vrot.lane.b32.xlu0 %v527_v49, %s5298_s18  ;;  %1861 = vrot.lane.b32.xlu1 %v1843_v50, %s5299_s25  ;;  %v5741_v49 = vsel %vm432_vm2, %v5622_v31, %v5633_v40 }
  0xf8   : > { %v1933_v15 = vmul.bf16 %v5741_v49, %v5453_v19 }
  0xfb   : > { %547 = vrot.lane.b32.xlu0 %v526_v53, %s5298_s18  ;;  %551 = vrot.lane.b32.xlu1 %v528_v54, %s5298_s18  ;;  %v1931_v54 = vmul.bf16 %v5633_v40, %v5455_v21 }
  0xff   : > { %1871 = vrot.lane.b32.xlu0 %v1848_v57, %s5299_s25  ;;  %1869 = vrot.lane.b32.xlu1 %v1847_v58, %s5299_s25  ;;  %v1930_v57 = vmul.bf16 %v5741_v49, %v5451_v18 }
 0x103   : > { %555 = vrot.lane.b32.xlu0 %v530_v62, %s5298_s18  ;;  %1867 = vrot.lane.b32.xlu1 %v1846_v63, %s5299_s25  ;;  %v615_v62 = vmul.bf16 %v5716_v12, %v5460_v25  ;;  %v1929_v63 = vmul.bf16 %v5622_v31, %v5455_v21 }
 0x107   : > { %553 = vrot.lane.b32.xlu0 %v529_v4, %s5298_s18  ;;  %557 = vrot.lane.b32.xlu1 %v531_v5, %s5298_s18  ;;  %v614_v4 = vmul.bf16 %v5611_v13, %v5453_v19  ;;  %v616_v5 = vmul.bf16 %v5620_v27, %v5453_v19 }
 0x10b   : > { %1877 = vrot.lane.b32.xlu0 %v1851_v11, %s5299_s25  ;;  %1875 = vrot.lane.b32.xlu1 %v1850_v14, %s5299_s25  ;;  %v1091_v11 = vld [vmem:[%s7164_s3 + $0x8] sm:$0x11] }
 0x10c   : > { %v4497_v24 = vcombine.low %v1091_v11, %v1091_v11 }
 0x10d   : > { %v368_v23 = vpop.permute.xlu1 %367 }
 0x10f   : > { %1031 = vrot.lane.b32.xlu0 %v1026_v28, %s5299_s25  ;;  %1029 = vrot.lane.b32.xlu1 %v1019_v10, %s5299_s25  ;;  %v1934_v10 = vmul.bf16 %v5633_v40, %v5460_v25 }
 0x111   : > { %v372_v29 = vpop.permute.xlu0 %371  ;;  %v374_v30 = vpop.permute.xlu1 %373 }
 0x113   : > { %631 = vrot.lane.b32.xlu0 %v612_v33, %s5297_s17  ;;  %1873 = vrot.lane.b32.xlu1 %v1849_v34, %s5299_s25  ;;  %v618_v33 = vmul.bf16 %v5716_v12, %v5535_v32  ;;  %v1932_v34 = vmul.bf16 %v5622_v31, %v5460_v25 }
 0x115   : > { %v5726_v38 = vpop.permute.xlu0 %379  ;;  %v378_v39 = vpop.permute.xlu1 %377 }
 0x117   : > { %629 = vrot.lane.b32.xlu0 %v611_v42, %s5297_s17  ;;  %633 = vrot.lane.b32.xlu1 %v613_v43, %s5297_s17  ;;  %v1098_v43 = vshrl.u32 %v4497_v24, 16  ;;  %v1935_v24 = vmul.bf16 %v5622_v31, %v5535_v32 }
 0x119   : > { %v384_v47 = vpop.permute.xlu0 %383  ;;  %v5736_v48 = vpop.permute.xlu1 %1691 }
 0x11b   : > { %2347 = vrot.lane.b32.xlu0 %v2342_v3, %s5298_s18  ;;  %2345 = vrot.lane.b32.xlu1 %v2335_v44, %s5298_s18 }
 0x11d   : > { %v5745_v50 = vpop.permute.xlu0 %541  ;;  %v5747_v53 = vpop.permute.xlu1 %1701 }
 0x11f   : > { %1951 = vrot.lane.b32.xlu0 %v1931_v54, %s5301_s27  ;;  %1949 = vrot.lane.b32.xlu1 %v1930_v57, %s5301_s27  ;;  %v617_v54 = vmul.bf16 %v5611_v13, %v5514_v20  ;;  %v1099_v57 = vpack.i.b16 %v1098_v43, %v1098_v43  ;;  %v697_v43 = vmul.bf16 %v5635_v41, %v5451_v18 }
 0x121   : > { %v5755_v58 = vpop.permute.xlu0 %1695  ;;  %v5757_v59 = vpop.permute.xlu1 %1703 }
 0x123   : > { %637 = vrot.lane.b32.xlu0 %v615_v62, %s5297_s17  ;;  %1947 = vrot.lane.b32.xlu1 %v1929_v63, %s5301_s27 }
 0x125   : > { %v5765_v1 = vpop.permute.xlu0 %1697  ;;  %v370_v2 = vpop.permute.xlu1 %369 }
 0x126   : > { %v387_v8 = vsel %vm385_vm6, %v370_v2, %v372_v29  ;;  %v386_v9 = vsel %vm385_vm6, %v368_v23, %v370_v2  ;;  %v4498_v23 = vcombine.high %v1091_v11, %v1091_v11  ;;  %v1936_v2 = vmul.bf16 %v5741_v49, %v5514_v20 }
 0x127   : > { %635 = vrot.lane.b32.xlu0 %v614_v4, %s5297_s17  ;;  %639 = vrot.lane.b32.xlu1 %v616_v5, %s5297_s17 }
 0x128   : > { %3396 = vmatprep.subr.bf16.mxu1 %v387_v8  ;;  %v1106_v42 = vshrl.u32 %v4498_v23, 16 }
 0x129   : > { %3397 = vmatpush1.bf16.msra.mxu1 %v386_v9  ;;  %v5778_v14 = vpop.permute.xlu0 %1707  ;;  %v382_v28 = vpop.permute.xlu1 %381 }
 0x12a   : > { %v391_v44 = vsel %vm385_vm6, %v382_v28, %v384_v47  ;;  %v390_v62 = vsel %vm385_vm6, %v5726_v38, %v382_v28  ;;  %v2407_v47 = vld [vmem:[%s7164_s3 + $0x18] sm:$0x11]  ;;  %v1104_v38 = vrot.slane %v1099_v57, %v5398_v17  ;;  %v5858_v57 = vsel %vm518_vm4, %v5648_v46, %v5658_v51 }
 0x12b   : > { %1957 = vrot.lane.b32.xlu0 %v1934_v10, %s5301_s27  ;;  %1955 = vrot.lane.b32.xlu1 %v1933_v15, %s5301_s27  ;;  %v4530_v5 = vcombine.high %v2407_v47, %v2407_v47  ;;  %v4529_v8 = vcombine.low %v2407_v47, %v2407_v47 }
 0x12d   : > { %v376_v26 = vpop.permute.xlu0 %375  ;;  %v5786_v29 = vpop.permute.xlu1 %455  ;;  %v2422_v49 = vshrl.u32 %v4530_v5, 16  ;;  %v2414_v28 = vshrl.u32 %v4529_v8, 16 }
 0x12e   : > { %v389_v35 = vsel %vm385_vm6, %v376_v26, %v378_v39  ;;  %v388_v36 = vsel %vm385_vm6, %v374_v30, %v376_v26  ;;  %v619_v39 = vmul.bf16 %v5620_v27, %v5514_v20  ;;  %v1107_v30 = vpack.i.b16 %v1106_v42, %v1106_v42 }
 0x12f   : > { %643 = vrot.lane.b32.xlu0 %v618_v33, %s5297_s17  ;;  %1953 = vrot.lane.b32.xlu1 %v1932_v34, %s5301_s27  ;;  %v1937_v27 = vmul.bf16 %v5633_v40, %v5535_v32  ;;  %v5827_v40 = vsel %vm692_vm7, %v5635_v41, %v5646_v45  ;;  %v2423_v34 = vpack.i.b16 %v2422_v49, %v2422_v49 }
 0x130   : > { %3398 = vmatprep.subr.bf16.mxu1 %v389_v35  ;;  %v1112_v4 = vrot.slane %v1107_v30, %v5398_v17  ;;  %v698_v23 = vmul.bf16 %v5827_v40, %v5455_v21  ;;  %v2415_v35 = vpack.i.b16 %v2414_v28, %v2414_v28  ;;  %v702_v49 = vmul.bf16 %v5646_v45, %v5453_v19 }
 0x131   : > { %3399 = vmatpush1.bf16.msra.mxu1 %v388_v36  ;;  %v5796_v3 = vpop.permute.xlu0 %461  ;;  %v460_v12 = vpop.permute.xlu1 %459 }
 0x132   : > { %3400 = vmatprep.subr.bf16.mxu1 %v391_v44  ;;  %v2420_v44 = vrot.slane %v2415_v35, %v5398_v17 }
 0x133   : > { %641 = vrot.lane.b32.xlu0 %v617_v54, %s5297_s17  ;;  %645 = vrot.lane.b32.xlu1 %v619_v39, %s5297_s17 }
 0x135   : > { %3401 = vmatpush1.bf16.msra.mxu1 %v390_v62  ;;  %v5810_v63 = vpop.permute.xlu0 %465  ;;  %v5812_v13 = vpop.permute.xlu1 %467 }
 0x137   : > { %1963 = vrot.lane.b32.xlu0 %v1937_v27, %s5301_s27  ;;  %1961 = vrot.lane.b32.xlu1 %v1936_v2, %s5301_s27  ;;  %v2015_v27 = vmul.bf16 %v5658_v51, %v5455_v21 }
 0x139   : > { %v1700_v9 = vpop.permute.xlu0 %1699  ;;  %v5822_v11 = vpop.permute.xlu1 %471 }
 0x13a   : > { %v1712_v42 = vsel %vm1205_vm8, %v1700_v9, %v5747_v53  ;;  %v1711_v53 = vsel %vm1205_vm8, %v5765_v1, %v1700_v9  ;;  %v700_v9 = vmul.bf16 %v5635_v41, %v5453_v19 }
 0x13b   : > { %1117 = vrot.lane.b32.xlu0 %v1112_v4, %s5302_s28  ;;  %1115 = vrot.lane.b32.xlu1 %v1104_v38, %s5302_s28  ;;  %v2013_v4 = vmul.bf16 %v5648_v46, %v5455_v21  ;;  %s5304_s28 = smov 127  }
 0x13d   : > { %v1778_v10 = vpop.permute.xlu0 %1777  ;;  %v1694_v15 = vpop.permute.xlu1 %1693 }
 0x13e   : > { %v1710_v26 = vsel %vm1205_vm8, %v1694_v15, %v5755_v58  ;;  %v1709_v33 = vsel %vm1205_vm8, %v5736_v48, %v1694_v15  ;;  %v699_v58 = vmul.bf16 %v5646_v45, %v5451_v18  ;;  %v2428_v48 = vrot.slane %v2423_v34, %v5398_v17 }
 0x13f   : > { %717 = vrot.lane.b32.xlu0 %v698_v23, %s5296_s10  ;;  %1959 = vrot.lane.b32.xlu1 %v1935_v24, %s5301_s27  ;;  %v2018_v24 = vmul.bf16 %v5658_v51, %v5460_v25 }
 0x140   : > { %3735 = vmatprep.subr.bf16.mxu0 %v1710_v26 }
 0x141   : > { %3736 = vmatpush1.bf16.msra.mxu0 %v1709_v33  ;;  %v1788_v36 = vpop.permute.xlu0 %1787  ;;  %v1706_v31 = vpop.permute.xlu1 %1705  ;;  %v1179_v33 = vld [vmem:[%s7164_s3 + $0x8] sm:$0x22] }
 0x142   : > { %3737 = vmatprep.subr.bf16.mxu0 %v1712_v42  ;;  %v1714_v39 = vsel %vm1205_vm8, %v1706_v31, %v5778_v14  ;;  %v1713_v1 = vsel %vm1205_vm8, %v5757_v59, %v1706_v31  ;;  %v701_v59 = vmul.bf16 %v5827_v40, %v5460_v25  ;;  %v2016_v42 = vmul.bf16 %v5648_v46, %v5460_v25 }
 0x143   : > { %715 = vrot.lane.b32.xlu0 %v697_v43, %s5296_s10  ;;  %719 = vrot.lane.b32.xlu1 %v699_v58, %s5296_s10  ;;  %v4500_v31 = vcombine.high %v1179_v33, %v1179_v33  ;;  %v4499_v43 = vcombine.low %v1179_v33, %v1179_v33 }
 0x145   : > { %3738 = vmatpush1.bf16.msra.mxu0 %v1711_v53  ;;  %v458_v54 = vpop.permute.xlu0 %457  ;;  %v1782_v30 = vpop.permute.xlu1 %1781 }
 0x146   : > { %3739 = vmatprep.subr.bf16.mxu0 %v1714_v39  ;;  %v475_v62 = vsel %vm473_vm9, %v458_v54, %v460_v12  ;;  %v474_v17 = vsel %vm473_vm9, %v5786_v29, %v458_v54  ;;  %v2014_v12 = vmul.bf16 %v5858_v57, %v5451_v18  ;;  %v1193_v54 = vpack.i.b16 %v4500_v31, %v4500_v31 }
 0x147   : > { %2433 = vrot.lane.b32.xlu0 %v2428_v48, %s5301_s27  ;;  %2431 = vrot.lane.b32.xlu1 %v2420_v44, %s5301_s27  ;;  %v703_v44 = vmul.bf16 %v5635_v41, %v5514_v20  ;;  %v1186_v39 = vpack.i.b16 %v4499_v43, %v4499_v43  ;;  %v2021_v41 = vmul.bf16 %v5658_v51, %v5535_v32 }
 0x148   : > { %3402 = vmatprep.subr.bf16.mxu1 %v475_v62  ;;  %v5945_v51 = vsel %vm647_vm12, %v5660_v52, %v5670_v55 }
 0x149   : > { %3403 = vmatpush1.bf16.msra.mxu1 %v474_v17  ;;  %3740 = vmatpush1.bf16.msra.mxu0 %v1713_v1  ;;  %v470_v14 = vpop.permute.xlu0 %469  ;;  %v1784_v47 = vpop.permute.xlu1 %1783  ;;  %v1191_v17 = vrot.slane %v1186_v39, %v5417_v37  ;;  %v2493_v1 = vld [vmem:[%s7164_s3 + $0x18] sm:$0x22] }
 0x14a   : > { %v479_v15 = vsel %vm473_vm9, %v470_v14, %v5822_v11  ;;  %v478_v11 = vsel %vm473_vm9, %v5812_v13, %v470_v14 }
 0x14b   : > { %2035 = vrot.lane.b32.xlu0 %v2015_v27, %s5298_s18  ;;  %2033 = vrot.lane.b32.xlu1 %v2014_v12, %s5298_s18  ;;  %v4532_v27 = vcombine.high %v2493_v1, %v2493_v1  ;;  %v4531_v12 = vcombine.low %v2493_v1, %v2493_v1 }
 0x14d   : > { %v1780_v29 = vpop.permute.xlu0 %1779  ;;  %v1794_v2 = vpop.permute.xlu1 %1793 }
 0x14e   : > { %v1796_v38 = vsel %vm1119_vm10, %v1780_v29, %v1782_v30  ;;  %v1795_v5 = vsel %vm1119_vm10, %v1778_v10, %v1780_v29 }
 0x14f   : > { %723 = vrot.lane.b32.xlu0 %v701_v59, %s5296_s10  ;;  %2031 = vrot.lane.b32.xlu1 %v2013_v4, %s5298_s18  ;;  %v5950_v59 = vld [vmem:[#allocation4] sm:$0xff] }
 0x150   : > { %3741 = vmatprep.subr.bf16.mxu0 %v1796_v38  ;;  %v784_v4 = vmul.bf16 %v5950_v59, %v5945_v51  ;;  %v2019_v38 = vmul.bf16 %v5648_v46, %v5535_v32 }
 0x151   : > { %3742 = vmatpush1.bf16.msra.mxu0 %v1795_v5  ;;  %v1792_v18 = vpop.permute.xlu0 %1791  ;;  %v464_v8 = vpop.permute.xlu1 %463 }
 0x152   : > { %v477_v21 = vsel %vm473_vm9, %v464_v8, %v5810_v63  ;;  %v476_v28 = vsel %vm473_vm9, %v5796_v3, %v464_v8  ;;  %v2017_v63 = vmul.bf16 %v5858_v57, %v5453_v19  ;;  %v1800_v34 = vsel %vm1119_vm10, %v1792_v18, %v1794_v2 }
 0x153   : > { %721 = vrot.lane.b32.xlu0 %v700_v9, %s5296_s10  ;;  %725 = vrot.lane.b32.xlu1 %v702_v49, %s5296_s10  ;;  %v2500_v8 = vpack.i.b16 %v4531_v12, %v4531_v12 }
 0x154   : > { %3404 = vmatprep.subr.bf16.mxu1 %v477_v21  ;;  %v5959_v21 = vld [vmem:[#allocation4 + $0x8] sm:$0xff] }
 0x155   : > { %3405 = vmatpush1.bf16.msra.mxu1 %v476_v28  ;;  %v5891_v10 = vpop.permute.xlu0 %945  ;;  %v1786_v23 = vpop.permute.xlu1 %1785  ;;  %v783_v28 = vmul.bf16 %v5959_v21, %v5660_v52 }
 0x156   : > { %3406 = vmatprep.subr.bf16.mxu1 %v479_v15  ;;  %v1798_v3 = vsel %vm1119_vm10, %v1786_v23, %v1788_v36  ;;  %v1797_v26 = vsel %vm1119_vm10, %v1784_v47, %v1786_v23  ;;  %v704_v36 = vmul.bf16 %v5827_v40, %v5535_v32  ;;  %v705_v40 = vmul.bf16 %v5646_v45, %v5514_v20 }
 0x157   : > { %2041 = vrot.lane.b32.xlu0 %v2018_v24, %s5298_s18  ;;  %2039 = vrot.lane.b32.xlu1 %v2017_v63, %s5298_s18  ;;  %v2020_v45 = vmul.bf16 %v5858_v57, %v5514_v20  ;;  %v785_v15 = vmul.bf16 %v5959_v21, %v5670_v55  ;;  %v2505_v63 = vrot.slane %v2500_v8, %v5417_v37 }
 0x158   : > { %3743 = vmatprep.subr.bf16.mxu0 %v1798_v3 }
 0x159   : > { %3407 = vmatpush1.bf16.msra.mxu1 %v478_v11  ;;  %3744 = vmatpush1.bf16.msra.mxu0 %v1797_v26  ;;  %v1790_v19 = vpop.permute.xlu0 %1789  ;;  %v5909_v35 = vpop.permute.xlu1 %947  ;;  %v5974_v11 = vsel %vm606_vm5, %v5672_v56, %v5682_v61 }
 0x15a   : > { %3745 = vmatprep.subr.bf16.mxu0 %v1800_v34  ;;  %v1799_v13 = vsel %vm1119_vm10, %v1790_v19, %v1792_v18  ;;  %v2507_v18 = vpack.i.b16 %v4532_v27, %v4532_v27  ;;  %v4976_v19 = vld [vmem:[%s7162_s1 + $0x4] ss:$44 sps:$4 sm:$0xff]  }
 0x15b   : > { %729 = vrot.lane.b32.xlu0 %v704_v36, %s5296_s10  ;;  %2037 = vrot.lane.b32.xlu1 %v2016_v42, %s5298_s18  ;;  %v2101_v42 = vmul.bf16 %v5950_v59, %v5682_v61 }
 0x15c   : > { %v2512_v24 = vrot.slane %v2507_v18, %v5417_v37  ;;  %3428 = vmatprep.mubr.bf16.mxu1 %v4976_v19 }
 0x15d   : > { %3746 = vmatpush1.bf16.msra.mxu0 %v1799_v13  ;;  %v546_v58 = vpop.permute.xlu0 %545  ;;  %v544_v48 = vpop.permute.xlu1 %543  ;;  %v2100_v13 = vmul.bf16 %v5959_v21, %v5974_v11 }
 0x15e   : > { %v561_v25 = vsel %vm559_vm11, %v544_v48, %v546_v58  ;;  %v560_v53 = vsel %vm559_vm11, %v5745_v50, %v544_v48  ;;  %v1198_v50 = vrot.slane %v1193_v54, %v5417_v37  ;;  %v5989_v48 = vld [vmem:[#allocation4 + $0x10] sm:$0xff]  ;;  %v4979_v54 = vld [vmem:[%s7162_s1 + $0x1c] ss:$44 sps:$4 sm:$0xff]  }
 0x15f   : > { %727 = vrot.lane.b32.xlu0 %v703_v44, %s5296_s10  ;;  %731 = vrot.lane.b32.xlu1 %v705_v40, %s5296_s10  ;;  %v787_v44 = vmul.bf16 %v5989_v48, %v5945_v51  ;;  %v2099_v40 = vmul.bf16 %v5950_v59, %v5672_v56  ;;  %v2104_v27 = vmul.bf16 %v5989_v48, %v5682_v61 }
 0x160   : > { %3408 = vmatprep.subr.bf16.mxu1 %v561_v25  ;;  %3767 = vmatprep.mubr.bf16.mxu0 %v4979_v54  ;;  %v2102_v18 = vmul.bf16 %v5989_v48, %v5672_v56 }
 0x161   : > { %3409 = vmatpush1.bf16.msra.mxu1 %v560_v53  ;;  %v5927_v30 = vpop.permute.xlu0 %2263  ;;  %v5929_v62 = vpop.permute.xlu1 %2261 }
 0x163   : > { %2047 = vrot.lane.b32.xlu0 %v2021_v41, %s5298_s18  ;;  %2045 = vrot.lane.b32.xlu1 %v2020_v45, %s5298_s18  ;;  %v6002_v45 = vld [vmem:[#allocation4 + $0x18] sm:$0xff] }
 0x164   : > { %v2103_v12 = vmul.bf16 %v6002_v45, %v5974_v11 }
 0x165   : > { %v1866_v14 = vpop.permute.xlu0 %1865  ;;  %v1864_v47 = vpop.permute.xlu1 %1863 }
 0x166   : > { %v1880_v57 = vsel %vm385_vm6, %v1864_v47, %v1866_v14  ;;  %v1265_v14 = vld [vmem:[%s7164_s3 + $0x8] sm:$0x22] }
 0x167   : > { %1203 = vrot.lane.b32.xlu0 %v1198_v50, %s5300_s26  ;;  %1201 = vrot.lane.b32.xlu1 %v1191_v17, %s5300_s26  ;;  %v786_v50 = vmul.bf16 %v6002_v45, %v5660_v52  ;;  %v788_v17 = vmul.bf16 %v6002_v45, %v5670_v55 }
 0x168   : > { %3747 = vmatprep.subr.bf16.mxu0 %v1880_v57 }
 0x169   : > { %v550_v29 = vpop.permute.xlu0 %549  ;;  %v1862_v2 = vpop.permute.xlu1 %1861 }
 0x16a   : > { %v1879_v5 = vsel %vm385_vm6, %v1862_v2, %v1864_v47  ;;  %v4501_v2 = vcombine.low %v1265_v14, %v1265_v14 }
 0x16b   : > { %803 = vrot.lane.b32.xlu0 %v784_v4, %s5295_s7  ;;  %2043 = vrot.lane.b32.xlu1 %v2019_v38, %s5298_s18 }
 0x16c   : > { %3748 = vmatpush1.bf16.msra.mxu0 %v1879_v5  ;;  %v790_v5 = vmul.bf16 %v5945_v51, %v5535_v32  ;;  %v791_v51 = vmul.bf16 %v5670_v55, %v5514_v20  ;;  %v2106_v55 = vmul.bf16 %v5974_v11, %v5514_v20 }
 0x16d   : > { %v548_v9 = vpop.permute.xlu0 %547  ;;  %v552_v49 = vpop.permute.xlu1 %551 }
 0x16e   : > { %v563_v46 = vsel %vm559_vm11, %v550_v29, %v552_v49  ;;  %v562_v23 = vsel %vm559_vm11, %v548_v9, %v550_v29  ;;  %v4502_v29 = vcombine.high %v1265_v14, %v1265_v14  ;;  %v1272_v49 = vshrl.u32 %v4501_v2, 16 }
 0x16f   : > { %801 = vrot.lane.b32.xlu0 %v783_v28, %s5295_s7  ;;  %805 = vrot.lane.b32.xlu1 %v785_v15, %s5295_s7 }
 0x170   : > { %3410 = vmatprep.subr.bf16.mxu1 %v563_v46  ;;  %v1280_v9 = vshrl.u32 %v4502_v29, 16  ;;  %v789_v46 = vmul.bf16 %v5660_v52, %v5514_v20  ;;  %v2107_v52 = vmul.bf16 %v5682_v61, %v5535_v32 }
 0x171   : > { %3411 = vmatpush1.bf16.msra.mxu1 %v562_v23  ;;  %v1872_v3 = vpop.permute.xlu0 %1871  ;;  %v1870_v26 = vpop.permute.xlu1 %1869 }
 0x172   : > { %v1882_v33 = vsel %vm385_vm6, %v1870_v26, %v1872_v3  ;;  %v1273_v3 = vpack.i.b16 %v1272_v49, %v1272_v49 }
 0x173   : > { %2517 = vrot.lane.b32.xlu0 %v2512_v24, %s5299_s25  ;;  %2515 = vrot.lane.b32.xlu1 %v2505_v63, %s5299_s25  ;;  %v1281_v63 = vpack.i.b16 %v1280_v9, %v1280_v9  ;;  %s5305_s25 = smov 1  }
 0x174   : > { %3749 = vmatprep.subr.bf16.mxu0 %v1882_v33 }
 0x175   : > { %v556_v34 = vpop.permute.xlu0 %555  ;;  %v1868_v36 = vpop.permute.xlu1 %1867  ;;  %v1286_v19 = vrot.slane %v1281_v63, %v5417_v37  ;;  %v6115_v63 = vld [vmem:[#allocation4 + $0x20] sm:$0xff] }
 0x176   : > { %v1881_v31 = vsel %vm385_vm6, %v1868_v36, %v1870_v26 }
 0x177   : > { %2121 = vrot.lane.b32.xlu0 %v2101_v42, %s5297_s17  ;;  %2119 = vrot.lane.b32.xlu1 %v2100_v13, %s5297_s17  ;;  %v6054_v13 = vsel %vm559_vm11, %v5687_v0, %v5695_v6 }
 0x178   : > { %3750 = vmatpush1.bf16.msra.mxu0 %v1881_v31  ;;  %v2105_v31 = vmul.bf16 %v5672_v56, %v5535_v32 }
 0x179   : > { %v554_v43 = vpop.permute.xlu0 %553  ;;  %v558_v58 = vpop.permute.xlu1 %557 }
 0x17a   : > { %v565_v25 = vsel %vm559_vm11, %v556_v34, %v558_v58  ;;  %v564_v53 = vsel %vm559_vm11, %v554_v43, %v556_v34  ;;  %v1278_v34 = vrot.slane %v1273_v3, %v5417_v37  ;;  %v868_v37 = vmul.bf16 %v5950_v59, %v6054_v13 }
 0x17b   : > { %809 = vrot.lane.b32.xlu0 %v787_v44, %s5295_s7  ;;  %2117 = vrot.lane.b32.xlu1 %v2099_v40, %s5297_s17  ;;  %v867_v40 = vmul.bf16 %v5959_v21, %v5687_v0  ;;  %v874_v3 = vmul.bf16 %v6115_v63, %v6054_v13 }
 0x17c   : > { %3412 = vmatprep.subr.bf16.mxu1 %v565_v25  ;;  %v869_v25 = vmul.bf16 %v5959_v21, %v5695_v6 }
 0x17d   : > { %3413 = vmatpush1.bf16.msra.mxu1 %v564_v53  ;;  %v1878_v39 = vpop.permute.xlu0 %1877  ;;  %v1876_v41 = vpop.permute.xlu1 %1875  ;;  %v6073_v53 = vsel %vm692_vm7, %v5711_v22, %v5699_v7 }
 0x17e   : > { %v1884_v1 = vsel %vm385_vm6, %v1876_v41, %v1878_v39 }
 0x17f   : > { %807 = vrot.lane.b32.xlu0 %v786_v50, %s5295_s7  ;;  %811 = vrot.lane.b32.xlu1 %v788_v17, %s5295_s7  ;;  %v2184_v50 = vmul.bf16 %v5959_v21, %v6073_v53 }
 0x180   : > { %3751 = vmatprep.subr.bf16.mxu0 %v1884_v1 }
 0x181   : > { %v6014_v47 = vpop.permute.xlu0 %1031  ;;  %v6016_v57 = vpop.permute.xlu1 %1029 }
 0x183   : > { %2127 = vrot.lane.b32.xlu0 %v2104_v27, %s5297_s17  ;;  %2125 = vrot.lane.b32.xlu1 %v2103_v12, %s5297_s17  ;;  %v871_v27 = vmul.bf16 %v5989_v48, %v6054_v13  ;;  %v2183_v12 = vmul.bf16 %v5950_v59, %v5711_v22 }
 0x185   : > { %v632_v4 = vpop.permute.xlu0 %631  ;;  %v1874_v38 = vpop.permute.xlu1 %1873 }
 0x186   : > { %v1883_v8 = vsel %vm385_vm6, %v1874_v38, %v1876_v41  ;;  %v2185_v41 = vmul.bf16 %v5950_v59, %v5699_v7  ;;  %v870_v38 = vmul.bf16 %v6002_v45, %v5687_v0 }
 0x187   : > { %815 = vrot.lane.b32.xlu0 %v790_v5, %s5295_s7  ;;  %2123 = vrot.lane.b32.xlu1 %v2102_v18, %s5297_s17  ;;  %v872_v5 = vmul.bf16 %v6002_v45, %v5695_v6 }
 0x188   : > { %3752 = vmatpush1.bf16.msra.mxu0 %v1883_v8 }
 0x189   : > { %v630_v28 = vpop.permute.xlu0 %629  ;;  %v634_v15 = vpop.permute.xlu1 %633 }
 0x18a   : > { %v649_v23 = vsel %vm647_vm12, %v632_v4, %v634_v15  ;;  %v648_v24 = vsel %vm647_vm12, %v630_v28, %v632_v4  ;;  %v2188_v28 = vmul.bf16 %v5989_v48, %v5699_v7  ;;  %v2187_v15 = vmul.bf16 %v6002_v45, %v6073_v53 }
 0x18b   : > { %813 = vrot.lane.b32.xlu0 %v789_v46, %s5295_s7  ;;  %817 = vrot.lane.b32.xlu1 %v791_v51, %s5295_s7  ;;  %v1353_v51 = vld [vmem:[%s7164_s3 + $0x8] sm:$0x44] }
 0x18c   : > { %3414 = vmatprep.subr.bf16.mxu1 %v649_v23 }
 0x18d   : > { %3415 = vmatpush1.bf16.msra.mxu1 %v648_v24  ;;  %v6039_v26 = vpop.permute.xlu0 %2347  ;;  %v6041_v33 = vpop.permute.xlu1 %2345 }
 0x18f   : > { %2133 = vrot.lane.b32.xlu0 %v2107_v52, %s5297_s17  ;;  %2131 = vrot.lane.b32.xlu1 %v2106_v55, %s5297_s17  ;;  %v2186_v52 = vmul.bf16 %v5989_v48, %v5711_v22  ;;  %v4504_v55 = vcombine.high %v1353_v51, %v1353_v51 }
 0x191   : > { %v1952_v36 = vpop.permute.xlu0 %1951  ;;  %v1950_v42 = vpop.permute.xlu1 %1949 }
 0x192   : > { %v1966_v61 = vsel %vm473_vm9, %v1950_v42, %v1952_v36 }
 0x193   : > { %1291 = vrot.lane.b32.xlu0 %v1286_v19, %s5303_s13  ;;  %1289 = vrot.lane.b32.xlu1 %v1278_v34, %s5303_s13  ;;  %v4503_v19 = vcombine.low %v1353_v51, %v1353_v51 }
 0x194   : > { %3753 = vmatprep.subr.bf16.mxu0 %v1966_v61 }
 0x195   : > { %v638_v20 = vpop.permute.xlu0 %637  ;;  %v1948_v11 = vpop.permute.xlu1 %1947 }
 0x196   : > { %v1965_v43 = vsel %vm473_vm9, %v1948_v11, %v1950_v42  ;;  %v6123_v42 = vld [vmem:[#allocation4 + $0x28] sm:$0xff]  ;;  %v1367_v11 = vpack.i.b16 %v4504_v55, %v4504_v55 }
 0x197   : > { %887 = vrot.lane.b32.xlu0 %v868_v37, %s5294_s19  ;;  %2129 = vrot.lane.b32.xlu1 %v2105_v31, %s5297_s17  ;;  %v873_v61 = vmul.bf16 %v6123_v42, %v5687_v0  ;;  %v1360_v37 = vpack.i.b16 %v4503_v19, %v4503_v19  ;;  %v2190_v0 = vmul.bf16 %v6123_v42, %v6073_v53 }
 0x198   : > { %3754 = vmatpush1.bf16.msra.mxu0 %v1965_v43  ;;  %v6149_v53 = vsel %vm473_vm9, %v5891_v10, %v5909_v35 }
 0x199   : > { %v636_v58 = vpop.permute.xlu0 %635  ;;  %v640_v44 = vpop.permute.xlu1 %639 }
 0x19a   : > { %v651_v32 = vsel %vm647_vm12, %v638_v20, %v640_v44  ;;  %v650_v56 = vsel %vm647_vm12, %v636_v58, %v638_v20  ;;  %v875_v20 = vmul.bf16 %v6123_v42, %v5695_v6  ;;  %v2191_v58 = vmul.bf16 %v6115_v63, %v5699_v7 }
 0x19b   : > { %885 = vrot.lane.b32.xlu0 %v867_v40, %s5294_s19  ;;  %889 = vrot.lane.b32.xlu1 %v869_v25, %s5294_s19  ;;  %v1372_v40 = vrot.slane %v1367_v11, %v5449_v16  ;;  %v1365_v25 = vrot.slane %v1360_v37, %v5449_v16 }
 0x19c   : > { %3416 = vmatprep.subr.bf16.mxu1 %v651_v32 }
 0x19d   : > { %3417 = vmatpush1.bf16.msra.mxu1 %v650_v56  ;;  %v1958_v54 = vpop.permute.xlu0 %1957  ;;  %v1956_v39 = vpop.permute.xlu1 %1955 }
 0x19e   : > { %v1968_v17 = vsel %vm473_vm9, %v1956_v39, %v1958_v54 }
 0x19f   : > { %2205 = vrot.lane.b32.xlu0 %v2185_v41, %s5296_s10  ;;  %2203 = vrot.lane.b32.xlu1 %v2184_v50, %s5296_s10  ;;  %v2189_v41 = vmul.bf16 %v6115_v63, %v5711_v22 }
 0x1a0   : > { %3755 = vmatprep.subr.bf16.mxu0 %v1968_v17 }
 0x1a1   : > { %v644_v1 = vpop.permute.xlu0 %643  ;;  %v1954_v14 = vpop.permute.xlu1 %1953 }
 0x1a2   : > { %v1967_v29 = vsel %vm473_vm9, %v1954_v14, %v1956_v39  ;;  %v954_v39 = vmul.bf16 %v5950_v59, %v6149_v53  ;;  %v953_v14 = vmul.bf16 %v5959_v21, %v5891_v10 }
 0x1a3   : > { %893 = vrot.lane.b32.xlu0 %v871_v27, %s5294_s19  ;;  %2201 = vrot.lane.b32.xlu1 %v2183_v12, %s5296_s10  ;;  %v955_v27 = vmul.bf16 %v5959_v21, %v5909_v35  ;;  %v2265_v12 = vsel %vm647_vm12, %v5929_v62, %v5927_v30 }
 0x1a4   : > { %3756 = vmatpush1.bf16.msra.mxu0 %v1967_v29 }
 0x1a5   : > { %v642_v2 = vpop.permute.xlu0 %641  ;;  %v646_v4 = vpop.permute.xlu1 %645 }
 0x1a6   : > { %v653_v18 = vsel %vm647_vm12, %v644_v1, %v646_v4  ;;  %v652_v8 = vsel %vm647_vm12, %v642_v2, %v644_v1  ;;  %v2271_v4 = vmul.bf16 %v5950_v59, %v5927_v30 }
 0x1a7   : > { %891 = vrot.lane.b32.xlu0 %v870_v38, %s5294_s19  ;;  %895 = vrot.lane.b32.xlu1 %v872_v5, %s5294_s19  ;;  %v2270_v38 = vmul.bf16 %v5959_v21, %v2265_v12 }
 0x1a8   : > { %3418 = vmatprep.subr.bf16.mxu1 %v653_v18 }
 0x1a9   : > { %3419 = vmatpush1.bf16.msra.mxu1 %v652_v8  ;;  %v1964_v9 = vpop.permute.xlu0 %1963  ;;  %v1962_v49 = vpop.permute.xlu1 %1961 }
 0x1aa   : > { %v1970_v46 = vsel %vm473_vm9, %v1962_v49, %v1964_v9 }
 0x1ab   : > { %2211 = vrot.lane.b32.xlu0 %v2188_v28, %s5296_s10  ;;  %2209 = vrot.lane.b32.xlu1 %v2187_v15, %s5296_s10  ;;  %v2269_v28 = vmul.bf16 %v5950_v59, %v5929_v62 }
 0x1ac   : > { %3757 = vmatprep.subr.bf16.mxu0 %v1970_v46 }
 0x1ad   : > { %v6111_v23 = vpop.permute.xlu0 %1117  ;;  %v6113_v24 = vpop.permute.xlu1 %1115 }
 0x1af   : > { %899 = vrot.lane.b32.xlu0 %v874_v3, %s5294_s19  ;;  %2207 = vrot.lane.b32.xlu1 %v2186_v52, %s5296_s10  ;;  %v956_v3 = vmul.bf16 %v6002_v45, %v5891_v10  ;;  %v958_v52 = vmul.bf16 %v6002_v45, %v5909_v35 }
 0x1b1   : > { %v718_v34 = vpop.permute.xlu0 %717  ;;  %v1960_v36 = vpop.permute.xlu1 %1959 }
 0x1b2   : > { %v1969_v13 = vsel %vm473_vm9, %v1960_v36, %v1962_v49  ;;  %v957_v49 = vmul.bf16 %v5989_v48, %v6149_v53  ;;  %v2274_v36 = vmul.bf16 %v5989_v48, %v5927_v30 }
 0x1b3   : > { %897 = vrot.lane.b32.xlu0 %v873_v61, %s5294_s19  ;;  %901 = vrot.lane.b32.xlu1 %v875_v20, %s5294_s19  ;;  %v2273_v61 = vmul.bf16 %v6002_v45, %v2265_v12 }
 0x1b4   : > { %3758 = vmatpush1.bf16.msra.mxu0 %v1969_v13 }
 0x1b5   : > { %v716_v31 = vpop.permute.xlu0 %715  ;;  %v720_v43 = vpop.permute.xlu1 %719 }
 0x1b6   : > { %v734_v44 = vsel %vm692_vm7, %v718_v34, %v720_v43  ;;  %v733_v6 = vsel %vm692_vm7, %v716_v31, %v718_v34  ;;  %v960_v31 = vmul.bf16 %v6115_v63, %v6149_v53  ;;  %v2272_v43 = vmul.bf16 %v5989_v48, %v5929_v62 }
 0x1b7   : > { %2217 = vrot.lane.b32.xlu0 %v2191_v58, %s5296_s10  ;;  %2215 = vrot.lane.b32.xlu1 %v2190_v0, %s5296_s10 }
 0x1b8   : > { %3420 = vmatprep.subr.bf16.mxu1 %v734_v44 }
 0x1b9   : > { %3421 = vmatpush1.bf16.msra.mxu1 %v733_v6  ;;  %v6142_v32 = vpop.permute.xlu0 %2433  ;;  %v6144_v7 = vpop.permute.xlu1 %2431  ;;  %v959_v6 = vmul.bf16 %v6123_v42, %v5891_v10 }
 0x1bb   : > { %1377 = vrot.lane.b32.xlu0 %v1372_v40, %s5304_s28  ;;  %1375 = vrot.lane.b32.xlu1 %v1365_v25, %s5304_s28  ;;  %v961_v40 = vmul.bf16 %v6123_v42, %v5909_v35 }
 0x1bd   : > { %v2036_v56 = vpop.permute.xlu0 %2035  ;;  %v2034_v54 = vpop.permute.xlu1 %2033 }
 0x1be   : > { %v2050_v50 = vsel %vm559_vm11, %v2034_v54, %v2036_v56  ;;  %v2277_v56 = vmul.bf16 %v6115_v63, %v5927_v30  ;;  %v2275_v30 = vmul.bf16 %v6115_v63, %v5929_v62  ;;  %v1037_v62 = vmul.bf16 %v5959_v21, %v6016_v57 }
 0x1bf   : > { %973 = vrot.lane.b32.xlu0 %v954_v39, %s5292_s15  ;;  %2213 = vrot.lane.b32.xlu1 %v2189_v41, %s5296_s10  ;;  %v6221_v39 = vsel %vm385_vm6, %v6016_v57, %v6014_v47 }
 0x1c0   : > { %3759 = vmatprep.subr.bf16.mxu0 %v2050_v50  ;;  %v1038_v50 = vmul.bf16 %v5950_v59, %v6221_v39 }
 0x1c1   : > { %v724_v17 = vpop.permute.xlu0 %723  ;;  %v2032_v1 = vpop.permute.xlu1 %2031 }
 0x1c2   : > { %v2049_v22 = vsel %vm559_vm11, %v2032_v1, %v2034_v54  ;;  %v2276_v54 = vmul.bf16 %v6123_v42, %v2265_v12 }
 0x1c3   : > { %971 = vrot.lane.b32.xlu0 %v953_v14, %s5292_s15  ;;  %975 = vrot.lane.b32.xlu1 %v955_v27, %s5292_s15  ;;  %v4974_v14 = vld [vmem:[%s7162_s1] ss:$44 sps:$4 sm:$0xff]  }
 0x1c4   : > { %3760 = vmatpush1.bf16.msra.mxu0 %v2049_v22  ;;  %v1039_v22 = vmul.bf16 %v5959_v21, %v6014_v47 }
 0x1c5   : > { %v722_v29 = vpop.permute.xlu0 %721  ;;  %v726_v2 = vpop.permute.xlu1 %725 }
 0x1c6   : > { %v736_v5 = vsel %vm692_vm7, %v724_v17, %v726_v2  ;;  %v735_v18 = vsel %vm692_vm7, %v722_v29, %v724_v17  ;;  %v6248_v29 = vsel %vm559_vm11, %v6041_v33, %v6039_v26 }
 0x1c7   : > { %2291 = vrot.lane.b32.xlu0 %v2271_v4, %s5295_s7  ;;  %2289 = vrot.lane.b32.xlu1 %v2270_v38, %s5295_s7  ;;  %v2355_v38 = vmul.bf16 %v5950_v59, %v6039_v26 }
 0x1c8   : > { %3422 = vmatprep.subr.bf16.mxu1 %v736_v5  ;;  %v2354_v5 = vmul.bf16 %v5959_v21, %v6248_v29 }
 0x1c9   : > { %3423 = vmatpush1.bf16.msra.mxu1 %v735_v18  ;;  %v2042_v8 = vpop.permute.xlu0 %2041  ;;  %v2040_v9 = vpop.permute.xlu1 %2039 }
 0x1ca   : > { %v2052_v15 = vsel %vm559_vm11, %v2040_v9, %v2042_v8 }
 0x1cb   : > { %979 = vrot.lane.b32.xlu0 %v957_v49, %s5292_s15  ;;  %2287 = vrot.lane.b32.xlu1 %v2269_v28, %s5295_s7  ;;  %v1041_v49 = vmul.bf16 %v5989_v48, %v6221_v39  ;;  %v2353_v28 = vmul.bf16 %v5950_v59, %v6041_v33 }
 0x1cc   : > { %3761 = vmatprep.subr.bf16.mxu0 %v2052_v15 }
 0x1cd   : > { %v730_v46 = vpop.permute.xlu0 %729  ;;  %v2038_v51 = vpop.permute.xlu1 %2037 }
 0x1ce   : > { %v2051_v55 = vsel %vm559_vm11, %v2038_v51, %v2040_v9 }
 0x1cf   : > { %977 = vrot.lane.b32.xlu0 %v956_v3, %s5292_s15  ;;  %981 = vrot.lane.b32.xlu1 %v958_v52, %s5292_s15  ;;  %v1040_v52 = vmul.bf16 %v6002_v45, %v6016_v57 }
 0x1d0   : > { %3762 = vmatpush1.bf16.msra.mxu0 %v2051_v55  ;;  %v1042_v55 = vmul.bf16 %v6002_v45, %v6014_v47 }
 0x1d1   : > { %v728_v19 = vpop.permute.xlu0 %727  ;;  %v732_v34 = vpop.permute.xlu1 %731 }
 0x1d2   : > { %v738_v20 = vsel %vm692_vm7, %v730_v46, %v732_v34  ;;  %v737_v13 = vsel %vm692_vm7, %v728_v19, %v730_v46  ;;  %v4977_v46 = vld [vmem:[%s7162_s1 + $0x18] ss:$44 sps:$4 sm:$0xff]  }
 0x1d3   : > { %2297 = vrot.lane.b32.xlu0 %v2274_v36, %s5295_s7  ;;  %2295 = vrot.lane.b32.xlu1 %v2273_v61, %s5295_s7 }
 0x1d4   : > { %3424 = vmatprep.subr.bf16.mxu1 %v738_v20  ;;  %v2358_v20 = vmul.bf16 %v5989_v48, %v6039_v26 }
 0x1d5   : > { %3425 = vmatpush1.bf16.msra.mxu1 %v737_v13  ;;  %v2048_v11 = vpop.permute.xlu0 %2047  ;;  %v2046_v37 = vpop.permute.xlu1 %2045  ;;  %v2357_v13 = vmul.bf16 %v6002_v45, %v6248_v29 }
 0x1d6   : > { %v2054_v58 = vsel %vm559_vm11, %v2046_v37, %v2048_v11 }
 0x1d7   : > { %985 = vrot.lane.b32.xlu0 %v960_v31, %s5292_s15  ;;  %2293 = vrot.lane.b32.xlu1 %v2272_v43, %s5295_s7 }
 0x1d8   : > { %3763 = vmatprep.subr.bf16.mxu0 %v2054_v58  ;;  %v1044_v58 = vmul.bf16 %v6115_v63, %v6221_v39  ;;  %v1045_v39 = vmul.bf16 %v6123_v42, %v6014_v47  ;;  %v2360_v47 = vmul.bf16 %v6123_v42, %v6248_v29 }
 0x1d9   : > { %v6205_v0 = vpop.permute.xlu0 %1203  ;;  %v6207_v44 = vpop.permute.xlu1 %1201 }
 0x1db   : > { %983 = vrot.lane.b32.xlu0 %v959_v6, %s5292_s15  ;;  %987 = vrot.lane.b32.xlu1 %v961_v40, %s5292_s15  ;;  %v2356_v6 = vmul.bf16 %v5989_v48, %v6041_v33 }
 0x1dd   : > { %v804_v25 = vpop.permute.xlu0 %803  ;;  %v2044_v53 = vpop.permute.xlu1 %2043 }
 0x1de   : > { %v2053_v10 = vsel %vm559_vm11, %v2044_v53, %v2046_v37  ;;  %v1473_v37 = vld [vmem:[%s7164_s3 + $0x8] sm:$0x88] }
 0x1df   : > { %2303 = vrot.lane.b32.xlu0 %v2277_v56, %s5295_s7  ;;  %2301 = vrot.lane.b32.xlu1 %v2276_v54, %s5295_s7  ;;  %v4507_v53 = vcombine.low %v1473_v37, %v1473_v37 }
 0x1e0   : > { %3764 = vmatpush1.bf16.msra.mxu0 %v2053_v10  ;;  %v1043_v10 = vmul.bf16 %v6123_v42, %v6016_v57  ;;  %v2361_v57 = vmul.bf16 %v6115_v63, %v6039_v26  ;;  %v6318_v26 = vsel %vm1119_vm10, %v6113_v24, %v6111_v23 }
 0x1e1   : > { %v802_v35 = vpop.permute.xlu0 %801  ;;  %v806_v41 = vpop.permute.xlu1 %805 }
 0x1e2   : > { %v820_v17 = vsel %vm606_vm5, %v804_v25, %v806_v41  ;;  %v819_v1 = vsel %vm606_vm5, %v802_v35, %v804_v25  ;;  %v4508_v25 = vcombine.high %v1473_v37, %v1473_v37 }
 0x1e3   : > { %1057 = vrot.lane.b32.xlu0 %v1038_v50, %s5290_s30  ;;  %2299 = vrot.lane.b32.xlu1 %v2275_v30, %s5295_s7  ;;  %v1480_v30 = vpack.i.b16 %v4507_v53, %v4507_v53  ;;  %v1129_v53 = vmul.bf16 %v6002_v45, %v6111_v23 }
 0x1e4   : > { %3426 = vmatprep.subr.bf16.mxu1 %v820_v17  ;;  %v1487_v50 = vpack.i.b16 %v4508_v25, %v4508_v25  ;;  %v1127_v25 = vmul.bf16 %v6002_v45, %v6113_v24 }
 0x1e5   : > { %3427 = vmatpush1.bf16.msra.mxu1 %v819_v1  ;;  %v6237_v27 = vpop.permute.xlu0 %2517  ;;  %v6239_v12 = vpop.permute.xlu1 %2515 }
 0x1e7   : > { %1055 = vrot.lane.b32.xlu0 %v1037_v62, %s5290_s30  ;;  %1059 = vrot.lane.b32.xlu1 %v1039_v22, %s5290_s30  ;;  %v1492_v62 = vrot.slane %v1487_v50, %v5492_v60  ;;  %v1485_v22 = vrot.slane %v1480_v30, %v5492_v60  ;;  %v2444_v30 = vmul.bf16 %v5989_v48, %v6142_v32 }
 0x1e8   : > { %3429 = vmatmul.mubr.bf16.vlgmr.msra.gmra.mrb[0].mxu1 %v4974_v14 }
 0x1e9   : > { %v2122_v2 = vpop.permute.xlu0 %2121  ;;  %v2120_v4 = vpop.permute.xlu1 %2119 }
 0x1ea   : > { %v2136_v18 = vsel %vm647_vm12, %v2120_v4, %v2122_v2 }
 0x1eb   : > { %2375 = vrot.lane.b32.xlu0 %v2355_v38, %s5294_s19  ;;  %2373 = vrot.lane.b32.xlu1 %v2354_v5, %s5294_s19  ;;  %v1125_v5 = vmul.bf16 %v5950_v59, %v6318_v26 }
 0x1ec   : > { %3765 = vmatprep.subr.bf16.mxu0 %v2136_v18  ;;  %v2359_v18 = vmul.bf16 %v6115_v63, %v6041_v33  ;;  %v1124_v33 = vmul.bf16 %v5959_v21, %v6113_v24 }
 0x1ed   : > { %v810_v8 = vpop.permute.xlu0 %809  ;;  %v2118_v9 = vpop.permute.xlu1 %2117 }
 0x1ee   : > { %v2135_v15 = vsel %vm647_vm12, %v2118_v9, %v2120_v4  ;;  %v4984_v9 = vld [vmem:[%s7162_s1 + $0x5c] ss:$44 sps:$4 sm:$0xff]  }
 0x1ef   : > { %1063 = vrot.lane.b32.xlu0 %v1041_v49, %s5290_s30  ;;  %2371 = vrot.lane.b32.xlu1 %v2353_v28, %s5294_s19  ;;  %v4986_v49 = vld [vmem:[%s7162_s1 + $0x58] ss:$44 sps:$4 sm:$0xff]  }
 0x1f0   : > { %3766 = vmatpush1.bf16.msra.mxu0 %v2135_v15  ;;  %3438 = vmatprep.mubr.bf16.mxu1 %v4984_v9  ;;  %v4995_v9 = vld [vmem:[%s7162_s1 + $0x160] ss:$44 sps:$4 sm:$0xff]  }
 0x1f1   : > { %v808_v51 = vpop.permute.xlu0 %807  ;;  %v812_v3 = vpop.permute.xlu1 %811  ;;  %3439 = vmatmul.mubr.bf16.gmra.mrb[4].mxu1 %v4986_v49 }
 0x1f2   : > { %v821_v19 = vsel %vm606_vm5, %v808_v51, %v810_v8  ;;  %v822_v34 = vsel %vm606_vm5, %v810_v8, %v812_v3  ;;  %v6342_v51 = vsel %vm473_vm9, %v6144_v7, %v6142_v32 }
 0x1f3   : > { %1061 = vrot.lane.b32.xlu0 %v1040_v52, %s5290_s30  ;;  %1065 = vrot.lane.b32.xlu1 %v1042_v55, %s5290_s30 }
 0x1f4   : > { %3509 = vmatprep.subr.bf16.mxu1 %v822_v34  ;;  %3768 = vmatmul.mubr.bf16.vlgmr.msra.gmra.mrb[0].mxu0 %v4977_v46  ;;  %v1126_v46 = vmul.bf16 %v5959_v21, %v6111_v23  ;;  %v2441_v34 = vmul.bf16 %v5950_v59, %v6142_v32 }
 0x1f5   : > { %3510 = vmatpush1.bf16.msra.mxu1 %v821_v19  ;;  %v2128_v36 = vpop.permute.xlu0 %2127  ;;  %v2126_v61 = vpop.permute.xlu1 %2125 }
 0x1f6   : > { %v2138_v11 = vsel %vm647_vm12, %v2126_v61, %v2128_v36  ;;  %v2440_v36 = vmul.bf16 %v5959_v21, %v6342_v51 }
 0x1f7   : > { %2381 = vrot.lane.b32.xlu0 %v2358_v20, %s5294_s19  ;;  %2379 = vrot.lane.b32.xlu1 %v2357_v13, %s5294_s19  ;;  %v4989_v13 = vld [vmem:[%s7162_s1 + $0xb0] ss:$44 sps:$4 sm:$0xff]  }
 0x1f8   : > { %3848 = vmatprep.subr.bf16.mxu0 %v2138_v11 }
 0x1f9   : > { %v816_v31 = vpop.permute.xlu0 %815  ;;  %v2124_v43 = vpop.permute.xlu1 %2123 }
 0x1fa   : > { %v2137_v40 = vsel %vm647_vm12, %v2124_v43, %v2126_v61  ;;  %v4987_v61 = vld [vmem:[%s7162_s1 + $0xb4] ss:$44 sps:$4 sm:$0xff]   ;;  %v2439_v43 = vmul.bf16 %v5950_v59, %v6144_v7 }
 0x1fb   : > { %1069 = vrot.lane.b32.xlu0 %v1044_v58, %s5290_s30  ;;  %2377 = vrot.lane.b32.xlu1 %v2356_v6, %s5294_s19 }
 0x1fc   : > { %3849 = vmatpush1.bf16.msra.mxu0 %v2137_v40  ;;  %3448 = vmatprep.mubr.bf16.mxu1 %v4987_v61 }
 0x1fd   : > { %v814_v56 = vpop.permute.xlu0 %813  ;;  %v818_v54 = vpop.permute.xlu1 %817  ;;  %3449 = vmatmul.mubr.bf16.gmra.mrb[8].mxu1 %v4989_v13 }
 0x1fe   : > { %v823_v35 = vsel %vm606_vm5, %v814_v56, %v816_v31  ;;  %v824_v41 = vsel %vm606_vm5, %v816_v31, %v818_v54  ;;  %v1128_v31 = vmul.bf16 %v5989_v48, %v6318_v26 }
 0x1ff   : > { %1067 = vrot.lane.b32.xlu0 %v1043_v10, %s5290_s30  ;;  %1071 = vrot.lane.b32.xlu1 %v1045_v39, %s5290_s30  ;;  %v4990_v10 = vld [vmem:[%s7162_s1 + $0x10c] ss:$44 sps:$4 sm:$0xff]   ;;  %v4992_v39 = vld [vmem:[%s7162_s1 + $0x108] ss:$44 sps:$4 sm:$0xff]  }
 0x200   : > { %3511 = vmatprep.subr.bf16.mxu1 %v824_v41  ;;  %3458 = vmatprep.mubr.bf16.mxu1 %v4990_v10 }
 0x201   : > { %3512 = vmatpush1.bf16.msra.mxu1 %v823_v35  ;;  %v2134_v17 = vpop.permute.xlu0 %2133  ;;  %v2132_v1 = vpop.permute.xlu1 %2131  ;;  %v1557_v35 = vld [vmem:[%s7164_s3 + $0x8] sm:$0x88] }
 0x202   : > { %v2140_v14 = vsel %vm647_vm12, %v2132_v1, %v2134_v17  ;;  %v2443_v17 = vmul.bf16 %v6002_v45, %v6342_v51 }
 0x203   : > { %2387 = vrot.lane.b32.xlu0 %v2361_v57, %s5294_s19  ;;  %2385 = vrot.lane.b32.xlu1 %v2360_v47, %s5294_s19  ;;  %v4510_v57 = vcombine.high %v1557_v35, %v1557_v35  ;;  %v4509_v47 = vcombine.low %v1557_v35, %v1557_v35  ;;  %v5002_v35 = vld [vmem:[%s7162_s1 + $0x74] ss:$44 sps:$4 sm:$0xff]  }
 0x204   : > { %3850 = vmatprep.subr.bf16.mxu0 %v2140_v14  ;;  %3777 = vmatprep.mubr.bf16.mxu0 %v5002_v35 }
 0x205   : > { %v6311_v2 = vpop.permute.xlu0 %1291  ;;  %v6313_v4 = vpop.permute.xlu1 %1289  ;;  %3459 = vmatmul.mubr.bf16.gmra.mrb[12].mxu1 %v4992_v39 }
 0x207   : > { %1497 = vrot.lane.b32.xlu0 %v1492_v62, %s5305_s25  ;;  %1495 = vrot.lane.b32.xlu1 %v1485_v22, %s5305_s25  ;;  %v1131_v22 = vmul.bf16 %v6115_v63, %v6318_v26 }
 0x209   : > { %v888_v29 = vpop.permute.xlu0 %887  ;;  %v2130_v38 = vpop.permute.xlu1 %2129 }
 0x20a   : > { %v2139_v8 = vsel %vm647_vm12, %v2130_v38, %v2132_v1 }
 0x20b   : > { %1144 = vrot.lane.b32.xlu0 %v1125_v5, %s5293_s16  ;;  %2383 = vrot.lane.b32.xlu1 %v2359_v18, %s5294_s19  ;;  %v1572_v5 = vshrl.u32 %v4510_v57, 16  ;;  %v1564_v18 = vshrl.u32 %v4509_v47, 16  ;;  %v5005_v57 = vld [vmem:[%s7162_s1 + $0x26c] ss:$44 sps:$4 sm:$0xff]  }
 0x20c   : > { %3851 = vmatpush1.bf16.msra.mxu0 %v2139_v8  ;;  %v4993_v8 = vld [vmem:[%s7162_s1 + $0x164] ss:$44 sps:$4 sm:$0xff]  }
 0x20d   : > { %v886_v28 = vpop.permute.xlu0 %885  ;;  %v890_v15 = vpop.permute.xlu1 %889  ;;  %3468 = vmatprep.mubr.bf16.mxu1 %v4993_v8 }
 0x20e   : > { %v903_v3 = vsel %vm518_vm4, %v886_v28, %v888_v29  ;;  %v904_v52 = vsel %vm518_vm4, %v888_v29, %v890_v15  ;;  %v2442_v29 = vmul.bf16 %v5989_v48, %v6144_v7  ;;  %v1130_v28 = vmul.bf16 %v6123_v42, %v6113_v24  ;;  %3469 = vmatmul.mubr.bf16.gmra.mrb[16].mxu1 %v4995_v9 }
 0x20f   : > { %1142 = vrot.lane.b32.xlu0 %v1124_v33, %s5293_s16  ;;  %1146 = vrot.lane.b32.xlu1 %v1126_v46, %s5293_s16  ;;  %v1132_v15 = vmul.bf16 %v6123_v42, %v6111_v23  ;;  %v2447_v24 = vmul.bf16 %v6115_v63, %v6142_v32  ;;  %v2446_v23 = vmul.bf16 %v6123_v42, %v6342_v51  ;;  %v4998_v32 = vld [vmem:[%s7162_s1 + $0x1b8] ss:$44 sps:$4 sm:$0xff]  }
 0x210   : > { %3513 = vmatprep.subr.bf16.mxu1 %v904_v52  ;;  %v1565_v52 = vpack.i.b16 %v1564_v18, %v1564_v18  ;;  %v1213_v9 = vmul.bf16 %v6002_v45, %v6207_v44 }
 0x211   : > { %3514 = vmatpush1.bf16.msra.mxu1 %v903_v3  ;;  %v2206_v55 = vpop.permute.xlu0 %2205  ;;  %v2204_v19 = vpop.permute.xlu1 %2203  ;;  %v1573_v3 = vpack.i.b16 %v1572_v5, %v1572_v5  ;;  %v5008_v5 = vld [vmem:[%s7162_s1 + $0xcc] ss:$44 sps:$4 sm:$0xff]  }
 0x212   : > { %v2220_v20 = vsel %vm692_vm7, %v2204_v19, %v2206_v55 }
 0x213   : > { %2461 = vrot.lane.b32.xlu0 %v2441_v34, %s5292_s15  ;;  %2459 = vrot.lane.b32.xlu1 %v2440_v36, %s5292_s15  ;;  %v4996_v36 = vld [vmem:[%s7162_s1 + $0x1bc] ss:$44 sps:$4 sm:$0xff]   ;;  %v1578_v61 = vrot.slane %v1573_v3, %v5492_v60 }
 0x214   : > { %3852 = vmatprep.subr.bf16.mxu0 %v2220_v20  ;;  %v1570_v20 = vrot.slane %v1565_v52, %v5492_v60  ;;  %3478 = vmatprep.mubr.bf16.mxu1 %v4996_v36  ;;  %v2528_v52 = vmul.bf16 %v5989_v48, %v6237_v27  ;;  %v6522_v36 = vld [vmem:[#allocation4 + $0x10] sm:$0xff] }
 0x215   : > { %v894_v11 = vpop.permute.xlu0 %893  ;;  %v2202_v37 = vpop.permute.xlu1 %2201 }
 0x216   : > { %v2219_v58 = vsel %vm692_vm7, %v2202_v37, %v2204_v19  ;;  %3479 = vmatmul.mubr.bf16.gmra.mrb[20].mxu1 %v4998_v32 }
 0x217   : > { %1150 = vrot.lane.b32.xlu0 %v1128_v31, %s5293_s16  ;;  %2457 = vrot.lane.b32.xlu1 %v2439_v43, %s5292_s15  ;;  %v2445_v43 = vmul.bf16 %v6115_v63, %v6144_v7  ;;  %v1210_v7 = vmul.bf16 %v5959_v21, %v6207_v44 }
 0x218   : > { %3853 = vmatpush1.bf16.msra.mxu0 %v2219_v58 }
 0x219   : > { %v892_v6 = vpop.permute.xlu0 %891  ;;  %v896_v40 = vpop.permute.xlu1 %895 }
 0x21a   : > { %v905_v56 = vsel %vm518_vm4, %v892_v6, %v894_v11  ;;  %v906_v54 = vsel %vm518_vm4, %v894_v11, %v896_v40  ;;  %v6435_v11 = vsel %vm1205_vm8, %v6207_v44, %v6205_v0  ;;  %v4999_v6 = vld [vmem:[%s7162_s1 + $0x214] ss:$44 sps:$4 sm:$0xff]   ;;  %v5001_v40 = vld [vmem:[%s7162_s1 + $0x210] ss:$44 sps:$4 sm:$0xff]  }
 0x21b   : > { %1148 = vrot.lane.b32.xlu0 %v1127_v25, %s5293_s16  ;;  %1152 = vrot.lane.b32.xlu1 %v1129_v53, %s5293_s16  ;;  %v1211_v31 = vmul.bf16 %v5950_v59, %v6435_v11 }
 0x21c   : > { %3515 = vmatprep.subr.bf16.mxu1 %v906_v54  ;;  %3488 = vmatprep.mubr.bf16.mxu1 %v4999_v6  ;;  %v6459_v54 = vsel %vm385_vm6, %v6239_v12, %v6237_v27 }
 0x21d   : > { %3516 = vmatpush1.bf16.msra.mxu1 %v905_v56  ;;  %v2212_v41 = vpop.permute.xlu0 %2211  ;;  %v2210_v50 = vpop.permute.xlu1 %2209  ;;  %v1212_v56 = vmul.bf16 %v5959_v21, %v6205_v0 }
 0x21e   : > { %v2222_v1 = vsel %vm692_vm7, %v2210_v50, %v2212_v41  ;;  %3489 = vmatmul.mubr.bf16.gmra.mrb[24].mxu1 %v5001_v40  ;;  %v6546_v40 = vld [vmem:[#allocation4 + $0x8] sm:$0xff] }
 0x21f   : > { %2467 = vrot.lane.b32.xlu0 %v2444_v30, %s5292_s15  ;;  %2465 = vrot.lane.b32.xlu1 %v2443_v17, %s5292_s15  ;;  %v2525_v30 = vmul.bf16 %v5950_v59, %v6237_v27  ;;  %v2524_v17 = vmul.bf16 %v5959_v21, %v6459_v54  ;;  %v5007_v59 = vld [vmem:[%s7162_s1 + $0x268] ss:$44 sps:$4 sm:$0xff]  }
 0x220   : > { %3854 = vmatprep.subr.bf16.mxu0 %v2222_v1  ;;  %v5004_v1 = vld [vmem:[%s7162_s1 + $0x70] ss:$44 sps:$4 sm:$0xff]   ;;  %3498 = vmatprep.mubr.bf16.mxu1 %v5005_v57 }
 0x221   : > { %v900_v14 = vpop.permute.xlu0 %899  ;;  %v2208_v62 = vpop.permute.xlu1 %2207  ;;  %3778 = vmatmul.mubr.bf16.gmra.mrb[4].mxu0 %v5004_v1  ;;  %v6566_v57 = vld [vmem:[#allocation4 + $0x18] sm:$0xff] }
 0x222   : > { %v2221_v38 = vsel %vm692_vm7, %v2208_v62, %v2210_v50  ;;  %v1214_v62 = vmul.bf16 %v5989_v48, %v6435_v11  ;;  %3787 = vmatprep.mubr.bf16.mxu0 %v5008_v5  ;;  %v1217_v48 = vmul.bf16 %v6115_v63, %v6435_v11  ;;  %v1306_v5 = vmul.bf16 %v6123_v42, %v6311_v2 }
 0x223   : > { %1156 = vrot.lane.b32.xlu0 %v1131_v22, %s5293_s16  ;;  %2463 = vrot.lane.b32.xlu1 %v2442_v29, %s5292_s15  ;;  %v6486_v22 = vld [vmem:[#allocation4] sm:$0xff] }
 0x224   : > { %3855 = vmatpush1.bf16.msra.mxu0 %v2221_v38  ;;  %v2523_v29 = vmul.bf16 %v6486_v22, %v6239_v12 }
 0x225   : > { %v898_v26 = vpop.permute.xlu0 %897  ;;  %v902_v49 = vpop.permute.xlu1 %901 }
 0x226   : > { %v907_v33 = vsel %vm518_vm4, %v898_v26, %v900_v14  ;;  %v908_v46 = vsel %vm518_vm4, %v900_v14, %v902_v49  ;;  %3499 = vmatmul.mubr.bf16.gmra.mrb[28].mxu1 %v5007_v59  ;;  %v1215_v26 = vmul.bf16 %v6002_v45, %v6205_v0  ;;  %v5010_v49 = vld [vmem:[%s7162_s1 + $0xc8] ss:$44 sps:$4 sm:$0xff]   ;;  %v1303_v59 = vmul.bf16 %v6566_v57, %v6311_v2 }
 0x227   : > { %1154 = vrot.lane.b32.xlu0 %v1130_v28, %s5293_s16  ;;  %1158 = vrot.lane.b32.xlu1 %v1132_v15, %s5293_s16 }
 0x228   : > { %3517 = vmatprep.subr.bf16.mxu1 %v908_v46 }
 0x229   : > { %3518 = vmatpush1.bf16.msra.mxu1 %v907_v33  ;;  %v2218_v55 = vpop.permute.xlu0 %2217  ;;  %v2216_v19 = vpop.permute.xlu1 %2215  ;;  %v5013_v33 = vld [vmem:[%s7162_s1 + $0xc] ss:$44 sps:$4 sm:$0xff]   ;;  %3788 = vmatmul.mubr.bf16.gmra.mrb[8].mxu0 %v5010_v49 }
 0x22a   : > { %v2224_v34 = vsel %vm692_vm7, %v2216_v19, %v2218_v55  ;;  %v2527_v55 = vmul.bf16 %v6002_v45, %v6459_v54  ;;  %3541 = vmatprep.mubr.bf16.mxu1 %v5013_v33  ;;  %v2526_v45 = vmul.bf16 %v6522_v36, %v6239_v12  ;;  %v5025_v33 = vld [vmem:[%s7162_s1 + $0x228] ss:$44 sps:$4 sm:$0xff]  }
 0x22b   : > { %2473 = vrot.lane.b32.xlu0 %v2447_v24, %s5292_s15  ;;  %2471 = vrot.lane.b32.xlu1 %v2446_v23, %s5292_s15  ;;  %v5014_v24 = vld [vmem:[%s7162_s1 + $0x124] ss:$44 sps:$4 sm:$0xff]  }
 0x22c   : > { %3856 = vmatprep.subr.bf16.mxu0 %v2224_v34  ;;  %3797 = vmatprep.mubr.bf16.mxu0 %v5014_v24 }
 0x22d   : > { %v6428_v51 = vpop.permute.xlu0 %1377  ;;  %v6430_v13 = vpop.permute.xlu1 %1375 }
 0x22f   : > { %1583 = vrot.lane.b32.xlu0 %v1578_v61, %s5306_s29  ;;  %1581 = vrot.lane.b32.xlu1 %v1570_v20, %s5306_s29  ;;  %v5016_v61 = vld [vmem:[%s7162_s1 + $0x120] ss:$44 sps:$4 sm:$0xff]  }
 0x231   : > { %v974_v60 = vpop.permute.xlu0 %973  ;;  %v2214_v37 = vpop.permute.xlu1 %2213  ;;  %3798 = vmatmul.mubr.bf16.gmra.mrb[12].mxu0 %v5016_v61  ;;  %v1389_v61 = vmul.bf16 %v6566_v57, %v6428_v51 }
 0x232   : > { %v2223_v58 = vsel %vm692_vm7, %v2214_v37, %v2216_v19  ;;  %v1218_v37 = vmul.bf16 %v6123_v42, %v6205_v0 }
 0x233   : > { %1230 = vrot.lane.b32.xlu0 %v1211_v31, %s5291_s6  ;;  %2469 = vrot.lane.b32.xlu1 %v2445_v43, %s5292_s15  ;;  %v1294_v31 = vsel %vm1293_vm13, %v6313_v4, %v6311_v2 }
 0x234   : > { %3857 = vmatpush1.bf16.msra.mxu0 %v2223_v58  ;;  %v1302_v35 = vmul.bf16 %v6522_v36, %v1294_v31 }
 0x235   : > { %v972_v25 = vpop.permute.xlu0 %971  ;;  %v976_v53 = vpop.permute.xlu1 %975 }
 0x236   : > { %v989_v10 = vsel %vm432_vm2, %v972_v25, %v974_v60  ;;  %v990_v39 = vsel %vm432_vm2, %v974_v60, %v976_v53  ;;  %v1216_v60 = vmul.bf16 %v6123_v42, %v6207_v44  ;;  %v5017_v44 = vld [vmem:[%s7162_s1 + $0x17c] ss:$44 sps:$4 sm:$0xff]   ;;  %v1300_v25 = vmul.bf16 %v6546_v40, %v6311_v2 }
 0x237   : > { %1228 = vrot.lane.b32.xlu0 %v1210_v7, %s5291_s6  ;;  %1232 = vrot.lane.b32.xlu1 %v1212_v56, %s5291_s6  ;;  %v1299_v53 = vmul.bf16 %v6486_v22, %v1294_v31  ;;  %v5019_v7 = vld [vmem:[%s7162_s1 + $0x178] ss:$44 sps:$4 sm:$0xff]  }
 0x238   : > { %3519 = vmatprep.subr.bf16.mxu1 %v990_v39  ;;  %3807 = vmatprep.mubr.bf16.mxu0 %v5017_v44 }
 0x239   : > { %3520 = vmatpush1.bf16.msra.mxu1 %v989_v10  ;;  %v2292_v41 = vpop.permute.xlu0 %2291  ;;  %v2290_v50 = vpop.permute.xlu1 %2289  ;;  %3808 = vmatmul.mubr.bf16.gmra.mrb[16].mxu0 %v5019_v7 }
 0x23a   : > { %v2306_v47 = vsel %vm606_vm5, %v2290_v50, %v2292_v41  ;;  %v1298_v41 = vmul.bf16 %v6546_v40, %v6313_v4 }
 0x23b   : > { %2545 = vrot.lane.b32.xlu0 %v2525_v30, %s5290_s30  ;;  %2543 = vrot.lane.b32.xlu1 %v2524_v17, %s5290_s30  ;;  %v5020_v30 = vld [vmem:[%s7162_s1 + $0x1d4] ss:$44 sps:$4 sm:$0xff]  }
 0x23c   : > { %3858 = vmatprep.subr.bf16.mxu0 %v2306_v47  ;;  %v1301_v47 = vmul.bf16 %v6566_v57, %v6313_v4  ;;  %3817 = vmatprep.mubr.bf16.mxu0 %v5020_v30 }
 0x23d   : > { %v980_v21 = vpop.permute.xlu0 %979  ;;  %v2288_v14 = vpop.permute.xlu1 %2287 }
 0x23e   : > { %v2305_v38 = vsel %vm606_vm5, %v2288_v14, %v2290_v50 }
 0x23f   : > { %1236 = vrot.lane.b32.xlu0 %v1214_v62, %s5291_s6  ;;  %2541 = vrot.lane.b32.xlu1 %v2523_v29, %s5290_s30 }
 0x240   : > { %3859 = vmatpush1.bf16.msra.mxu0 %v2305_v38 }
 0x241   : > { %v978_v18 = vpop.permute.xlu0 %977  ;;  %v982_v8 = vpop.permute.xlu1 %981 }
 0x242   : > { %v991_v28 = vsel %vm432_vm2, %v978_v18, %v980_v21  ;;  %v992_v15 = vsel %vm432_vm2, %v980_v21, %v982_v8  ;;  %v5022_v21 = vld [vmem:[%s7162_s1 + $0x1d0] ss:$44 sps:$4 sm:$0xff]   ;;  %v1305_v18 = vmul.bf16 %v6115_v63, %v1294_v31  ;;  %v1380_v8 = vsel %vm1379_vm14, %v6430_v13, %v6428_v51 }
 0x243   : > { %1234 = vrot.lane.b32.xlu0 %v1213_v9, %s5291_s6  ;;  %1238 = vrot.lane.b32.xlu1 %v1215_v26, %s5291_s6  ;;  %v5023_v26 = vld [vmem:[%s7162_s1 + $0x22c] ss:$44 sps:$4 sm:$0xff]   ;;  %v1391_v31 = vmul.bf16 %v6115_v63, %v1380_v8  ;;  %v1390_v63 = vmul.bf16 %v6123_v42, %v6430_v13 }
 0x244   : > { %3521 = vmatprep.subr.bf16.mxu1 %v992_v15  ;;  %3818 = vmatmul.mubr.bf16.gmra.mrb[20].mxu0 %v5022_v21  ;;  %v1385_v15 = vmul.bf16 %v6486_v22, %v1380_v8 }
 0x245   : > { %3522 = vmatpush1.bf16.msra.mxu1 %v991_v28  ;;  %v2298_v46 = vpop.permute.xlu0 %2297  ;;  %v2296_v3 = vpop.permute.xlu1 %2295  ;;  %v1304_v28 = vmul.bf16 %v6123_v42, %v6313_v4  ;;  %3827 = vmatprep.mubr.bf16.mxu0 %v5023_v26  ;;  %v1384_v4 = vmul.bf16 %v6546_v40, %v6430_v13  ;;  %v6658_v26 = vld [vmem:[#allocation4 + $0x28] sm:$0xff] }
 0x246   : > { %v2308_v19 = vsel %vm606_vm5, %v2296_v3, %v2298_v46 }
 0x247   : > { %2551 = vrot.lane.b32.xlu0 %v2528_v52, %s5290_s30  ;;  %2549 = vrot.lane.b32.xlu1 %v2527_v55, %s5290_s30  ;;  %v1386_v55 = vmul.bf16 %v6546_v40, %v6428_v51 }
 0x248   : > { %3860 = vmatprep.subr.bf16.mxu0 %v2308_v19 }
 0x249   : > { %v986_v23 = vpop.permute.xlu0 %985  ;;  %v2294_v34 = vpop.permute.xlu1 %2293 }
 0x24a   : > { %v2307_v20 = vsel %vm606_vm5, %v2294_v34, %v2296_v3 }
 0x24b   : > { %1242 = vrot.lane.b32.xlu0 %v1217_v48, %s5291_s6  ;;  %2547 = vrot.lane.b32.xlu1 %v2526_v45, %s5290_s30  ;;  %v1388_v45 = vmul.bf16 %v6522_v36, %v1380_v8 }
 0x24c   : > { %3861 = vmatpush1.bf16.msra.mxu0 %v2307_v20  ;;  %v5028_v20 = vld [vmem:[%s7162_s1 + $0x280] ss:$44 sps:$4 sm:$0xff]  }
 0x24d   : > { %v984_v32 = vpop.permute.xlu0 %983  ;;  %v988_v11 = vpop.permute.xlu1 %987  ;;  %3828 = vmatmul.mubr.bf16.gmra.mrb[24].mxu0 %v5025_v33 }
 0x24e   : > { %v993_v43 = vsel %vm432_vm2, %v984_v32, %v986_v23  ;;  %v994_v58 = vsel %vm432_vm2, %v986_v23, %v988_v11  ;;  %v5026_v23 = vld [vmem:[%s7162_s1 + $0x284] ss:$44 sps:$4 sm:$0xff]  }
 0x24f   : > { %1240 = vrot.lane.b32.xlu0 %v1216_v60, %s5291_s6  ;;  %1244 = vrot.lane.b32.xlu1 %v1218_v37, %s5291_s6  ;;  %v1387_v37 = vmul.bf16 %v6566_v57, %v6430_v13 }
 0x250   : > { %3523 = vmatprep.subr.bf16.mxu1 %v994_v58  ;;  %3837 = vmatprep.mubr.bf16.mxu0 %v5026_v23  ;;  %v5033_v58 = vld [vmem:[%s7162_s1 + $0x24] ss:$44 sps:$4 sm:$0xff]  }
 0x251   : > { %3524 = vmatpush1.bf16.msra.mxu1 %v993_v43  ;;  %v2304_v0 = vpop.permute.xlu0 %2303  ;;  %v2302_v6 = vpop.permute.xlu1 %2301 }
 0x252   : > { %v2310_v56 = vsel %vm606_vm5, %v2302_v6, %v2304_v0 }
 0x253   : > { %1320 = vrot.lane.b32.xlu0 %v1300_v25, %s5306_s29  ;;  %1318 = vrot.lane.b32.xlu1 %v1299_v53, %s5306_s29 }
 0x254   : > { %3862 = vmatprep.subr.bf16.mxu0 %v2310_v56 }
 0x255   : > { %v1058_v10 = vpop.permute.xlu0 %1057  ;;  %v2300_v39 = vpop.permute.xlu1 %2299  ;;  %3838 = vmatmul.mubr.bf16.gmra.mrb[28].mxu0 %v5028_v20 }
 0x256   : > { %v2309_v50 = vsel %vm606_vm5, %v2300_v39, %v2302_v6  ;;  %v1392_v6 = vmul.bf16 %v6123_v42, %v6428_v51  ;;  %3880 = vmatprep.mubr.bf16.mxu0 %v5033_v58 }
 0x257   : > { %1324 = vrot.lane.b32.xlu0 %v1302_v35, %s5306_s29  ;;  %1316 = vrot.lane.b32.xlu1 %v1298_v41, %s5306_s29 }
 0x258   : > { %3863 = vmatpush1.bf16.msra.mxu0 %v2309_v50 }
 0x259   : > { %v1056_v17 = vpop.permute.xlu0 %1055  ;;  %v1060_v1 = vpop.permute.xlu1 %1059 }
 0x25a   : > { %v1073_v14 = vsel %vm344_vm0, %v1056_v17, %v1058_v10  ;;  %v1074_v62 = vsel %vm344_vm0, %v1058_v10, %v1060_v1 }
 0x25b   : > { %1322 = vrot.lane.b32.xlu0 %v1301_v47, %s5306_s29  ;;  %1326 = vrot.lane.b32.xlu1 %v1303_v59, %s5306_s29 }
 0x25c   : > { %3525 = vmatprep.subr.bf16.mxu1 %v1074_v62 }
 0x25d   : > { %3526 = vmatpush1.bf16.msra.mxu1 %v1073_v14  ;;  %v2376_v29 = vpop.permute.xlu0 %2375  ;;  %v2374_v38 = vpop.permute.xlu1 %2373 }
 0x25e   : > { %v2390_v9 = vsel %vm518_vm4, %v2374_v38, %v2376_v29 }
 0x25f   : > { %1332 = vrot.lane.b32.xlu0 %v1306_v5, %s5306_s29  ;;  %1330 = vrot.lane.b32.xlu1 %v1305_v18, %s5306_s29  ;;  %v6654_v18 = vld [vmem:[#allocation4 + $0x20] sm:$0xff] }
 0x260   : > { %3864 = vmatprep.subr.bf16.mxu0 %v2390_v9 }
 0x261   : > { %v1064_v49 = vpop.permute.xlu0 %1063  ;;  %v2372_v2 = vpop.permute.xlu1 %2371 }
 0x262   : > { %v2389_v46 = vsel %vm518_vm4, %v2372_v2, %v2374_v38 }
 0x263   : > { %1328 = vrot.lane.b32.xlu1 %v1304_v28, %s5306_s29  ;;  %1404 = vrot.lane.b32.xlu0 %v1385_v15, %s5305_s25 }
 0x264   : > { %3865 = vmatpush1.bf16.msra.mxu0 %v2389_v46 }
 0x265   : > { %v1062_v3 = vpop.permute.xlu0 %1061  ;;  %v1066_v52 = vpop.permute.xlu1 %1065 }
 0x266   : > { %v1075_v19 = vsel %vm344_vm0, %v1062_v3, %v1064_v49  ;;  %v1076_v24 = vsel %vm344_vm0, %v1064_v49, %v1066_v52 }
 0x267   : > { %1406 = vrot.lane.b32.xlu1 %v1386_v55, %s5305_s25  ;;  %1402 = vrot.lane.b32.xlu0 %v1384_v4, %s5305_s25 }
 0x268   : > { %3527 = vmatprep.subr.bf16.mxu1 %v1076_v24 }
 0x269   : > { %3528 = vmatpush1.bf16.msra.mxu1 %v1075_v19  ;;  %v2382_v34 = vpop.permute.xlu0 %2381  ;;  %v2380_v48 = vpop.permute.xlu1 %2379 }
 0x26a   : > { %v2392_v32 = vsel %vm518_vm4, %v2380_v48, %v2382_v34 }
 0x26b   : > { %1410 = vrot.lane.b32.xlu1 %v1388_v45, %s5305_s25  ;;  %1412 = vrot.lane.b32.xlu0 %v1389_v61, %s5305_s25 }
 0x26c   : > { %3866 = vmatprep.subr.bf16.mxu0 %v2392_v32 }
 0x26d   : > { %v1070_v11 = vpop.permute.xlu0 %1069  ;;  %v2378_v60 = vpop.permute.xlu1 %2377 }
 0x26e   : > { %v2391_v43 = vsel %vm518_vm4, %v2378_v60, %v2380_v48 }
 0x26f   : > { %1408 = vrot.lane.b32.xlu1 %v1387_v37, %s5305_s25  ;;  %1416 = vrot.lane.b32.xlu0 %v1391_v31, %s5305_s25 }
 0x270   : > { %3867 = vmatpush1.bf16.msra.mxu0 %v2391_v43 }
 0x271   : > { %v1068_v44 = vpop.permute.xlu0 %1067  ;;  %v1072_v0 = vpop.permute.xlu1 %1071 }
 0x272   : > { %v1077_v25 = vsel %vm344_vm0, %v1068_v44, %v1070_v11  ;;  %v1078_v53 = vsel %vm344_vm0, %v1070_v11, %v1072_v0 }
 0x273   : > { %1418 = vrot.lane.b32.xlu1 %v1392_v6, %s5305_s25  ;;  %1414 = vrot.lane.b32.xlu0 %v1390_v63, %s5305_s25 }
 0x274   : > { %3529 = vmatprep.subr.bf16.mxu1 %v1078_v53 }
 0x275   : > { %3530 = vmatpush1.bf16.msra.mxu1 %v1077_v25  ;;  %v2388_v7 = vpop.permute.xlu0 %2387  ;;  %v2386_v56 = vpop.permute.xlu1 %2385 }
 0x276   : > { %v2394_v10 = vsel %vm518_vm4, %v2386_v56, %v2388_v7 }
 0x277   : > { %3868 = vmatprep.subr.bf16.mxu0 %v2394_v10 }
 0x279   : > { %v1498_v51 = vpop.permute.xlu0 %1497  ;;  %v1496_v39 = vpop.permute.xlu1 %1495 }
 0x27a   : > { %v1505_v42 = vmul.bf16 %v6486_v22, %v1498_v51  ;;  %v1499_v13 = vsel %vm1420_vm15, %v1496_v39, %v1498_v51  ;;  %v1503_v1 = vmul.bf16 %v6486_v22, %v1496_v39  ;;  %v1506_v21 = vmul.bf16 %v6522_v36, %v1496_v39 }
 0x27b   : > { %v1504_v35 = vmul.bf16 %v6546_v40, %v1499_v13  ;;  %v1507_v17 = vmul.bf16 %v6566_v57, %v1499_v13  ;;  %v1508_v29 = vmul.bf16 %v6522_v36, %v1498_v51  ;;  %v1511_v8 = vmul.bf16 %v6654_v18, %v1498_v51 }
 0x27c   : > { %1525 = vrot.lane.b32.xlu0 %v1505_v42, %s5304_s28  ;;  %v1510_v49 = vmul.bf16 %v6658_v26, %v1499_v13  ;;  %v1509_v33 = vmul.bf16 %v6654_v18, %v1496_v39 }
 0x27d   : > { %v1145_v41 = vpop.permute.xlu0 %1144  ;;  %1523 = vrot.lane.b32.xlu1 %v1504_v35, %s5304_s28  ;;  %v2384_v50 = vpop.permute.xlu1 %2383 }
 0x27e   : > { %v2393_v30 = vsel %vm518_vm4, %v2384_v50, %v2386_v56  ;;  %vm1334_vm4 = vcmask 56320  }
 0x27f   : > { %3869 = vmatpush1.bf16.msra.mxu0 %v2393_v30 }
 0x280   : > { %1529 = vrot.lane.b32.xlu0 %v1507_v17, %s5304_s28 }
 0x281   : > { %v1143_v47 = vpop.permute.xlu0 %1142  ;;  %1521 = vrot.lane.b32.xlu1 %v1503_v1, %s5304_s28  ;;  %v1147_v59 = vpop.permute.xlu1 %1146  ;;  %v5307_v1 = vmov 0  }
 0x282   : > { %v1161_v14 = vsel %vm1160_vm3, %v1143_v47, %v1145_v41  ;;  %v1162_v62 = vsel %vm1160_vm3, %v1145_v41, %v1147_v59  ;;  %4923 = vset.pattern.permute.xlu0 %v5307_v1  ;;  %4924 = vset.pattern.permute.xlu1 %v5307_v1 }
 0x283   : > { %3531 = vmatprep.subr.bf16.mxu1 %v1162_v62 }
 0x284   : > { %1527 = vrot.lane.b32.xlu0 %v1506_v21, %s5304_s28  ;;  %3532 = vmatpush1.bf16.msra.mxu1 %v1161_v14  ;;  %v2530_v14 = vmul.bf16 %v6658_v26, %v6459_v54  ;;  %v2531_v54 = vmul.bf16 %v6654_v18, %v6237_v27 }
 0x285   : > { %v2462_v38 = vpop.permute.xlu0 %2461  ;;  %1531 = vrot.lane.b32.xlu1 %v1508_v29, %s5304_s28  ;;  %v2460_v5 = vpop.permute.xlu1 %2459 }
 0x286   : > { %v2476_v9 = vsel %vm432_vm2, %v2460_v5, %v2462_v38 }
 0x287   : > { %3870 = vmatprep.subr.bf16.mxu0 %v2476_v9  ;;  %v2529_v9 = vmul.bf16 %v6654_v18, %v6239_v12 }
 0x288   : > { %1537 = vrot.lane.b32.xlu0 %v1511_v8, %s5304_s28 }
 0x289   : > { %v1151_v2 = vpop.permute.xlu0 %1150  ;;  %1535 = vrot.lane.b32.xlu1 %v1510_v49, %s5304_s28  ;;  %v2458_v28 = vpop.permute.xlu1 %2457  ;;  %v5011_v49 = vld [vmem:[%s7162_s1 + $0x8] ss:$44 sps:$4 sm:$0xff]  }
 0x28a   : > { %v2475_v15 = vsel %vm432_vm2, %v2458_v28, %v2460_v5 }
 0x28b   : > { %3871 = vmatpush1.bf16.msra.mxu0 %v2475_v15 }
 0x28d   : > { %v1149_v46 = vpop.permute.xlu0 %1148  ;;  %1533 = vrot.lane.b32.xlu1 %v1509_v33, %s5304_s28  ;;  %v1153_v3 = vpop.permute.xlu1 %1152 }
 0x28e   : > { %v1163_v52 = vsel %vm1160_vm3, %v1149_v46, %v1151_v2  ;;  %v1164_v55 = vsel %vm1160_vm3, %v1151_v2, %v1153_v3  ;;  %v5034_v2 = vld [vmem:[%s7162_s1 + $0x64] ss:$44 sps:$4 sm:$0xff]   ;;  %v5031_v3 = vld [vmem:[%s7162_s1 + $0x20] ss:$44 sps:$4 sm:$0xff]  }
 0x28f   : > { %3533 = vmatprep.subr.bf16.mxu1 %v1164_v55  ;;  %v5037_v55 = vld [vmem:[%s7162_s1 + $0x7c] ss:$44 sps:$4 sm:$0xff]  }
 0x290   : > { %3534 = vmatpush1.bf16.msra.mxu1 %v1163_v52  ;;  %v5036_v52 = vld [vmem:[%s7162_s1 + $0x60] ss:$44 sps:$4 sm:$0xff]  }
 0x291   : > { %v2468_v4 = vpop.permute.xlu0 %2467  ;;  %v2466_v19 = vpop.permute.xlu1 %2465 }
 0x292   : > { %v2478_v24 = vsel %vm432_vm2, %v2466_v19, %v2468_v4 }
 0x293   : > { %3872 = vmatprep.subr.bf16.mxu0 %v2478_v24  ;;  %v5040_v24 = vld [vmem:[%s7162_s1 + $0xbc] ss:$44 sps:$4 sm:$0xff]  }
 0x295   : > { %v1157_v23 = vpop.permute.xlu0 %1156  ;;  %v2464_v34 = vpop.permute.xlu1 %2463 }
 0x296   : > { %v2477_v48 = vsel %vm432_vm2, %v2464_v34, %v2466_v19 }
 0x297   : > { %3873 = vmatpush1.bf16.msra.mxu0 %v2477_v48 }
 0x299   : > { %v1155_v45 = vpop.permute.xlu0 %1154  ;;  %v1159_v61 = vpop.permute.xlu1 %1158 }
 0x29a   : > { %v1165_v20 = vsel %vm1160_vm3, %v1155_v45, %v1157_v23  ;;  %v1166_v32 = vsel %vm1160_vm3, %v1157_v23, %v1159_v61 }
 0x29b   : > { %3535 = vmatprep.subr.bf16.mxu1 %v1166_v32  ;;  %v5043_v32 = vld [vmem:[%s7162_s1 + $0xd4] ss:$44 sps:$4 sm:$0xff]  }
 0x29c   : > { %3536 = vmatpush1.bf16.msra.mxu1 %v1165_v20  ;;  %v5039_v20 = vld [vmem:[%s7162_s1 + $0x78] ss:$44 sps:$4 sm:$0xff]  }
 0x29d   : > { %v2474_v11 = vpop.permute.xlu0 %2473  ;;  %v2472_v60 = vpop.permute.xlu1 %2471 }
 0x29e   : > { %v2480_v37 = vsel %vm432_vm2, %v2472_v60, %v2474_v11  ;;  %v5042_v11 = vld [vmem:[%s7162_s1 + $0xb8] ss:$44 sps:$4 sm:$0xff]  }
 0x29f   : > { %3874 = vmatprep.subr.bf16.mxu0 %v2480_v37 }
 0x2a1   : > { %v1584_v31 = vpop.permute.xlu0 %1583  ;;  %v1582_v43 = vpop.permute.xlu1 %1581 }
 0x2a2   : > { %v1591_v58 = vmul.bf16 %v6486_v22, %v1584_v31  ;;  %v1585_v44 = vsel %vm1334_vm4, %v1582_v43, %v1584_v31  ;;  %v1589_v7 = vmul.bf16 %v6486_v22, %v1582_v43  ;;  %v1592_v51 = vmul.bf16 %v6522_v36, %v1582_v43 }
 0x2a3   : > { %v1590_v0 = vmul.bf16 %v6546_v40, %v1585_v44  ;;  %v1593_v53 = vmul.bf16 %v6566_v57, %v1585_v44  ;;  %v1594_v13 = vmul.bf16 %v6522_v36, %v1584_v31  ;;  %v1597_v50 = vmul.bf16 %v6654_v18, %v1584_v31  ;;  %v5046_v31 = vld [vmem:[%s7162_s1 + $0x114] ss:$44 sps:$4 sm:$0xff]  }
 0x2a4   : > { %1611 = vrot.lane.b32.xlu1 %v1591_v58, %s5303_s13  ;;  %v1596_v17 = vmul.bf16 %v6658_v26, %v1585_v44  ;;  %v1595_v62 = vmul.bf16 %v6654_v18, %v1582_v43 }
 0x2a5   : > { %v1231_v6 = vpop.permute.xlu0 %1230  ;;  %1609 = vrot.lane.b32.xlu0 %v1590_v0, %s5303_s13  ;;  %v2470_v63 = vpop.permute.xlu1 %2469 }
 0x2a6   : > { %v2479_v25 = vsel %vm432_vm2, %v2470_v63, %v2472_v60  ;;  %v5045_v63 = vld [vmem:[%s7162_s1 + $0xd0] ss:$44 sps:$4 sm:$0xff]  }
 0x2a7   : > { %3875 = vmatpush1.bf16.msra.mxu0 %v2479_v25  ;;  %v5049_v25 = vld [vmem:[%s7162_s1 + $0x12c] ss:$44 sps:$4 sm:$0xff]  }
 0x2a8   : > { %1615 = vrot.lane.b32.xlu1 %v1593_v53, %s5303_s13  ;;  %v5048_v53 = vld [vmem:[%s7162_s1 + $0x110] ss:$44 sps:$4 sm:$0xff]  }
 0x2a9   : > { %v1229_v56 = vpop.permute.xlu0 %1228  ;;  %1607 = vrot.lane.b32.xlu0 %v1589_v7, %s5303_s13  ;;  %v1233_v10 = vpop.permute.xlu1 %1232 }
 0x2aa   : > { %v1247_v39 = vsel %vm1246_vm1, %v1229_v56, %v1231_v6  ;;  %v1248_v42 = vsel %vm1246_vm1, %v1231_v6, %v1233_v10  ;;  %v5052_v10 = vld [vmem:[%s7162_s1 + $0x16c] ss:$44 sps:$4 sm:$0xff]  }
 0x2ab   : > { %3537 = vmatprep.subr.bf16.mxu1 %v1248_v42 }
 0x2ac   : > { %1613 = vrot.lane.b32.xlu1 %v1592_v51, %s5303_s13  ;;  %3538 = vmatpush1.bf16.msra.mxu1 %v1247_v39  ;;  %v1439_v39 = vld [vmem:[%s7164_s3 + $0x8] sm:$0x44] }
 0x2ad   : > { %v2546_v35 = vpop.permute.xlu0 %2545  ;;  %1617 = vrot.lane.b32.xlu0 %v1594_v13, %s5303_s13  ;;  %v2544_v41 = vpop.permute.xlu1 %2543 }
 0x2ae   : > { %v2560_v30 = vsel %vm344_vm0, %v2544_v41, %v2546_v35  ;;  %v4506_v35 = vcombine.high %v1439_v39, %v1439_v39 }
 0x2af   : > { %3876 = vmatprep.subr.bf16.mxu0 %v2560_v30  ;;  %v5055_v30 = vld [vmem:[%s7162_s1 + $0x184] ss:$44 sps:$4 sm:$0xff]  }
 0x2b0   : > { %1623 = vrot.lane.b32.xlu1 %v1597_v50, %s5303_s13  ;;  %v5051_v50 = vld [vmem:[%s7162_s1 + $0x128] ss:$44 sps:$4 sm:$0xff]  }
 0x2b1   : > { %v1237_v47 = vpop.permute.xlu0 %1236  ;;  %1621 = vrot.lane.b32.xlu0 %v1596_v17, %s5303_s13  ;;  %v2542_v59 = vpop.permute.xlu1 %2541  ;;  %v4505_v17 = vcombine.low %v1439_v39, %v1439_v39 }
 0x2b2   : > { %v2559_v21 = vsel %vm344_vm0, %v2542_v59, %v2544_v41 }
 0x2b3   : > { %3877 = vmatpush1.bf16.msra.mxu0 %v2559_v21  ;;  %v1454_v21 = vshrl.u32 %v4506_v35, 16 }
 0x2b4   : > { %2555 = vrot.lane.b32.xlu1 %v2530_v14, %s5290_s30  ;;  %v5054_v14 = vld [vmem:[%s7162_s1 + $0x168] ss:$44 sps:$4 sm:$0xff]  }
 0x2b5   : > { %v1235_v29 = vpop.permute.xlu0 %1234  ;;  %1619 = vrot.lane.b32.xlu0 %v1595_v62, %s5303_s13  ;;  %v1239_v38 = vpop.permute.xlu1 %1238 }
 0x2b6   : > { %v1249_v5 = vsel %vm1246_vm1, %v1235_v29, %v1237_v47  ;;  %v1250_v8 = vsel %vm1246_vm1, %v1237_v47, %v1239_v38  ;;  %v5058_v38 = vld [vmem:[%s7162_s1 + $0x1c4] ss:$44 sps:$4 sm:$0xff]  }
 0x2b7   : > { %3539 = vmatprep.subr.bf16.mxu1 %v1250_v8 }
 0x2b8   : > { %2553 = vrot.lane.b32.xlu1 %v2529_v9, %s5290_s30  ;;  %3540 = vmatpush1.bf16.msra.mxu1 %v1249_v5  ;;  %v1446_v5 = vshrl.u32 %v4505_v17, 16 }
 0x2b9   : > { %v2552_v28 = vpop.permute.xlu0 %2551  ;;  %2557 = vrot.lane.b32.xlu0 %v2531_v54, %s5290_s30  ;;  %v2550_v15 = vpop.permute.xlu1 %2549  ;;  %v1455_v54 = vpack.i.b16 %v1454_v21, %v1454_v21  ;;  %v2845_v21 = vld [vmem:[%s7163_s2 + $0x50] sm:$0xff] }
 0x2ba   : > { %v2562_v12 = vsel %vm344_vm0, %v2550_v15, %v2552_v28  ;;  %v5061_v28 = vld [vmem:[%s7162_s1 + $0x1dc] ss:$44 sps:$4 sm:$0xff]  }
 0x2bb   : > { %3878 = vmatprep.subr.bf16.mxu0 %v2562_v12  ;;  %3542 = vmatmul.mubr.bf16.vlgmr.msra.gmra.mrb[0].mxu1 %v5011_v49 }
 0x2bc   : > { %3551 = vmatprep.mubr.bf16.mxu1 %v5034_v2  ;;  %v5057_v2 = vld [vmem:[%s7162_s1 + $0x180] ss:$44 sps:$4 sm:$0xff]  }
 0x2bd   : > { %v1243_v27 = vpop.permute.xlu0 %1242  ;;  %v2548_v33 = vpop.permute.xlu1 %2547 }
 0x2be   : > { %v2561_v46 = vsel %vm344_vm0, %v2548_v33, %v2550_v15  ;;  %v1447_v15 = vpack.i.b16 %v1446_v5, %v1446_v5  ;;  %v1460_v33 = vrot.slane %v1455_v54, %v5449_v16  ;;  %v2850_v5 = vld [vmem:[%s7163_s2 + $0x78] sm:$0xff] }
 0x2bf   : > { %3879 = vmatpush1.bf16.msra.mxu0 %v2561_v46  ;;  %v5060_v46 = vld [vmem:[%s7162_s1 + $0x1c0] ss:$44 sps:$4 sm:$0xff]  }
 0x2c1   : > { %v1241_v4 = vpop.permute.xlu0 %1240  ;;  %v1245_v19 = vpop.permute.xlu1 %1244 }
 0x2c2   : > { %v1251_v23 = vsel %vm1246_vm1, %v1241_v4, %v1243_v27  ;;  %v1252_v34 = vsel %vm1246_vm1, %v1243_v27, %v1245_v19  ;;  %3881 = vmatmul.mubr.bf16.vlgmr.msra.gmra.mrb[0].mxu0 %v5031_v3  ;;  %vm3371_vm1 = vcmask 130048  }
 0x2c3   : > { %3622 = vmatprep.subr.bf16.mxu1 %v1252_v34  ;;  %3552 = vmatmul.mubr.bf16.gmra.mrb[4].mxu1 %v5036_v52  ;;  %v5064_v52 = vld [vmem:[%s7162_s1 + $0x21c] ss:$44 sps:$4 sm:$0xff]  }
 0x2c4   : > { %3623 = vmatpush1.bf16.msra.mxu1 %v1251_v23  ;;  %3890 = vmatprep.mubr.bf16.mxu0 %v5037_v55  ;;  %v1452_v55 = vrot.slane %v1447_v15, %v5449_v16 }
 0x2c5   : > { %v1321_v48 = vpop.permute.xlu0 %1320  ;;  %v1319_v45 = vpop.permute.xlu1 %1318  ;;  %3561 = vmatprep.mubr.bf16.mxu1 %v5040_v24  ;;  %v1462_v24 = vmul.bf16 %v6546_v40, %v1460_v33  ;;  %v1464_v40 = vmul.bf16 %v6566_v57, %v1460_v33  ;;  %v2838_v57 = vld [vmem:[%s7163_s2 + $0x18] sm:$0xff] }
 0x2c6   : > { %v1336_v61 = vsel %vm1334_vm4, %v1319_v45, %v1321_v48  ;;  %v5063_v48 = vld [vmem:[%s7162_s1 + $0x1d8] ss:$44 sps:$4 sm:$0xff]   ;;  %v1461_v16 = vmul.bf16 %v6486_v22, %v1452_v55  ;;  %v5070_v22 = vld [vmem:[%s7162_s1 + $0x274] ss:$44 sps:$4 sm:$0xff]  }
 0x2c7   : > { %3624 = vmatprep.subr.bf16.mxu1 %v1336_v61  ;;  %v5066_v61 = vld [vmem:[%s7162_s1 + $0x218] ss:$44 sps:$4 sm:$0xff]  }
 0x2c9   : > { %v1325_v60 = vpop.permute.xlu0 %1324  ;;  %v1317_v37 = vpop.permute.xlu1 %1316 }
 0x2ca   : > { %v1335_v43 = vsel %vm1334_vm4, %v1317_v37, %v1319_v45  ;;  %3891 = vmatmul.mubr.bf16.gmra.mrb[4].mxu0 %v5039_v20  ;;  %v5067_v45 = vld [vmem:[%s7162_s1 + $0x234] ss:$44 sps:$4 sm:$0xff]   ;;  %v1466_v37 = vmul.bf16 %v6658_v26, %v1460_v33  ;;  %v1465_v26 = vmul.bf16 %v6654_v18, %v1452_v55  ;;  %v2842_v18 = vld [vmem:[%s7163_s2 + $0x38] sm:$0xff] }
 0x2cb   : > { %3625 = vmatpush1.bf16.msra.mxu1 %v1335_v43  ;;  %3900 = vmatprep.mubr.bf16.mxu0 %v5043_v32  ;;  %v2835_v20 = vld [vmem:[%s7163_s2] sm:$0xff]  ;;  %v2836_v32 = vld [vmem:[%s7163_s2 + $0x8] sm:$0xff]  ;;  %v5069_v43 = vld [vmem:[%s7162_s1 + $0x230] ss:$44 sps:$4 sm:$0xff]  }
 0x2cc   : > { %3562 = vmatmul.mubr.bf16.gmra.mrb[8].mxu1 %v5042_v11  ;;  %2853 = vperm.xlu0 %4923, %v2835_v20   ;;  %v1463_v11 = vmul.bf16 %v6522_v36, %v1452_v55  ;;  %v5073_v36 = vld [vmem:[%s7162_s1 + $0x28c] ss:$44 sps:$4 sm:$0xff]   ;;  %v5082_v20 = vld [vmem:[%s7162_s1 + $0x68] ss:$44 sps:$4 sm:$0xff]  }
 0x2cd   : > { %v1323_v58 = vpop.permute.xlu0 %1322  ;;  %v1327_v44 = vpop.permute.xlu1 %1326  ;;  %3571 = vmatprep.mubr.bf16.mxu1 %v5046_v31  ;;  %2858 = vperm.xlu1 %4924, %v2836_v32   ;;  %v5084_v32 = vld [vmem:[%s7162_s1 + $0xc4] ss:$44 sps:$4 sm:$0xff]  }
 0x2ce   : > { %v1337_v0 = vsel %vm1334_vm4, %v1323_v58, %v1325_v60  ;;  %v1338_v6 = vsel %vm1334_vm4, %v1325_v60, %v1327_v44  ;;  %v2837_v60 = vld [vmem:[%s7163_s2 + $0x10] sm:$0xff]  ;;  %v2840_v44 = vld [vmem:[%s7163_s2 + $0x28] sm:$0xff] }
 0x2cf   : > { %3626 = vmatprep.subr.bf16.mxu1 %v1338_v6  ;;  %v5072_v6 = vld [vmem:[%s7162_s1 + $0x270] ss:$44 sps:$4 sm:$0xff]  }
 0x2d0   : > { %3627 = vmatpush1.bf16.msra.mxu1 %v1337_v0  ;;  %2868 = vperm.xlu0 %4923, %v2838_v57   ;;  %v2839_v0 = vld [vmem:[%s7163_s2 + $0x20] sm:$0xff] }
 0x2d1   : > { %v1333_v7 = vpop.permute.xlu0 %1332  ;;  %v1331_v56 = vpop.permute.xlu1 %1330  ;;  %2863 = vperm.xlu1 %4924, %v2837_v60   ;;  %v5086_v57 = vld [vmem:[%s7162_s1 + $0xc0] ss:$44 sps:$4 sm:$0xff]   ;;  %v5087_v60 = vld [vmem:[%s7162_s1 + $0xd8] ss:$44 sps:$4 sm:$0xff]  }
 0x2d2   : > { %v1340_v51 = vsel %vm1334_vm4, %v1331_v56, %v1333_v7  ;;  %3901 = vmatmul.mubr.bf16.gmra.mrb[8].mxu0 %v5045_v63 }
 0x2d3   : > { %3628 = vmatprep.subr.bf16.mxu1 %v1340_v51  ;;  %3910 = vmatprep.mubr.bf16.mxu0 %v5049_v25  ;;  %v5078_v25 = vld [vmem:[%s7162_s1 + $0x14] ss:$44 sps:$4 sm:$0xff]  }
 0x2d4   : > { %3572 = vmatmul.mubr.bf16.gmra.mrb[12].mxu1 %v5048_v53  ;;  %2878 = vperm.xlu0 %4923, %v2840_v44   ;;  %v5075_v51 = vld [vmem:[%s7162_s1 + $0x288] ss:$44 sps:$4 sm:$0xff]  }
 0x2d5   : > { %v1405_v42 = vpop.permute.xlu0 %1404  ;;  %v1329_v13 = vpop.permute.xlu1 %1328  ;;  %3581 = vmatprep.mubr.bf16.mxu1 %v5052_v10  ;;  %2873 = vperm.xlu1 %4924, %v2839_v0   ;;  %v5095_v44 = vld [vmem:[%s7162_s1 + $0x188] ss:$44 sps:$4 sm:$0xff]   ;;  %v5100_v0 = vld [vmem:[%s7162_s1 + $0x224] ss:$44 sps:$4 sm:$0xff]  }
 0x2d6   : > { %v1339_v41 = vsel %vm1334_vm4, %v1329_v13, %v1331_v56  ;;  %v2841_v56 = vld [vmem:[%s7163_s2 + $0x30] sm:$0xff]  ;;  %v2844_v13 = vld [vmem:[%s7163_s2 + $0x48] sm:$0xff] }
 0x2d7   : > { %3629 = vmatpush1.bf16.msra.mxu1 %v1339_v41  ;;  %v2843_v41 = vld [vmem:[%s7163_s2 + $0x40] sm:$0xff] }
 0x2d8   : > { %2888 = vperm.xlu0 %4923, %v2842_v18   ;;  %v5106_v18 = vld [vmem:[%s7162_s1 + $0x278] ss:$44 sps:$4 sm:$0xff]  }
 0x2d9   : > { %v1403_v47 = vpop.permute.xlu0 %1402  ;;  %v1407_v59 = vpop.permute.xlu1 %1406  ;;  %2883 = vperm.xlu1 %4924, %v2841_v56  }
 0x2da   : > { %v1421_v62 = vsel %vm1420_vm15, %v1403_v47, %v1405_v42  ;;  %v1422_v29 = vsel %vm1420_vm15, %v1405_v42, %v1407_v59  ;;  %3911 = vmatmul.mubr.bf16.gmra.mrb[12].mxu0 %v5051_v50  ;;  %v2846_v47 = vld [vmem:[%s7163_s2 + $0x58] sm:$0xff] }
 0x2db   : > { %3630 = vmatprep.subr.bf16.mxu1 %v1422_v29  ;;  %3920 = vmatprep.mubr.bf16.mxu0 %v5055_v30 }
 0x2dc   : > { %3631 = vmatpush1.bf16.msra.mxu1 %v1421_v62  ;;  %2898 = vperm.xlu0 %4923, %v2844_v13   ;;  %v2848_v62 = vld [vmem:[%s7163_s2 + $0x68] sm:$0xff] }
 0x2dd   : > { %v1413_v8 = vpop.permute.xlu0 %1412  ;;  %v1411_v9 = vpop.permute.xlu1 %1410  ;;  %3582 = vmatmul.mubr.bf16.gmra.mrb[16].mxu1 %v5054_v14  ;;  %2893 = vperm.xlu1 %4924, %v2843_v41   ;;  %v6982_v13 = vld [vmem:[#allocation3 + $0x8] sm:$0xff] }
 0x2de   : > { %v1424_v49 = vsel %vm1420_vm15, %v1411_v9, %v1413_v8  ;;  %3591 = vmatprep.mubr.bf16.mxu1 %v5058_v38  ;;  %v2847_v38 = vld [vmem:[%s7163_s2 + $0x60] sm:$0xff]  ;;  %v2849_v8 = vld [vmem:[%s7163_s2 + $0x70] sm:$0xff] }
 0x2df   : > { %3632 = vmatprep.subr.bf16.mxu1 %v1424_v49 }
 0x2e0   : > { %2908 = vperm.xlu0 %4923, %v2846_v47  }
 0x2e1   : > { %v1417_v12 = vpop.permute.xlu0 %1416  ;;  %v1409_v27 = vpop.permute.xlu1 %1408  ;;  %2903 = vperm.xlu1 %4924, %v2845_v21   ;;  %v4085_v21 = vld [vmem:[%s7165_s4 + $0x18] sm:$0xff] }
 0x2e2   : > { %v1423_v3 = vsel %vm1420_vm15, %v1409_v27, %v1411_v9  ;;  %3921 = vmatmul.mubr.bf16.gmra.mrb[16].mxu0 %v5057_v2 }
 0x2e3   : > { %3633 = vmatpush1.bf16.msra.mxu1 %v1423_v3  ;;  %3930 = vmatprep.mubr.bf16.mxu0 %v5061_v28 }
 0x2e4   : > { %2918 = vperm.xlu0 %4923, %v2848_v62  }
 0x2e5   : > { %v1415_v4 = vpop.permute.xlu0 %1414  ;;  %v1419_v19 = vpop.permute.xlu1 %1418  ;;  %3592 = vmatmul.mubr.bf16.gmra.mrb[20].mxu1 %v5060_v46  ;;  %2913 = vperm.xlu1 %4924, %v2847_v38  }
 0x2e6   : > { %v1425_v23 = vsel %vm1420_vm15, %v1415_v4, %v1417_v12  ;;  %v1426_v34 = vsel %vm1420_vm15, %v1417_v12, %v1419_v19  ;;  %3601 = vmatprep.mubr.bf16.mxu1 %v5064_v52 }
 0x2e7   : > { %3634 = vmatprep.subr.bf16.mxu1 %v1426_v34  ;;  %v5080_v34 = vld [vmem:[%s7162_s1 + $0x6c] ss:$44 sps:$4 sm:$0xff]  }
 0x2e8   : > { %3635 = vmatpush1.bf16.msra.mxu1 %v1425_v23  ;;  %2928 = vperm.xlu0 %4923, %v2850_v5   ;;  %v5076_v23 = vld [vmem:[%s7162_s1 + $0x10] ss:$44 sps:$4 sm:$0xff]  }
 0x2e9   : > { %3636 = vmatprep.subr.bf16.mxu1 %v1462_v24  ;;  %2923 = vperm.xlu1 %4924, %v2849_v8  }
 0x2ea   : > { %3931 = vmatmul.mubr.bf16.gmra.mrb[20].mxu0 %v5063_v48 }
 0x2eb   : > { %3940 = vmatprep.mubr.bf16.mxu0 %v5067_v45 }
 0x2ec   : > { %3637 = vmatpush1.bf16.msra.mxu1 %v1461_v16 }
 0x2ed   : > { %3638 = vmatprep.subr.bf16.mxu1 %v1464_v40  ;;  %3602 = vmatmul.mubr.bf16.gmra.mrb[24].mxu1 %v5066_v61  ;;  %v5079_v61 = vld [vmem:[%s7162_s1 + $0x28] ss:$44 sps:$4 sm:$0xff]  }
 0x2ee   : > { %v1526_v31 = vpop.permute.xlu0 %1525  ;;  %3611 = vmatprep.mubr.bf16.mxu1 %v5070_v22  ;;  %v5083_v22 = vld [vmem:[%s7162_s1 + $0x80] ss:$44 sps:$4 sm:$0xff]  }
 0x2ef   : > { %v1524_v58 = vpop.permute.xlu1 %1523 }
 0x2f0   : > { %3639 = vmatpush1.bf16.msra.mxu1 %v1463_v11  ;;  %v1540_v7 = vsel %vm1379_vm14, %v1524_v58, %v1526_v31  ;;  %v5088_v11 = vld [vmem:[%s7162_s1 + $0x11c] ss:$44 sps:$4 sm:$0xff]   ;;  %v5092_v31 = vld [vmem:[%s7162_s1 + $0x174] ss:$44 sps:$4 sm:$0xff]  }
 0x2f1   : > { %3640 = vmatprep.subr.bf16.mxu1 %v1466_v37  ;;  %v5090_v37 = vld [vmem:[%s7162_s1 + $0x118] ss:$44 sps:$4 sm:$0xff]  }
 0x2f2   : > { %v1530_v63 = vpop.permute.xlu0 %1529  ;;  %3941 = vmatmul.mubr.bf16.gmra.mrb[24].mxu0 %v5069_v43  ;;  %v5091_v43 = vld [vmem:[%s7162_s1 + $0x130] ss:$44 sps:$4 sm:$0xff]  }
 0x2f3   : > { %v1522_v53 = vpop.permute.xlu1 %1521  ;;  %3950 = vmatprep.mubr.bf16.mxu0 %v5073_v36  ;;  %v5096_v36 = vld [vmem:[%s7162_s1 + $0x1cc] ss:$44 sps:$4 sm:$0xff]  }
 0x2f4   : > { %3641 = vmatpush1.bf16.msra.mxu1 %v1465_v26  ;;  %v1539_v39 = vsel %vm1379_vm14, %v1522_v53, %v1524_v58  ;;  %v5094_v58 = vld [vmem:[%s7162_s1 + $0x170] ss:$44 sps:$4 sm:$0xff]   ;;  %v5098_v26 = vld [vmem:[%s7162_s1 + $0x1c8] ss:$44 sps:$4 sm:$0xff]   ;;  %v5103_v53 = vld [vmem:[%s7162_s1 + $0x238] ss:$44 sps:$4 sm:$0xff]  }
 0x2f5   : > { %3642 = vmatprep.subr.bf16.mxu1 %v1540_v7  ;;  %3612 = vmatmul.mubr.bf16.gmra.mrb[28].mxu1 %v5072_v6  ;;  %v5099_v6 = vld [vmem:[%s7162_s1 + $0x1e0] ss:$44 sps:$4 sm:$0xff]   ;;  %v5107_v7 = vld [vmem:[%s7162_s1 + $0x290] ss:$44 sps:$4 sm:$0xff]  }
 0x2f6   : > { %v1528_v10 = vpop.permute.xlu0 %1527  ;;  %3654 = vmatprep.mubr.bf16.mxu1 %v5078_v25  ;;  %v5104_v25 = vld [vmem:[%s7162_s1 + $0x27c] ss:$44 sps:$4 sm:$0xff]  }
 0x2f7   : > { %v1532_v42 = vpop.permute.xlu1 %1531  ;;  %v1541_v30 = vsel %vm1379_vm14, %v1528_v10, %v1530_v63 }
 0x2f8   : > { %3643 = vmatpush1.bf16.msra.mxu1 %v1539_v39  ;;  %v1542_v35 = vsel %vm1379_vm14, %v1530_v63, %v1532_v42  ;;  %v5102_v63 = vld [vmem:[%s7162_s1 + $0x220] ss:$44 sps:$4 sm:$0xff]  }
 0x2f9   : > { %3644 = vmatprep.subr.bf16.mxu1 %v1542_v35  ;;  %v4082_v39 = vld [vmem:[%s7165_s4] sm:$0xff] }
 0x2fa   : > { %v1538_v50 = vpop.permute.xlu0 %1537  ;;  %3951 = vmatmul.mubr.bf16.gmra.mrb[28].mxu0 %v5075_v51  ;;  %v6977_v51 = vld [vmem:[#allocation3] sm:$0xff] }
 0x2fb   : > { %v1536_v17 = vpop.permute.xlu1 %1535  ;;  %3993 = vmatprep.mubr.bf16.mxu0 %v5307_v1  ;;  %v4090_v47 = vmul.f32 %v4082_v39, %v6977_v51 }
 0x2fc   : > { %3645 = vmatpush1.bf16.msra.mxu1 %v1541_v30  ;;  %v1544_v59 = vsel %vm1379_vm14, %v1536_v17, %v1538_v50  ;;  %v6987_v50 = vld [vmem:[#allocation3 + $0x10] sm:$0xff] }
 0x2fd   : > { %3646 = vmatprep.subr.bf16.mxu1 %v1544_v59  ;;  %v4084_v30 = vld [vmem:[%s7165_s4 + $0x10] sm:$0xff]  ;;  %v6993_v59 = vld [vmem:[#allocation3 + $0x18] sm:$0xff] }
 0x2ff   : > { %v1534_v14 = vpop.permute.xlu1 %1533 }
 0x300   : > { %v1543_v29 = vsel %vm1379_vm14, %v1534_v14, %v1536_v17 }
 0x301   : > { %3647 = vmatpush1.bf16.msra.mxu1 %v1543_v29 }
 0x316   : > { %v1612_v9 = vpop.permute.xlu1 %1611 }
 0x317   : > { %v1610_v54 = vpop.permute.xlu0 %1609 }
 0x318   : > { %v1626_v49 = vsel %vm1293_vm13, %v1610_v54, %v1612_v9 }
 0x319   : > { %3648 = vmatprep.subr.bf16.mxu1 %v1626_v49 }
 0x31a   : > { %v1616_v2 = vpop.permute.xlu1 %1615 }
 0x31b   : > { %v1608_v28 = vpop.permute.xlu0 %1607 }
 0x31c   : > { %v1625_v15 = vsel %vm1293_vm13, %v1608_v28, %v1610_v54  ;;  %v4092_v54 = vmul.f32 %v4084_v30, %v6987_v50 }
 0x31d   : > { %3649 = vmatpush1.bf16.msra.mxu1 %v1625_v15  ;;  %v4093_v15 = vmul.f32 %v4085_v21, %v6993_v59 }
 0x31e   : > { %v1614_v12 = vpop.permute.xlu1 %1613 }
 0x31f   : > { %v1618_v27 = vpop.permute.xlu0 %1617  ;;  %v1627_v46 = vsel %vm1293_vm13, %v1614_v12, %v1616_v2 }
 0x320   : > { %v1628_v33 = vsel %vm1293_vm13, %v1616_v2, %v1618_v27 }
 0x321   : > { %3650 = vmatprep.subr.bf16.mxu1 %v1628_v33 }
 0x322   : > { %3651 = vmatpush1.bf16.msra.mxu1 %v1627_v46  ;;  %v1624_v3 = vpop.permute.xlu1 %1623 }
 0x323   : > { %v1622_v52 = vpop.permute.xlu0 %1621 }
 0x324   : > { %v1630_v55 = vsel %vm1293_vm13, %v1622_v52, %v1624_v3 }
 0x325   : > { %3652 = vmatprep.subr.bf16.mxu1 %v1630_v55 }
 0x326   : > { %v2556_v4 = vpop.permute.xlu1 %2555 }
 0x327   : > { %v1620_v19 = vpop.permute.xlu0 %1619 }
 0x328   : > { %v1629_v24 = vsel %vm1293_vm13, %v1620_v19, %v1622_v52  ;;  %v4086_v19 = vld [vmem:[%s7165_s4 + $0x20] sm:$0xff] }
 0x329   : > { %3653 = vmatpush1.bf16.msra.mxu1 %v1629_v24 }
 0x32a   : > { %v2554_v48 = vpop.permute.xlu1 %2553 }
 0x32b   : > { %v2558_v45 = vpop.permute.xlu0 %2557  ;;  %v2563_v40 = vsel %vm344_vm0, %v2554_v48, %v2556_v4  ;;  %v7006_v48 = vld [vmem:[#allocation3 + $0x28] sm:$0xff] }
 0x32c   : > { %3655 = vmatmul.mubr.bf16.vlgmr.msra.gmra.mrb[0].mxu1 %v5076_v23  ;;  %v2564_v16 = vsel %vm344_vm0, %v2556_v4, %v2558_v45  ;;  %v7001_v4 = vld [vmem:[#allocation3 + $0x20] sm:$0xff]  ;;  %v4087_v45 = vld [vmem:[%s7165_s4 + $0x28] sm:$0xff] }
 0x32d   : > { %3961 = vmatprep.subr.bf16.mxu0 %v2564_v16  ;;  %3664 = vmatprep.mubr.bf16.mxu1 %v5080_v34 }
 0x32e   : > { %3962 = vmatpush1.bf16.msra.mxu0 %v2563_v40 }
 0x331   : > { %4621 = vmatmul.mubr.msk.bf16.vlgmr.msra.gmra.mrb[0].mxu0 %vm3371_vm1, %v5079_v61 }
 0x332   : > { %4003 = vmatprep.mubr.bf16.mxu0 %v5307_v1 }
 0x334   : > { %3665 = vmatmul.mubr.bf16.gmra.mrb[4].mxu1 %v5082_v20 }
 0x335   : > { %3674 = vmatprep.mubr.bf16.mxu1 %v5084_v32  ;;  %v7011_v32 = vld [vmem:[#allocation3 + $0x30] sm:$0xff] }
 0x339   : > { %4622 = vmatmul.mubr.msk.bf16.gmra.mrb[4].mxu0 %vm3371_vm1, %v5083_v22  ;;  %v4088_v22 = vld [vmem:[%s7165_s4 + $0x30] sm:$0xff] }
 0x33a   : > { %4013 = vmatprep.mubr.bf16.mxu0 %v5307_v1 }
 0x33c   : > { %3675 = vmatmul.mubr.bf16.gmra.mrb[8].mxu1 %v5086_v57 }
 0x33d   : > { %3684 = vmatprep.mubr.bf16.mxu1 %v5088_v11 }
 0x341   : > { %4623 = vmatmul.mubr.msk.bf16.gmra.mrb[8].mxu0 %vm3371_vm1, %v5087_v60  ;;  %v4094_v60 = vmul.f32 %v4086_v19, %v7001_v4 }
 0x342   : > { %4023 = vmatprep.mubr.bf16.mxu0 %v5307_v1 }
 0x344   : > { %3685 = vmatmul.mubr.bf16.gmra.mrb[12].mxu1 %v5090_v37  ;;  %v7017_v37 = vld [vmem:[#allocation3 + $0x38] sm:$0xff] }
 0x345   : > { %3694 = vmatprep.mubr.bf16.mxu1 %v5092_v31  ;;  %v4089_v31 = vld [vmem:[%s7165_s4 + $0x38] sm:$0xff] }
 0x349   : > { %4624 = vmatmul.mubr.msk.bf16.gmra.mrb[12].mxu0 %vm3371_vm1, %v5091_v43 }
 0x34a   : > { %4033 = vmatprep.mubr.bf16.mxu0 %v5307_v1 }
 0x34b   : > { %v2854_v35 = vpop.permute.xlu0 %2853 }
 0x34c   : > { %3695 = vmatmul.mubr.bf16.gmra.mrb[16].mxu1 %v5094_v58  ;;  %v2859_v62 = vpop.permute.xlu1 %2858 }
 0x34d   : > { %3704 = vmatprep.mubr.bf16.mxu1 %v5096_v36 }
 0x34f   : > { %v2869_v36 = vpop.permute.xlu0 %2868 }
 0x350   : > { %v2864_v61 = vpop.permute.xlu1 %2863 }
 0x351   : > { %4625 = vmatmul.mubr.msk.bf16.gmra.mrb[16].mxu0 %vm3371_vm1, %v5095_v44 }
 0x352   : > { %4043 = vmatprep.mubr.bf16.mxu0 %v5307_v1 }
 0x354   : > { %3705 = vmatmul.mubr.bf16.gmra.mrb[20].mxu1 %v5098_v26  ;;  %v4095_v26 = vmul.f32 %v4087_v45, %v7006_v48 }
 0x355   : > { %3714 = vmatprep.mubr.bf16.mxu1 %v5100_v0 }
 0x359   : > { %4626 = vmatmul.mubr.msk.bf16.gmra.mrb[20].mxu0 %vm3371_vm1, %v5099_v6 }
 0x35a   : > { %4053 = vmatprep.mubr.bf16.mxu0 %v5307_v1 }
 0x35c   : > { %3715 = vmatmul.mubr.bf16.gmra.mrb[24].mxu1 %v5102_v63 }
 0x35d   : > { %3724 = vmatprep.mubr.bf16.mxu1 %v5104_v25  ;;  %v4096_v25 = vmul.f32 %v4088_v22, %v7011_v32 }
 0x361   : > { %4627 = vmatmul.mubr.msk.bf16.gmra.mrb[24].mxu0 %vm3371_vm1, %v5103_v53 }
 0x362   : > { %4063 = vmatprep.mubr.bf16.mxu0 %v5307_v1  ;;  %v4083_v1 = vld [vmem:[%s7165_s4 + $0x8] sm:$0xff] }
 0x363   : > { %v4091_v38 = vmul.f32 %v4083_v1, %v6982_v13 }
 0x364   : > { %3725 = vmatmul.mubr.bf16.gmra.mrb[28].mxu1 %v5106_v18 }
 0x369   : > { %4628 = vmatmul.mubr.msk.bf16.gmra.mrb[28].mxu0 %vm3371_vm1, %v5107_v7 }
 0x3ff   : > { %v3656_v56 = vpop.f32.mrb[0].mxu1 }
 0x400   : > { %v3658_v10 = vpop.f32.mrb[1].mxu1  ;;  %v4671_v17 = vadd.f32 %v3656_v56, %v2854_v35  ;;  %v4097_v56 = vmul.f32 %v4089_v31, %v7017_v37 }
 0x401   : > { %v3660_v42 = vpop.f32.mrb[2].mxu1  ;;  %v4673_v14 = vadd.f32 %v3658_v10, %v2854_v35 }
 0x402   : > { %v3662_v41 = vpop.f32.mrb[3].mxu1  ;;  %v4675_v5 = vadd.f32 %v3660_v42, %v2859_v62 }
 0x403   : > { %v4677_v49 = vadd.f32 %v3662_v41, %v2859_v62  ;;  %v4638_v62 = vld [vmem:[%s7165_s4 + $0x48] sm:$0xff] }
 0x404   : > { %v3995_v29 = vpop.f32.mrb[0].mxu0 }
 0x405   : > { %v4672_v8 = vadd.f32 %v4671_v17, %v3995_v29  ;;  %v3997_v9 = vpop.f32.mrb[1].mxu0  ;;  %v4637_v17 = vld [vmem:[%s7165_s4 + $0x40] sm:$0xff] }
 0x406   : > { %v4674_v2 = vadd.f32 %v4673_v14, %v3997_v9  ;;  %v3999_v28 = vpop.f32.mrb[2].mxu0  ;;  %v4639_v9 = vld [vmem:[%s7165_s4 + $0x50] sm:$0xff] }
 0x407   : > { %v4098_v12 = vadd.f32 %v4672_v8, %v4090_v47  ;;  %v4676_v27 = vadd.f32 %v4675_v5, %v3999_v28  ;;  %v3666_v33 = vpop.f32.mrb[4].mxu1  ;;  %v4001_v46 = vpop.f32.mrb[3].mxu0  ;;  %v4640_v28 = vld [vmem:[%s7165_s4 + $0x58] sm:$0xff] }
 0x408   : > { %v4099_v3 = vadd.f32 %v4674_v2, %v4091_v38  ;;  %v4678_v52 = vadd.f32 %v4677_v49, %v4001_v46  ;;  %v3668_v55 = vpop.f32.mrb[5].mxu1  ;;  %v4679_v11 = vadd.f32 %v3666_v33, %v2864_v61  ;;  %v2874_v5 = vpop.permute.xlu1 %2873  ;;  %v4163_v2 = vmul.f32 %v4637_v17, %v6977_v51 }
 0x409   : > { %v4629_v24 = vmul.f32 -1.442695, %v4098_v12  ;;  %v4100_v23 = vadd.f32 %v4676_v27, %v4092_v54  ;;  %v3670_v34 = vpop.f32.mrb[6].mxu1  ;;  %v4681_v58 = vadd.f32 %v3668_v55, %v2864_v61  ;;  %v2879_v27 = vpop.permute.xlu0 %2878  ;;  %v4164_v46 = vmul.f32 %v4638_v62, %v6982_v13 }
 0x40a   : > { %v4630_v16 = vmul.f32 -1.442695, %v4099_v3  ;;  %v4101_v40 = vadd.f32 %v4678_v52, %v4093_v15  ;;  %v3672_v20 = vpop.f32.mrb[7].mxu1  ;;  %v4683_v0 = vadd.f32 %v3670_v34, %v2869_v36  ;;  %v4166_v61 = vmul.f32 %v4640_v28, %v6993_v59 }
 0x40b   : > { %5108 = vpow2.f32 %v4629_v24  ;;  %v4631_v57 = vmul.f32 -1.442695, %v4100_v23  ;;  %v4685_v53 = vadd.f32 %v3672_v20, %v2869_v36  ;;  %v4165_v24 = vmul.f32 %v4639_v9, %v6987_v50  ;;  %v4641_v20 = vld [vmem:[%s7165_s4 + $0x60] sm:$0xff] }
 0x40c   : > { %5110 = vpow2.f32 %v4630_v16  ;;  %v4632_v43 = vmul.f32 -1.442695, %v4101_v40  ;;  %v4005_v44 = vpop.f32.mrb[4].mxu0 }
 0x40d   : > { %5112 = vpow2.f32 %v4631_v57  ;;  %v4680_v6 = vadd.f32 %v4679_v11, %v4005_v44  ;;  %v4007_v63 = vpop.f32.mrb[5].mxu0  ;;  %v2889_v62 = vpop.permute.xlu0 %2888 }
 0x40e   : > { %v4682_v18 = vadd.f32 %v4681_v58, %v4007_v63  ;;  %v4009_v7 = vpop.f32.mrb[6].mxu0  ;;  %5114 = vpow2.f32 %v4632_v43  ;;  %v4642_v58 = vld [vmem:[%s7165_s4 + $0x68] sm:$0xff] }
 0x40f   : > { %v4102_v10 = vadd.f32 %v4680_v6, %v4094_v60  ;;  %v4684_v39 = vadd.f32 %v4683_v0, %v4009_v7  ;;  %v3676_v42 = vpop.f32.mrb[8].mxu1  ;;  %v4011_v1 = vpop.f32.mrb[7].mxu0  ;;  %v4643_v6 = vld [vmem:[%s7165_s4 + $0x70] sm:$0xff]  ;;  %v4167_v7 = vmul.f32 %v4641_v20, %v7001_v4 }
 0x410   : > { %v4103_v35 = vadd.f32 %v4682_v18, %v4095_v26  ;;  %v4686_v41 = vadd.f32 %v4685_v53, %v4011_v1  ;;  %v3678_v30 = vpop.f32.mrb[9].mxu1  ;;  %v4687_v49 = vadd.f32 %v3676_v42, %v2874_v5  ;;  %v4168_v1 = vmul.f32 %v4642_v58, %v7006_v48 }
 0x411   : > { %v4633_v47 = vmul.f32 -1.442695, %v4102_v10  ;;  %v4104_v21 = vadd.f32 %v4684_v39, %v4096_v25  ;;  %v3680_v14 = vpop.f32.mrb[10].mxu1  ;;  %v4689_v12 = vadd.f32 %v3678_v30, %v2874_v5  ;;  %v2884_v39 = vpop.permute.xlu1 %2883  ;;  %v4169_v17 = vmul.f32 %v4643_v6, %v7011_v32 }
 0x412   : > { %v4634_v29 = vmul.f32 -1.442695, %v4103_v35  ;;  %v4105_v38 = vadd.f32 %v4686_v41, %v4097_v56  ;;  %v3682_v8 = vpop.f32.mrb[11].mxu1  ;;  %v4691_v52 = vadd.f32 %v3680_v14, %v2879_v27  ;;  %v4644_v35 = vld [vmem:[%s7165_s4 + $0x78] sm:$0xff] }
 0x413   : > { %5116 = vpow2.f32 %v4633_v47  ;;  %v4635_v54 = vmul.f32 -1.442695, %v4104_v21  ;;  %v4693_v45 = vadd.f32 %v3682_v8, %v2879_v27 }
 0x414   : > { %5118 = vpow2.f32 %v4634_v29  ;;  %v4636_v15 = vmul.f32 -1.442695, %v4105_v38  ;;  %v4015_v33 = vpop.f32.mrb[8].mxu0 }
 0x415   : > { %v5109_v3 = vpop.eup %5108  ;;  %5120 = vpow2.f32 %v4635_v54  ;;  %v4688_v55 = vadd.f32 %v4687_v49, %v4015_v33  ;;  %v4017_v19 = vpop.f32.mrb[9].mxu0  ;;  %v4170_v54 = vmul.f32 %v4644_v35, %v7017_v37 }
 0x416   : > { %v5111_v23 = vpop.eup %5110  ;;  %v4130_v34 = vadd.f32 1.0, %v5109_v3  ;;  %v4690_v16 = vadd.f32 %v4689_v12, %v4017_v19  ;;  %v4019_v40 = vpop.f32.mrb[10].mxu0  ;;  %5122 = vpow2.f32 %v4636_v15 }
 0x417   : > { %v5113_v22 = vpop.eup %5112  ;;  %v4131_v57 = vadd.f32 1.0, %v5111_v23  ;;  %v4171_v11 = vadd.f32 %v4688_v55, %v4163_v2  ;;  %v4692_v60 = vadd.f32 %v4691_v52, %v4019_v40  ;;  %v3686_v31 = vpop.f32.mrb[12].mxu1 }
 0x418   : > { %v4021_v43 = vpop.f32.mrb[11].mxu0  ;;  %v4132_v36 = vadd.f32 1.0, %v5113_v22  ;;  %v4172_v44 = vadd.f32 %v4690_v16, %v4164_v46  ;;  %v3688_v0 = vpop.f32.mrb[13].mxu1  ;;  %5124 = vrcp.f32 %v4130_v34  ;;  %v4695_v30 = vadd.f32 %v3686_v31, %v2884_v39 }
 0x419   : > { %v4694_v26 = vadd.f32 %v4693_v45, %v4021_v43  ;;  %v5115_v63 = vpop.eup %5114  ;;  %v4645_v25 = vmul.f32 -1.442695, %v4171_v11  ;;  %v4173_v53 = vadd.f32 %v4692_v60, %v4165_v24  ;;  %v3690_v18 = vpop.f32.mrb[14].mxu1  ;;  %5126 = vrcp.f32 %v4131_v57 }
 0x41a   : > { %v4646_v56 = vmul.f32 -1.442695, %v4172_v44  ;;  %v3692_v42 = vpop.f32.mrb[15].mxu1  ;;  %5128 = vrcp.f32 %v4132_v36  ;;  %v4133_v47 = vadd.f32 1.0, %v5115_v63  ;;  %v4697_v14 = vadd.f32 %v3688_v0, %v2884_v39  ;;  %v2894_v57 = vpop.permute.xlu1 %2893 }
 0x41b   : > { %v4174_v10 = vadd.f32 %v4694_v26, %v4166_v61  ;;  %v4647_v41 = vmul.f32 -1.442695, %v4173_v53  ;;  %5130 = vpow2.f32 %v4645_v25  ;;  %v4699_v5 = vadd.f32 %v3690_v18, %v2889_v62  ;;  %v2899_v26 = vpop.permute.xlu0 %2898 }
 0x41c   : > { %v4025_v29 = vpop.f32.mrb[12].mxu0  ;;  %5132 = vpow2.f32 %v4646_v56  ;;  %v4701_v28 = vadd.f32 %v3692_v42, %v2889_v62 }
 0x41d   : > { %v4648_v21 = vmul.f32 -1.442695, %v4174_v10  ;;  %v5117_v38 = vpop.eup %5116  ;;  %v4696_v8 = vadd.f32 %v4695_v30, %v4025_v29  ;;  %v4027_v9 = vpop.f32.mrb[13].mxu0  ;;  %5134 = vpow2.f32 %v4647_v41 }
 0x41e   : > { %v5119_v49 = vpop.eup %5118  ;;  %v4134_v2 = vadd.f32 1.0, %v5117_v38  ;;  %v4698_v15 = vadd.f32 %v4697_v14, %v4027_v9  ;;  %v4029_v12 = vpop.f32.mrb[14].mxu0 }
 0x41f   : > { %v5121_v27 = vpop.eup %5120  ;;  %v4135_v33 = vadd.f32 1.0, %v5119_v49  ;;  %5136 = vpow2.f32 %v4648_v21  ;;  %v4175_v46 = vadd.f32 %v4696_v8, %v4167_v7  ;;  %v4700_v3 = vadd.f32 %v4699_v5, %v4029_v12  ;;  %v3696_v52 = vpop.f32.mrb[16].mxu1 }
 0x420   : > { %v4031_v55 = vpop.f32.mrb[15].mxu0  ;;  %5138 = vrcp.f32 %v4133_v47  ;;  %v4136_v19 = vadd.f32 1.0, %v5121_v27  ;;  %v4176_v24 = vadd.f32 %v4698_v15, %v4168_v1  ;;  %v3698_v34 = vpop.f32.mrb[17].mxu1  ;;  %v4703_v43 = vadd.f32 %v3696_v52, %v2894_v57 }
 0x421   : > { %v4702_v23 = vadd.f32 %v4701_v28, %v4031_v55  ;;  %5140 = vrcp.f32 %v4134_v2  ;;  %v4649_v45 = vmul.f32 -1.442695, %v4175_v46  ;;  %v4177_v16 = vadd.f32 %v4700_v3, %v4169_v17  ;;  %v3700_v40 = vpop.f32.mrb[18].mxu1  ;;  %v7057_v61 = vpop.eup %5122 }
 0x422   : > { %5142 = vrcp.f32 %v4135_v33  ;;  %v4650_v20 = vmul.f32 -1.442695, %v4176_v24  ;;  %v3702_v11 = vpop.f32.mrb[19].mxu1  ;;  %v7059_v60 = vpop.eup %5124  ;;  %v4705_v44 = vadd.f32 %v3698_v34, %v2894_v57  ;;  %v4707_v63 = vadd.f32 %v3700_v40, %v2899_v26 }
 0x423   : > { %v4178_v22 = vadd.f32 %v4702_v23, %v4170_v54  ;;  %5144 = vrcp.f32 %v4136_v19  ;;  %v4651_v31 = vmul.f32 -1.442695, %v4177_v16  ;;  %v7061_v58 = vpop.eup %5126  ;;  %v4709_v7 = vadd.f32 %v3702_v11, %v2899_v26  ;;  %v2904_v8 = vpop.permute.xlu1 %2903 }
 0x424   : > { %5146 = vpow2.f32 %v4649_v45  ;;  %v4035_v0 = vpop.f32.mrb[16].mxu0  ;;  %v7063_v6 = vpop.eup %5128 }
 0x425   : > { %v4652_v36 = vmul.f32 -1.442695, %v4178_v22  ;;  %5148 = vpow2.f32 %v4650_v20  ;;  %v4704_v25 = vadd.f32 %v4703_v43, %v4035_v0  ;;  %v4037_v53 = vpop.f32.mrb[17].mxu0  ;;  %v5131_v18 = vpop.eup %5130 }
 0x426   : > { %5150 = vpow2.f32 %v4651_v31  ;;  %v4706_v56 = vadd.f32 %v4705_v44, %v4037_v53  ;;  %v4039_v10 = vpop.f32.mrb[18].mxu0  ;;  %v5133_v39 = vpop.eup %5132  ;;  %v4203_v42 = vadd.f32 1.0, %v5131_v18 }
 0x427   : > { %5152 = vpow2.f32 %v4652_v36  ;;  %v4708_v1 = vadd.f32 %v4707_v63, %v4039_v10  ;;  %v3706_v35 = vpop.f32.mrb[20].mxu1  ;;  %v4041_v41 = vpop.f32.mrb[19].mxu0  ;;  %v4204_v17 = vadd.f32 1.0, %v5133_v39 }
 0x428   : > { %v5135_v30 = vpop.eup %5134  ;;  %5154 = vtanh.f32 %v4704_v25  ;;  %v4710_v47 = vadd.f32 %v4709_v7, %v4041_v41  ;;  %v3708_v21 = vpop.f32.mrb[21].mxu1  ;;  %v4711_v49 = vadd.f32 %v3706_v35, %v2904_v8 }
 0x429   : > { %v5137_v14 = vpop.eup %5136  ;;  %5156 = vrcp.f32 %v4203_v42  ;;  %v4205_v62 = vadd.f32 1.0, %v5135_v30  ;;  %v3710_v29 = vpop.f32.mrb[22].mxu1  ;;  %v4713_v28 = vadd.f32 %v3708_v21, %v2904_v8 }
 0x42a   : > { %v7065_v38 = vpop.eup %5138  ;;  %5158 = vrcp.f32 %v4204_v17  ;;  %v4206_v5 = vadd.f32 1.0, %v5137_v14  ;;  %v3712_v9 = vpop.f32.mrb[23].mxu1 }
 0x42b   : > { %v7067_v54 = vpop.eup %5140  ;;  %5160 = vrcp.f32 %v4205_v62  ;;  %v2909_v15 = vpop.permute.xlu0 %2908 }
 0x42c   : > { %v7069_v2 = vpop.eup %5142  ;;  %5162 = vrcp.f32 %v4206_v5  ;;  %v4045_v12 = vpop.f32.mrb[20].mxu0  ;;  %v4715_v33 = vadd.f32 %v3710_v29, %v2909_v15  ;;  %v4717_v55 = vadd.f32 %v3712_v9, %v2909_v15 }
 0x42d   : > { %v7071_v27 = vpop.eup %5144  ;;  %5164 = vtanh.f32 %v4706_v56  ;;  %v4712_v46 = vadd.f32 %v4711_v49, %v4045_v12  ;;  %v4047_v3 = vpop.f32.mrb[21].mxu0  ;;  %v4137_v56 = vadd.f32 1.0, %v7057_v61 }
 0x42e   : > { %v5147_v52 = vpop.eup %5146  ;;  %5166 = vtanh.f32 %v4708_v1  ;;  %v4714_v19 = vadd.f32 %v4713_v28, %v4047_v3  ;;  %v4049_v24 = vpop.f32.mrb[22].mxu0 }
 0x42f   : > { %v5149_v23 = vpop.eup %5148  ;;  %v4207_v34 = vadd.f32 1.0, %v5147_v52  ;;  %5168 = vtanh.f32 %v4710_v47  ;;  %v4716_v45 = vadd.f32 %v4715_v33, %v4049_v24  ;;  %v3716_v16 = vpop.f32.mrb[24].mxu1  ;;  %v4653_v47 = vld [vmem:[%s7165_s4 + $0x80] sm:$0xff]  ;;  %v4654_v52 = vld [vmem:[%s7165_s4 + $0x88] sm:$0xff] }
 0x430   : > { %v4051_v40 = vpop.f32.mrb[23].mxu0  ;;  %v5151_v20 = vpop.eup %5150  ;;  %v4208_v22 = vadd.f32 1.0, %v5149_v23  ;;  %5170 = vtanh.f32 %v4712_v46 }
 0x431   : > { %v4718_v57 = vadd.f32 %v4717_v55, %v4051_v40  ;;  %v3718_v11 = vpop.f32.mrb[25].mxu1  ;;  %v5153_v31 = vpop.eup %5152  ;;  %5172 = vrcp.f32 %v4207_v34  ;;  %v4209_v43 = vadd.f32 1.0, %v5151_v20 }
 0x432   : > { %v3720_v36 = vpop.f32.mrb[26].mxu1  ;;  %v5155_v44 = vpop.eup %5154  ;;  %5174 = vrcp.f32 %v4208_v22  ;;  %v4210_v26 = vadd.f32 1.0, %v5153_v31 }
 0x433   : > { %v2914_v0 = vpop.permute.xlu1 %2913  ;;  %v3722_v63 = vpop.f32.mrb[27].mxu1  ;;  %5176 = vrcp.f32 %v4209_v43  ;;  %v4243_v18 = vmul.f32 %v5155_v44, %v7059_v60 }
 0x434   : > { %v5157_v25 = vpop.eup %5156  ;;  %v4719_v53 = vadd.f32 %v3716_v16, %v2914_v0  ;;  %5178 = vrcp.f32 %v4210_v26  ;;  %v4721_v10 = vadd.f32 %v3718_v11, %v2914_v0  ;;  %v2919_v39 = vpop.permute.xlu0 %2918 }
 0x435   : > { %v5159_v7 = vpop.eup %5158  ;;  %v4055_v42 = vpop.f32.mrb[24].mxu0  ;;  %v4227_v1 = vmul.f32 %v5157_v25, %v6977_v51  ;;  %5180 = vtanh.f32 %v4714_v19  ;;  %v4723_v41 = vadd.f32 %v3720_v36, %v2919_v39  ;;  %v4725_v30 = vadd.f32 %v3722_v63, %v2919_v39 }
 0x436   : > { %v5161_v35 = vpop.eup %5160  ;;  %v4720_v17 = vadd.f32 %v4719_v53, %v4055_v42  ;;  %v4057_v21 = vpop.f32.mrb[25].mxu0  ;;  %5182 = vtanh.f32 %v4716_v45  ;;  %v4228_v62 = vmul.f32 %v5159_v7, %v6982_v13 }
 0x437   : > { %v5163_v60 = vpop.eup %5162  ;;  %v7079_v14 = vadd.f32 %v4243_v18, %v4227_v1  ;;  %v4722_v61 = vadd.f32 %v4721_v10, %v4057_v21  ;;  %v4059_v29 = vpop.f32.mrb[26].mxu0  ;;  %5184 = vtanh.f32 %v4718_v57  ;;  %v4229_v8 = vmul.f32 %v5161_v35, %v6987_v50  ;;  %v4657_v10 = vld [vmem:[%s7165_s4 + $0xa0] sm:$0xff] }
 0x438   : > { %v5165_v5 = vpop.eup %5164  ;;  %v4724_v51 = vadd.f32 %v4723_v41, %v4059_v29  ;;  %v3726_v9 = vpop.f32.mrb[28].mxu1  ;;  %v4230_v46 = vmul.f32 %v5163_v60, %v6993_v59  ;;  %5186 = vrcp.f32 %v4137_v56 }
 0x439   : > { %v4061_v49 = vpop.f32.mrb[27].mxu0  ;;  %v5167_v28 = vpop.eup %5166  ;;  %v4268_v15 = vmul.f32 %v4653_v47, %v7079_v14  ;;  %4356 = vst [vmem:[#allocation3] sm:$0xff] %v7079_v14  ;;  %v4244_v12 = vmul.f32 %v5165_v5, %v7061_v58  ;;  %v4655_v58 = vld [vmem:[%s7165_s4 + $0x90] sm:$0xff] }
 0x43a   : > { %v4726_v33 = vadd.f32 %v4725_v30, %v4061_v49  ;;  %v3728_v3 = vpop.f32.mrb[29].mxu1  ;;  %v5169_v13 = vpop.eup %5168  ;;  %v4245_v50 = vmul.f32 %v5167_v28, %v7063_v6  ;;  %v4656_v6 = vld [vmem:[%s7165_s4 + $0x98] sm:$0xff] }
 0x43b   : > { %v3730_v55 = vpop.f32.mrb[30].mxu1  ;;  %v5171_v19 = vpop.eup %5170  ;;  %v4276_v24 = vadd.f32 %v4720_v17, %v4268_v15  ;;  %v7091_v23 = vadd.f32 %v4244_v12, %v4228_v62  ;;  %v4246_v59 = vmul.f32 %v5169_v13, %v7065_v38  ;;  %v4659_v12 = vld [vmem:[%s7165_s4 + $0xb0] sm:$0xff] }
 0x43c   : > { %v2924_v34 = vpop.permute.xlu1 %2923  ;;  %v3732_v45 = vpop.f32.mrb[31].mxu1  ;;  %v7097_v40 = vadd.f32 %v4245_v50, %v4229_v8  ;;  %v4247_v22 = vmul.f32 %v5171_v19, %v7067_v54 }
 0x43d   : > { %v5173_v16 = vpop.eup %5172  ;;  %v4727_v20 = vadd.f32 %v3726_v9, %v2924_v34  ;;  %v4661_v11 = vmul.f32 -1.442695, %v4276_v24  ;;  %v4269_v31 = vmul.f32 %v4654_v52, %v7091_v23  ;;  %4357 = vst [vmem:[#allocation3 + $0x8] sm:$0xff] %v7091_v23  ;;  %v7105_v43 = vadd.f32 %v4246_v59, %v4230_v46  ;;  %v2929_v36 = vpop.permute.xlu0 %2928 }
 0x43e   : > { %v5175_v57 = vpop.eup %5174  ;;  %v4729_v38 = vadd.f32 %v3728_v3, %v2924_v34  ;;  %v4065_v44 = vpop.f32.mrb[28].mxu0  ;;  %v4270_v0 = vmul.f32 %v4655_v58, %v7097_v40  ;;  %4358 = vst [vmem:[#allocation3 + $0x10] sm:$0xff] %v7097_v40  ;;  %v4731_v63 = vadd.f32 %v3730_v55, %v2929_v36  ;;  %v4231_v54 = vmul.f32 %v5173_v16, %v7001_v4 }
 0x43f   : > { %v5177_v26 = vpop.eup %5176  ;;  %v4728_v25 = vadd.f32 %v4727_v20, %v4065_v44  ;;  %v4067_v53 = vpop.f32.mrb[29].mxu0  ;;  %5188 = vpow2.f32 %v4661_v11  ;;  %v4277_v7 = vadd.f32 %v4722_v61, %v4269_v31  ;;  %v4271_v56 = vmul.f32 %v4656_v6, %v7105_v43  ;;  %4359 = vst [vmem:[#allocation3 + $0x18] sm:$0xff] %v7105_v43 }
 0x440   : > { %v5179_v18 = vpop.eup %5178  ;;  %v4730_v39 = vadd.f32 %v4729_v38, %v4067_v53  ;;  %v4069_v42 = vpop.f32.mrb[30].mxu0  ;;  %v4278_v35 = vadd.f32 %v4724_v51, %v4270_v0  ;;  %v7115_v41 = vadd.f32 %v4247_v22, %v4231_v54  ;;  %v4232_v4 = vmul.f32 %v5175_v57, %v7006_v48  ;;  %v4658_v51 = vld [vmem:[%s7165_s4 + $0xa8] sm:$0xff] }
 0x441   : > { %v5181_v1 = vpop.eup %5180  ;;  %v4071_v30 = vpop.f32.mrb[31].mxu0  ;;  %v4662_v47 = vmul.f32 -1.442695, %v4277_v7  ;;  %v4279_v21 = vadd.f32 %v4726_v33, %v4271_v56  ;;  %v4732_v61 = vadd.f32 %v4731_v63, %v4069_v42  ;;  %v4733_v5 = vadd.f32 %v3732_v45, %v2929_v36 }
 0x442   : > { %v5183_v17 = vpop.eup %5182  ;;  %v4248_v60 = vmul.f32 %v5181_v1, %v7069_v2  ;;  %v4663_v29 = vmul.f32 -1.442695, %v4278_v35  ;;  %v4272_v8 = vmul.f32 %v4657_v10, %v7115_v41  ;;  %4360 = vst [vmem:[#allocation3 + $0x20] sm:$0xff] %v7115_v41  ;;  %v4233_v48 = vmul.f32 %v5177_v26, %v7011_v32 }
 0x443   : > { %v5185_v62 = vpop.eup %5184  ;;  %5190 = vpow2.f32 %v4662_v47  ;;  %v4664_v9 = vmul.f32 -1.442695, %v4279_v21  ;;  %v4249_v28 = vmul.f32 %v5183_v17, %v7071_v27  ;;  %v4734_v33 = vadd.f32 %v4733_v5, %v4071_v30  ;;  %v4660_v27 = vld [vmem:[%s7165_s4 + $0xb8] sm:$0xff] }
 0x444   : > { %v4256_v49 = vadd.f32 %v4248_v60, %v4232_v4  ;;  %v5187_v2 = vpop.eup %5186  ;;  %5192 = vpow2.f32 %v4663_v29  ;;  %v4280_v15 = vadd.f32 %v4728_v25, %v4272_v8  ;;  %v4234_v46 = vmul.f32 %v5179_v18, %v7017_v37 }
 0x445   : > { %5194 = vpow2.f32 %v4664_v9  ;;  %v4257_v13 = vadd.f32 %v4249_v28, %v4233_v48  ;;  %v4250_v32 = vmul.f32 %v5187_v2, %v5185_v62 }
 0x446   : > { %v4273_v3 = vmul.f32 %v4658_v51, %v4256_v49  ;;  %4361 = vst [vmem:[#allocation3 + $0x28] sm:$0xff] %v4256_v49  ;;  %v4665_v52 = vmul.f32 -1.442695, %v4280_v15  ;;  %5196 = vtanh.f32 %v7079_v14 }
 0x447   : > { %v4274_v55 = vmul.f32 %v4659_v12, %v4257_v13  ;;  %4362 = vst [vmem:[#allocation3 + $0x30] sm:$0xff] %v4257_v13  ;;  %v4258_v19 = vadd.f32 %v4250_v32, %v4234_v46 }
 0x448   : > { %v4281_v50 = vadd.f32 %v4730_v39, %v4273_v3  ;;  %5198 = vpow2.f32 %v4665_v52 }
 0x449   : > { %v5189_v24 = vpop.eup %5188  ;;  %5200 = vtanh.f32 %v7091_v23  ;;  %v4282_v58 = vadd.f32 %v4732_v61, %v4274_v55  ;;  %v4275_v59 = vmul.f32 %v4660_v27, %v4258_v19  ;;  %4363 = vst [vmem:[#allocation3 + $0x38] sm:$0xff] %v4258_v19 }
 0x44a   : > { %v4666_v37 = vmul.f32 -1.442695, %v4281_v50  ;;  %v4308_v34 = vadd.f32 1.0, %v5189_v24  ;;  %5202 = vtanh.f32 %v7097_v40 }
 0x44b   : > { %v4667_v45 = vmul.f32 -1.442695, %v4282_v58  ;;  %v4283_v16 = vadd.f32 %v4734_v33, %v4275_v59 }
 0x44c   : > { %5204 = vpow2.f32 %v4666_v37 }
 0x44d   : > { %5206 = vrcp.f32 %v4308_v34  ;;  %v5191_v14 = vpop.eup %5190  ;;  %v4668_v6 = vmul.f32 -1.442695, %v4283_v16 }
 0x44e   : > { %5208 = vpow2.f32 %v4667_v45  ;;  %v5193_v20 = vpop.eup %5192  ;;  %v4309_v22 = vadd.f32 1.0, %v5191_v14 }
 0x44f   : > { %5210 = vtanh.f32 %v7105_v43  ;;  %v5195_v57 = vpop.eup %5194  ;;  %v4310_v23 = vadd.f32 1.0, %v5193_v20 }
 0x450   : > { %5212 = vpow2.f32 %v4668_v6  ;;  %v4311_v11 = vadd.f32 1.0, %v5195_v57  ;;  %v5197_v31 = vpop.eup %5196 }
 0x451   : > { %5214 = vrcp.f32 %v4309_v22 }
 0x452   : > { %5216 = vrcp.f32 %v4310_v23  ;;  %v5199_v38 = vpop.eup %5198 }
 0x453   : > { %5218 = vrcp.f32 %v4311_v11  ;;  %v5201_v40 = vpop.eup %5200  ;;  %v4312_v36 = vadd.f32 1.0, %v5199_v38 }
 0x454   : > { %v5203_v44 = vpop.eup %5202  ;;  %5220 = vtanh.f32 %v7115_v41 }
 0x455   : > { %5222 = vrcp.f32 %v4312_v36 }
 0x456   : > { %v5205_v26 = vpop.eup %5204  ;;  %5224 = vtanh.f32 %v4256_v49 }
 0x457   : > { %v5207_v0 = vpop.eup %5206  ;;  %v4313_v63 = vadd.f32 1.0, %v5205_v26 }
 0x458   : > { %v5209_v43 = vpop.eup %5208  ;;  %v4340_v25 = vmul.f32 %v5207_v0, %v5197_v31 }
 0x459   : > { %v5211_v54 = vpop.eup %5210  ;;  %5226 = vrcp.f32 %v4313_v63  ;;  %v4314_v53 = vadd.f32 1.0, %v5209_v43 }
 0x45a   : > { %v5213_v18 = vpop.eup %5212  ;;  %4348 = vst [vmem:[#allocation2] sm:$0xff] %v4340_v25  ;;  %4364 = vst [vmem:[%s5380_s14] sm:$0xff] %v4340_v25  ;;  %5228 = vtanh.f32 %v4257_v13 }
 0x45b   : > { %v5215_v7 = vpop.eup %5214  ;;  %5230 = vrcp.f32 %v4314_v53  ;;  %v4315_v56 = vadd.f32 1.0, %v5213_v18 }
 0x45c   : > { %v5217_v10 = vpop.eup %5216  ;;  %v4341_v39 = vmul.f32 %v5215_v7, %v5201_v40  ;;  %5232 = vtanh.f32 %v4258_v19 }
 0x45d   : > { %v5219_v42 = vpop.eup %5218  ;;  %v4342_v1 = vmul.f32 %v5217_v10, %v5203_v44  ;;  %5234 = vrcp.f32 %v4315_v56 }
 0x45e   : > { %4349 = vst [vmem:[#allocation2 + $0x8] sm:$0xff] %v4341_v39  ;;  %4365 = vst [vmem:[%s5380_s14 + $0x8] sm:$0xff] %v4341_v39  ;;  %v4343_v35 = vmul.f32 %v5219_v42, %v5211_v54  ;;  %v5221_v41 = vpop.eup %5220 }
 0x45f   : > { %4350 = vst [vmem:[#allocation2 + $0x10] sm:$0xff] %v4342_v1  ;;  %4366 = vst [vmem:[%s5380_s14 + $0x10] sm:$0xff] %v4342_v1  ;;  %v5223_v4 = vpop.eup %5222 }
 0x460   : > { %4351 = vst [vmem:[#allocation2 + $0x18] sm:$0xff] %v4343_v35  ;;  %4367 = vst [vmem:[%s5380_s14 + $0x18] sm:$0xff] %v4343_v35  ;;  %v4344_v30 = vmul.f32 %v5223_v4, %v5221_v41  ;;  %v5225_v17 = vpop.eup %5224 }
 0x462   : > { %4352 = vst [vmem:[#allocation2 + $0x20] sm:$0xff] %v4344_v30  ;;  %4368 = vst [vmem:[%s5380_s14 + $0x20] sm:$0xff] %v4344_v30 }
 0x463   : > { %v5227_v47 = vpop.eup %5226 }
 0x464   : > { %v5229_v21 = vpop.eup %5228  ;;  %v4345_v60 = vmul.f32 %v5227_v47, %v5225_v17 }
 0x465   : > { %v5231_v61 = vpop.eup %5230 }
 0x466   : > { %v5233_v62 = vpop.eup %5232  ;;  %4353 = vst [vmem:[#allocation2 + $0x28] sm:$0xff] %v4345_v60  ;;  %4369 = vst [vmem:[%s5380_s14 + $0x28] sm:$0xff] %v4345_v60  ;;  %v4346_v29 = vmul.f32 %v5231_v61, %v5229_v21 }
 0x467   : > { %v5235_v5 = vpop.eup %5234 }
 0x468   : > { %4354 = vst [vmem:[#allocation2 + $0x30] sm:$0xff] %v4346_v29  ;;  %4370 = vst [vmem:[%s5380_s14 + $0x30] sm:$0xff] %v4346_v29  ;;  %v4347_v8 = vmul.f32 %v5235_v5, %v5233_v62 }
 0x46a   : > { %4355 = vst [vmem:[#allocation2 + $0x38] sm:$0xff] %v4347_v8  ;;  %4371 = vst [vmem:[%s5380_s14 + $0x38] sm:$0xff] %v4347_v8 }
 0x46b PF: > { %s15_s22 = sadd.s32 1, %s5286_s22   ;;  %s7167_s18 = smov %s5278_s20 }
 0x46c   : > { %p12_p8 = scmp.ge.s32.totalorder %s15_s22, 10   ;;  %s7168_s19 = smov %s5282_s21 }
 0x46d   : > { %s7169_s20 = smov %s7172_s23  ;;  %s7170_s21 = smov %s7176_s24 }
 0x46e   :  { %14 = sbr.rel (!%p12_p8) target bundleno = 3 (0x3), region = 76 }

</bundles_post_ra>
